<compile_context>
chip_gen: v5e
topology: v5e:2x2
jax: 0.10.0
libtpu: 0.0.40
codegen_flags: <defaults>
</compile_context>

<pallas_src>
import numpy as np
import jax
import jax.numpy as jnp
from jax.experimental import pallas as pl
from jax.experimental.pallas import tpu as pltpu


def adaptive_pool_matrix(H, W, out_h=4, out_w=4):
    """(H*W, out_h*out_w) matrix reproducing nn.AdaptiveAvgPool2d((4,4)) bins."""
    M = np.zeros((H * W, out_h * out_w), dtype=np.float32)
    for p in range(out_h):
        h0 = (p * H) // out_h
        h1 = -(-((p + 1) * H) // out_h)      # ceil
        for q in range(out_w):
            w0 = (q * W) // out_w
            w1 = -(-((q + 1) * W) // out_w)  # ceil
            area = float((h1 - h0) * (w1 - w0))
            for hh in range(h0, h1):
                for ww in range(w0, w1):
                    M[hh * W + ww, p * out_w + q] = 1.0 / area
    return jnp.asarray(M)


# -----------------------------------------------------------------------------
# Fused kernel: adaptive-avg-pool (as matmul) + 1x1 conv + ReLU + fc1 + ReLU.
# Grid axis c ("parallel") = which 512-column half of w1/b1/z this step owns.
# Each step performs the full 2048-deep fc1 contraction for its half; on v7x
# the two halves run on the two TensorCores concurrently, each streaming its
# own 2 MiB bf16 w1 half from HBM.
# -----------------------------------------------------------------------------
def inception_aux_kernel(x_ref, mt_ref, wct_ref, bc_ref, w1_ref, b1_ref,
                         z_ref, h_ref):
    # x_ref  : (HW, N*C)         input, spatial-major so pooling is one matmul
    # mt_ref : (16, HW)          transposed adaptive-avg-pool matrix
    # wct_ref: (C, 128)          1x1 conv weight, transposed (out chans on lanes)
    # bc_ref : (1, 128)          conv bias (lane broadcast)
    # w1_ref : (2048, tn) bf16   this step's column half of the permuted fc1 weight
    # b1_ref : (1, tn)           this step's half of the fc1 bias
    # z_ref  : (N, tn)           output: relu(fc1) for this column half
    # h_ref  : VMEM (N, 2048)    flattened conv output, column index = k*128 + o
    c_in = wct_ref.shape[0]
    n_batch = h_ref.shape[0]
    n_pos = mt_ref.shape[0]                     # 16 pooled positions

    # Adaptive avg-pool for the whole batch: (16, HW) @ (HW, N*C) -> (16, N*C)
    # (contraction over the long HW axis -> good MXU shape).
    pooled_t = jnp.dot(mt_ref[...], x_ref[...],
                       preferred_element_type=jnp.float32)
    wct = wct_ref[...]
    bc = bc_ref[...]
    for n in range(n_batch):                    # N is small & static
        # 1x1 conv, transposed: (16, C) @ (C, 128) -> (16, 128); the 128
        # output channels land on lanes, bias is a cheap lane broadcast.
        y = jnp.dot(pooled_t[:, n * c_in:(n + 1) * c_in], wct,
                    preferred_element_type=jnp.float32) + bc
        y = jnp.maximum(y, 0.0)                 # (16, 128)
        # Flatten into h[n, k*128 + o] with fully static, lane-dense stores
        # (w1 rows were permuted in the wrapper to match this order).
        for k in range(n_pos):
            h_ref[n:n + 1, k * 128:(k + 1) * 128] = y[k:k + 1, :]

    # fc1 for this column half: (N, 2048)bf16 @ (2048, tn)bf16 -> f32 accum.
    z = jnp.dot(h_ref[...].astype(jnp.bfloat16), w1_ref[...],
                preferred_element_type=jnp.float32)
    z_ref[...] = jnp.maximum(z + b1_ref[...], 0.0)


def inception_aux_forward(x, params, *, col_splits=2):
    N, C, H, W = x.shape
    HW = H * W
    num_classes = params["b2"].shape[0]
    hidden = params["w1"].shape[1]              # 1024
    assert params["w1"].shape[0] == 2048 and hidden % col_splits == 0
    tn = hidden // col_splits

    # ---- one-time wrapper-side layout prep (XLA ops, outside the kernel) ----
    mt = adaptive_pool_matrix(H, W).T                           # (16, HW)
    # NCHW -> (HW, N*C): pooling contraction axis first, batch*channels on lanes.
    # TODO(synk): at production shapes, replace with a free (N*C, HW) reshape
    # plus a small in-kernel pooled-block transpose to avoid this HBM pass.
    x_t = x.transpose(2, 3, 0, 1).reshape(HW, N * C)
    wct = params["wc"].T                                        # (C, 128)
    bc = params["bc"].reshape(1, 128)
    # Permute fc1 rows from torch flatten order (o*16 + k) to the kernel's
    # lane-dense order (k*128 + o), then cast to bf16: w1 is the only large
    # HBM stream, so halving it ~halves kernel wall-clock on every generation.
    w1p = (params["w1"].reshape(128, 16, hidden)
           .transpose(1, 0, 2)
           .reshape(2048, hidden)
           .astype(jnp.bfloat16))
    b1 = params["b1"].reshape(1, hidden)

    z = pl.pallas_call(
        inception_aux_kernel,
        out_shape=jax.ShapeDtypeStruct((N, hidden), jnp.float32),
        grid_spec=pltpu.PrefetchScalarGridSpec(
            num_scalar_prefetch=0,
            grid=(col_splits,),
            in_specs=[
                pl.BlockSpec((HW, N * C), lambda c: (0, 0)),    # x_t (resident)
                pl.BlockSpec((16, HW), lambda c: (0, 0)),       # pool matrix^T
                pl.BlockSpec((C, 128), lambda c: (0, 0)),       # conv weight^T
                pl.BlockSpec((1, 128), lambda c: (0, 0)),       # conv bias
                pl.BlockSpec((2048, tn), lambda c: (0, c)),     # w1 column half (bf16)
                pl.BlockSpec((1, tn), lambda c: (0, c)),        # fc1 bias half
            ],
            out_specs=pl.BlockSpec((N, tn), lambda c: (0, c)),
            scratch_shapes=[
                pltpu.VMEM((N, 2048), jnp.float32),             # flattened conv out
            ],
        ),
        compiler_params=pltpu.CompilerParams(
            # Independent column halves -> shard across TensorCores on v7x.
            dimension_semantics=("parallel",),
        ),
    )(x_t, mt, wct, bc, w1p, b1)

    # TODO(synk): Dropout(p=0.7) uses eval-mode (identity) semantics.
    # fc2 is a tiny (N,1024)@(1024,num_classes) matmul; left to XLA so each
    # TensorCore only has to produce its lane-dense half of z.
    return z @ params["w2"] + params["b2"]


def reference_forward(x, params):
    """Pure-JAX f32 reference matching the PyTorch forward (eval mode)."""
    N, C, H, W = x.shape
    M = adaptive_pool_matrix(H, W)
    pooled = jnp.einsum("ncs,sk->nck", x.reshape(N, C, H * W), M)          # (N,C,16)
    conv = jnp.einsum("oc,nck->nok", params["wc"], pooled) + params["bc"][None, :, None]
    conv = jnp.maximum(conv, 0.0)                                          # (N,128,16)
    h = conv.reshape(N, 2048)
    z = jnp.maximum(h @ params["w1"] + params["b1"], 0.0)
    return z @ params["w2"] + params["b2"]


if __name__ == "__main__":
    N, C, H, W = 2, 4, 16, 16
    NUM_CLASSES = 10

    key = jax.random.PRNGKey(0)
    kx, kwc, kbc, kw1, kb1, kw2, kb2 = jax.random.split(key, 7)

    x = jax.random.normal(kx, (N, C, H, W), dtype=jnp.float32)

    params = {
        # Conv2d(C, 128, kernel_size=1): weight (128, C), bias (128,)
        "wc": jax.random.normal(kwc, (128, C), dtype=jnp.float32) * 0.1,
        "bc": jax.random.normal(kbc, (128,), dtype=jnp.float32) * 0.1,
        # Linear(2048, 1024): stored as (in, out) so forward is h @ w1 + b1
        "w1": jax.random.normal(kw1, (2048, 1024), dtype=jnp.float32) * 0.02,
        "b1": jax.random.normal(kb1, (1024,), dtype=jnp.float32) * 0.02,
        # Linear(1024, num_classes)
        "w2": jax.random.normal(kw2, (1024, NUM_CLASSES), dtype=jnp.float32) * 0.02,
        "b2": jax.random.normal(kb2, (NUM_CLASSES,), dtype=jnp.float32) * 0.02,
    }

    out = inception_aux_forward(x, params)
    out = jax.block_until_ready(out)

    ref = reference_forward(x, params)
    assert out.shape == (N, NUM_CLASSES)
    # Tolerance relaxed vs. the f32 reference because fc1 streams w1 in bf16
    # (f32 accumulation preserved).
    np.testing.assert_allclose(np.asarray(out), np.asarray(ref), rtol=2e-2, atol=5e-3)

    print("KERNEL_OK")
</pallas_src>

<mosaic_0001>
module attributes {stable_mosaic.version = 11 : i64} {
  func.func @inception_aux_kernel(%arg0: i32, %arg1: memref<256x8xf32, #tpu.memory_space<vmem>>, %arg2: memref<16x256xf32, #tpu.memory_space<vmem>>, %arg3: memref<4x128xf32, #tpu.memory_space<vmem>>, %arg4: memref<1x128xf32, #tpu.memory_space<vmem>>, %arg5: memref<2048x512xbf16, #tpu.memory_space<vmem>>, %arg6: memref<1x512xf32, #tpu.memory_space<vmem>>, %arg7: memref<2x512xf32, #tpu.memory_space<vmem>>, %arg8: memref<2x2048xf32, #tpu.memory_space<vmem>>) attributes {dimension_semantics = [#tpu.dimension_semantics<parallel>], iteration_bounds = array<i64: 2>, scalar_prefetch = 0 : i64, scratch_operands = 1 : i64, tpu.core_type = #tpu.core_type<tc>, window_params = [{pipeline_mode = #tpu.pipeline_mode<synchronous>, transform_indices = @transform_0, window_bounds = array<i64: 256, 8>}, {pipeline_mode = #tpu.pipeline_mode<synchronous>, transform_indices = @transform_1, window_bounds = array<i64: 16, 256>}, {pipeline_mode = #tpu.pipeline_mode<synchronous>, transform_indices = @transform_2, window_bounds = array<i64: 4, 128>}, {pipeline_mode = #tpu.pipeline_mode<synchronous>, transform_indices = @transform_3, window_bounds = array<i64: 1, 128>}, {transform_indices = @transform_4, window_bounds = array<i64: 2048, 512>}, {transform_indices = @transform_5, window_bounds = array<i64: 1, 512>}, {transform_indices = @transform_6, window_bounds = array<i64: 2, 512>}]} {
    %c0 = arith.constant 0 : index
    %c0_0 = arith.constant 0 : index
    %0 = vector.load %arg2[%c0, %c0_0] : memref<16x256xf32, #tpu.memory_space<vmem>>, vector<16x256xf32>
    %c0_1 = arith.constant 0 : index
    %c0_2 = arith.constant 0 : index
    %1 = vector.load %arg1[%c0_1, %c0_2] : memref<256x8xf32, #tpu.memory_space<vmem>>, vector<256x8xf32>
    %cst = arith.constant dense<0.000000e+00> : vector<16x8xf32>
    %2 = tpu.matmul %0, %1, %cst {dimension_numbers = #tpu.dot_dimension_numbers<[1], [0], [0], [1], [0, 0, 1, 1], [], []>} : vector<16x256xf32>, vector<256x8xf32>, vector<16x8xf32> -> vector<16x8xf32>
    %c0_3 = arith.constant 0 : index
    %c0_4 = arith.constant 0 : index
    %3 = vector.load %arg3[%c0_3, %c0_4] : memref<4x128xf32, #tpu.memory_space<vmem>>, vector<4x128xf32>
    %c0_5 = arith.constant 0 : index
    %c0_6 = arith.constant 0 : index
    %4 = vector.load %arg4[%c0_5, %c0_6] : memref<1x128xf32, #tpu.memory_space<vmem>>, vector<1x128xf32>
    %5 = vector.extract_strided_slice %2 {offsets = [0, 0], sizes = [16, 4], strides = [1, 1]} : vector<16x8xf32> to vector<16x4xf32>
    %cst_7 = arith.constant dense<0.000000e+00> : vector<16x128xf32>
    %6 = tpu.matmul %5, %3, %cst_7 {dimension_numbers = #tpu.dot_dimension_numbers<[1], [0], [0], [1], [0, 0, 1, 1], [], []>} : vector<16x4xf32>, vector<4x128xf32>, vector<16x128xf32> -> vector<16x128xf32>
    %7 = vector.broadcast %4 : vector<1x128xf32> to vector<16x128xf32>
    %8 = arith.addf %6, %7 : vector<16x128xf32>
    %cst_8 = arith.constant 0.000000e+00 : f32
    %9 = vector.broadcast %cst_8 : f32 to vector<16x128xf32>
    %10 = arith.maximumf %8, %9 : vector<16x128xf32>
    %11 = vector.extract_strided_slice %10 {offsets = [0, 0], sizes = [1, 128], strides = [1, 1]} : vector<16x128xf32> to vector<1x128xf32>
    %c0_9 = arith.constant 0 : index
    %c0_10 = arith.constant 0 : index
    %12 = vector.load %arg8[%c0_9, %c0_10] : memref<2x2048xf32, #tpu.memory_space<vmem>>, vector<1x128xf32>
    tpu.vector_store %arg8[%c0_9, %c0_10], %11 {strides = array<i32>} : memref<2x2048xf32, #tpu.memory_space<vmem>>, vector<1x128xf32>,
    %13 = vector.extract_strided_slice %10 {offsets = [1, 0], sizes = [1, 128], strides = [1, 1]} : vector<16x128xf32> to vector<1x128xf32>
    %c0_11 = arith.constant 0 : index
    %c128 = arith.constant 128 : index
    %14 = vector.load %arg8[%c0_11, %c128] : memref<2x2048xf32, #tpu.memory_space<vmem>>, vector<1x128xf32>
    tpu.vector_store %arg8[%c0_11, %c128], %13 {strides = array<i32>} : memref<2x2048xf32, #tpu.memory_space<vmem>>, vector<1x128xf32>,
    %15 = vector.extract_strided_slice %10 {offsets = [2, 0], sizes = [1, 128], strides = [1, 1]} : vector<16x128xf32> to vector<1x128xf32>
    %c0_12 = arith.constant 0 : index
    %c256 = arith.constant 256 : index
    %16 = vector.load %arg8[%c0_12, %c256] : memref<2x2048xf32, #tpu.memory_space<vmem>>, vector<1x128xf32>
    tpu.vector_store %arg8[%c0_12, %c256], %15 {strides = array<i32>} : memref<2x2048xf32, #tpu.memory_space<vmem>>, vector<1x128xf32>,
    %17 = vector.extract_strided_slice %10 {offsets = [3, 0], sizes = [1, 128], strides = [1, 1]} : vector<16x128xf32> to vector<1x128xf32>
    %c0_13 = arith.constant 0 : index
    %c384 = arith.constant 384 : index
    %18 = vector.load %arg8[%c0_13, %c384] : memref<2x2048xf32, #tpu.memory_space<vmem>>, vector<1x128xf32>
    tpu.vector_store %arg8[%c0_13, %c384], %17 {strides = array<i32>} : memref<2x2048xf32, #tpu.memory_space<vmem>>, vector<1x128xf32>,
    %19 = vector.extract_strided_slice %10 {offsets = [4, 0], sizes = [1, 128], strides = [1, 1]} : vector<16x128xf32> to vector<1x128xf32>
    %c0_14 = arith.constant 0 : index
    %c512 = arith.constant 512 : index
    %20 = vector.load %arg8[%c0_14, %c512] : memref<2x2048xf32, #tpu.memory_space<vmem>>, vector<1x128xf32>
    tpu.vector_store %arg8[%c0_14, %c512], %19 {strides = array<i32>} : memref<2x2048xf32, #tpu.memory_space<vmem>>, vector<1x128xf32>,
    %21 = vector.extract_strided_slice %10 {offsets = [5, 0], sizes = [1, 128], strides = [1, 1]} : vector<16x128xf32> to vector<1x128xf32>
    %c0_15 = arith.constant 0 : index
    %c640 = arith.constant 640 : index
    %22 = vector.load %arg8[%c0_15, %c640] : memref<2x2048xf32, #tpu.memory_space<vmem>>, vector<1x128xf32>
    tpu.vector_store %arg8[%c0_15, %c640], %21 {strides = array<i32>} : memref<2x2048xf32, #tpu.memory_space<vmem>>, vector<1x128xf32>,
    %23 = vector.extract_strided_slice %10 {offsets = [6, 0], sizes = [1, 128], strides = [1, 1]} : vector<16x128xf32> to vector<1x128xf32>
    %c0_16 = arith.constant 0 : index
    %c768 = arith.constant 768 : index
    %24 = vector.load %arg8[%c0_16, %c768] : memref<2x2048xf32, #tpu.memory_space<vmem>>, vector<1x128xf32>
    tpu.vector_store %arg8[%c0_16, %c768], %23 {strides = array<i32>} : memref<2x2048xf32, #tpu.memory_space<vmem>>, vector<1x128xf32>,
    %25 = vector.extract_strided_slice %10 {offsets = [7, 0], sizes = [1, 128], strides = [1, 1]} : vector<16x128xf32> to vector<1x128xf32>
    %c0_17 = arith.constant 0 : index
    %c896 = arith.constant 896 : index
    %26 = vector.load %arg8[%c0_17, %c896] : memref<2x2048xf32, #tpu.memory_space<vmem>>, vector<1x128xf32>
    tpu.vector_store %arg8[%c0_17, %c896], %25 {strides = array<i32>} : memref<2x2048xf32, #tpu.memory_space<vmem>>, vector<1x128xf32>,
    %27 = vector.extract_strided_slice %10 {offsets = [8, 0], sizes = [1, 128], strides = [1, 1]} : vector<16x128xf32> to vector<1x128xf32>
    %c0_18 = arith.constant 0 : index
    %c1024 = arith.constant 1024 : index
    %28 = vector.load %arg8[%c0_18, %c1024] : memref<2x2048xf32, #tpu.memory_space<vmem>>, vector<1x128xf32>
    tpu.vector_store %arg8[%c0_18, %c1024], %27 {strides = array<i32>} : memref<2x2048xf32, #tpu.memory_space<vmem>>, vector<1x128xf32>,
    %29 = vector.extract_strided_slice %10 {offsets = [9, 0], sizes = [1, 128], strides = [1, 1]} : vector<16x128xf32> to vector<1x128xf32>
    %c0_19 = arith.constant 0 : index
    %c1152 = arith.constant 1152 : index
    %30 = vector.load %arg8[%c0_19, %c1152] : memref<2x2048xf32, #tpu.memory_space<vmem>>, vector<1x128xf32>
    tpu.vector_store %arg8[%c0_19, %c1152], %29 {strides = array<i32>} : memref<2x2048xf32, #tpu.memory_space<vmem>>, vector<1x128xf32>,
    %31 = vector.extract_strided_slice %10 {offsets = [10, 0], sizes = [1, 128], strides = [1, 1]} : vector<16x128xf32> to vector<1x128xf32>
    %c0_20 = arith.constant 0 : index
    %c1280 = arith.constant 1280 : index
    %32 = vector.load %arg8[%c0_20, %c1280] : memref<2x2048xf32, #tpu.memory_space<vmem>>, vector<1x128xf32>
    tpu.vector_store %arg8[%c0_20, %c1280], %31 {strides = array<i32>} : memref<2x2048xf32, #tpu.memory_space<vmem>>, vector<1x128xf32>,
    %33 = vector.extract_strided_slice %10 {offsets = [11, 0], sizes = [1, 128], strides = [1, 1]} : vector<16x128xf32> to vector<1x128xf32>
    %c0_21 = arith.constant 0 : index
    %c1408 = arith.constant 1408 : index
    %34 = vector.load %arg8[%c0_21, %c1408] : memref<2x2048xf32, #tpu.memory_space<vmem>>, vector<1x128xf32>
    tpu.vector_store %arg8[%c0_21, %c1408], %33 {strides = array<i32>} : memref<2x2048xf32, #tpu.memory_space<vmem>>, vector<1x128xf32>,
    %35 = vector.extract_strided_slice %10 {offsets = [12, 0], sizes = [1, 128], strides = [1, 1]} : vector<16x128xf32> to vector<1x128xf32>
    %c0_22 = arith.constant 0 : index
    %c1536 = arith.constant 1536 : index
    %36 = vector.load %arg8[%c0_22, %c1536] : memref<2x2048xf32, #tpu.memory_space<vmem>>, vector<1x128xf32>
    tpu.vector_store %arg8[%c0_22, %c1536], %35 {strides = array<i32>} : memref<2x2048xf32, #tpu.memory_space<vmem>>, vector<1x128xf32>,
    %37 = vector.extract_strided_slice %10 {offsets = [13, 0], sizes = [1, 128], strides = [1, 1]} : vector<16x128xf32> to vector<1x128xf32>
    %c0_23 = arith.constant 0 : index
    %c1664 = arith.constant 1664 : index
    %38 = vector.load %arg8[%c0_23, %c1664] : memref<2x2048xf32, #tpu.memory_space<vmem>>, vector<1x128xf32>
    tpu.vector_store %arg8[%c0_23, %c1664], %37 {strides = array<i32>} : memref<2x2048xf32, #tpu.memory_space<vmem>>, vector<1x128xf32>,
    %39 = vector.extract_strided_slice %10 {offsets = [14, 0], sizes = [1, 128], strides = [1, 1]} : vector<16x128xf32> to vector<1x128xf32>
    %c0_24 = arith.constant 0 : index
    %c1792 = arith.constant 1792 : index
    %40 = vector.load %arg8[%c0_24, %c1792] : memref<2x2048xf32, #tpu.memory_space<vmem>>, vector<1x128xf32>
    tpu.vector_store %arg8[%c0_24, %c1792], %39 {strides = array<i32>} : memref<2x2048xf32, #tpu.memory_space<vmem>>, vector<1x128xf32>,
    %41 = vector.extract_strided_slice %10 {offsets = [15, 0], sizes = [1, 128], strides = [1, 1]} : vector<16x128xf32> to vector<1x128xf32>
    %c0_25 = arith.constant 0 : index
    %c1920 = arith.constant 1920 : index
    %42 = vector.load %arg8[%c0_25, %c1920] : memref<2x2048xf32, #tpu.memory_space<vmem>>, vector<1x128xf32>
    tpu.vector_store %arg8[%c0_25, %c1920], %41 {strides = array<i32>} : memref<2x2048xf32, #tpu.memory_space<vmem>>, vector<1x128xf32>,
    %43 = vector.extract_strided_slice %2 {offsets = [0, 4], sizes = [16, 4], strides = [1, 1]} : vector<16x8xf32> to vector<16x4xf32>
    %cst_26 = arith.constant dense<0.000000e+00> : vector<16x128xf32>
    %44 = tpu.matmul %43, %3, %cst_26 {dimension_numbers = #tpu.dot_dimension_numbers<[1], [0], [0], [1], [0, 0, 1, 1], [], []>} : vector<16x4xf32>, vector<4x128xf32>, vector<16x128xf32> -> vector<16x128xf32>
    %45 = vector.broadcast %4 : vector<1x128xf32> to vector<16x128xf32>
    %46 = arith.addf %44, %45 : vector<16x128xf32>
    %cst_27 = arith.constant 0.000000e+00 : f32
    %47 = vector.broadcast %cst_27 : f32 to vector<16x128xf32>
    %48 = arith.maximumf %46, %47 : vector<16x128xf32>
    %49 = vector.extract_strided_slice %48 {offsets = [0, 0], sizes = [1, 128], strides = [1, 1]} : vector<16x128xf32> to vector<1x128xf32>
    %c1 = arith.constant 1 : index
    %c0_28 = arith.constant 0 : index
    %50 = vector.load %arg8[%c1, %c0_28] : memref<2x2048xf32, #tpu.memory_space<vmem>>, vector<1x128xf32>
    tpu.vector_store %arg8[%c1, %c0_28], %49 {strides = array<i32>} : memref<2x2048xf32, #tpu.memory_space<vmem>>, vector<1x128xf32>,
    %51 = vector.extract_strided_slice %48 {offsets = [1, 0], sizes = [1, 128], strides = [1, 1]} : vector<16x128xf32> to vector<1x128xf32>
    %c1_29 = arith.constant 1 : index
    %c128_30 = arith.constant 128 : index
    %52 = vector.load %arg8[%c1_29, %c128_30] : memref<2x2048xf32, #tpu.memory_space<vmem>>, vector<1x128xf32>
    tpu.vector_store %arg8[%c1_29, %c128_30], %51 {strides = array<i32>} : memref<2x2048xf32, #tpu.memory_space<vmem>>, vector<1x128xf32>,
    %53 = vector.extract_strided_slice %48 {offsets = [2, 0], sizes = [1, 128], strides = [1, 1]} : vector<16x128xf32> to vector<1x128xf32>
    %c1_31 = arith.constant 1 : index
    %c256_32 = arith.constant 256 : index
    %54 = vector.load %arg8[%c1_31, %c256_32] : memref<2x2048xf32, #tpu.memory_space<vmem>>, vector<1x128xf32>
    tpu.vector_store %arg8[%c1_31, %c256_32], %53 {strides = array<i32>} : memref<2x2048xf32, #tpu.memory_space<vmem>>, vector<1x128xf32>,
    %55 = vector.extract_strided_slice %48 {offsets = [3, 0], sizes = [1, 128], strides = [1, 1]} : vector<16x128xf32> to vector<1x128xf32>
    %c1_33 = arith.constant 1 : index
    %c384_34 = arith.constant 384 : index
    %56 = vector.load %arg8[%c1_33, %c384_34] : memref<2x2048xf32, #tpu.memory_space<vmem>>, vector<1x128xf32>
    tpu.vector_store %arg8[%c1_33, %c384_34], %55 {strides = array<i32>} : memref<2x2048xf32, #tpu.memory_space<vmem>>, vector<1x128xf32>,
    %57 = vector.extract_strided_slice %48 {offsets = [4, 0], sizes = [1, 128], strides = [1, 1]} : vector<16x128xf32> to vector<1x128xf32>
    %c1_35 = arith.constant 1 : index
    %c512_36 = arith.constant 512 : index
    %58 = vector.load %arg8[%c1_35, %c512_36] : memref<2x2048xf32, #tpu.memory_space<vmem>>, vector<1x128xf32>
    tpu.vector_store %arg8[%c1_35, %c512_36], %57 {strides = array<i32>} : memref<2x2048xf32, #tpu.memory_space<vmem>>, vector<1x128xf32>,
    %59 = vector.extract_strided_slice %48 {offsets = [5, 0], sizes = [1, 128], strides = [1, 1]} : vector<16x128xf32> to vector<1x128xf32>
    %c1_37 = arith.constant 1 : index
    %c640_38 = arith.constant 640 : index
    %60 = vector.load %arg8[%c1_37, %c640_38] : memref<2x2048xf32, #tpu.memory_space<vmem>>, vector<1x128xf32>
    tpu.vector_store %arg8[%c1_37, %c640_38], %59 {strides = array<i32>} : memref<2x2048xf32, #tpu.memory_space<vmem>>, vector<1x128xf32>,
    %61 = vector.extract_strided_slice %48 {offsets = [6, 0], sizes = [1, 128], strides = [1, 1]} : vector<16x128xf32> to vector<1x128xf32>
    %c1_39 = arith.constant 1 : index
    %c768_40 = arith.constant 768 : index
    %62 = vector.load %arg8[%c1_39, %c768_40] : memref<2x2048xf32, #tpu.memory_space<vmem>>, vector<1x128xf32>
    tpu.vector_store %arg8[%c1_39, %c768_40], %61 {strides = array<i32>} : memref<2x2048xf32, #tpu.memory_space<vmem>>, vector<1x128xf32>,
    %63 = vector.extract_strided_slice %48 {offsets = [7, 0], sizes = [1, 128], strides = [1, 1]} : vector<16x128xf32> to vector<1x128xf32>
    %c1_41 = arith.constant 1 : index
    %c896_42 = arith.constant 896 : index
    %64 = vector.load %arg8[%c1_41, %c896_42] : memref<2x2048xf32, #tpu.memory_space<vmem>>, vector<1x128xf32>
    tpu.vector_store %arg8[%c1_41, %c896_42], %63 {strides = array<i32>} : memref<2x2048xf32, #tpu.memory_space<vmem>>, vector<1x128xf32>,
    %65 = vector.extract_strided_slice %48 {offsets = [8, 0], sizes = [1, 128], strides = [1, 1]} : vector<16x128xf32> to vector<1x128xf32>
    %c1_43 = arith.constant 1 : index
    %c1024_44 = arith.constant 1024 : index
    %66 = vector.load %arg8[%c1_43, %c1024_44] : memref<2x2048xf32, #tpu.memory_space<vmem>>, vector<1x128xf32>
    tpu.vector_store %arg8[%c1_43, %c1024_44], %65 {strides = array<i32>} : memref<2x2048xf32, #tpu.memory_space<vmem>>, vector<1x128xf32>,
    %67 = vector.extract_strided_slice %48 {offsets = [9, 0], sizes = [1, 128], strides = [1, 1]} : vector<16x128xf32> to vector<1x128xf32>
    %c1_45 = arith.constant 1 : index
    %c1152_46 = arith.constant 1152 : index
    %68 = vector.load %arg8[%c1_45, %c1152_46] : memref<2x2048xf32, #tpu.memory_space<vmem>>, vector<1x128xf32>
    tpu.vector_store %arg8[%c1_45, %c1152_46], %67 {strides = array<i32>} : memref<2x2048xf32, #tpu.memory_space<vmem>>, vector<1x128xf32>,
    %69 = vector.extract_strided_slice %48 {offsets = [10, 0], sizes = [1, 128], strides = [1, 1]} : vector<16x128xf32> to vector<1x128xf32>
    %c1_47 = arith.constant 1 : index
    %c1280_48 = arith.constant 1280 : index
    %70 = vector.load %arg8[%c1_47, %c1280_48] : memref<2x2048xf32, #tpu.memory_space<vmem>>, vector<1x128xf32>
    tpu.vector_store %arg8[%c1_47, %c1280_48], %69 {strides = array<i32>} : memref<2x2048xf32, #tpu.memory_space<vmem>>, vector<1x128xf32>,
    %71 = vector.extract_strided_slice %48 {offsets = [11, 0], sizes = [1, 128], strides = [1, 1]} : vector<16x128xf32> to vector<1x128xf32>
    %c1_49 = arith.constant 1 : index
    %c1408_50 = arith.constant 1408 : index
    %72 = vector.load %arg8[%c1_49, %c1408_50] : memref<2x2048xf32, #tpu.memory_space<vmem>>, vector<1x128xf32>
    tpu.vector_store %arg8[%c1_49, %c1408_50], %71 {strides = array<i32>} : memref<2x2048xf32, #tpu.memory_space<vmem>>, vector<1x128xf32>,
    %73 = vector.extract_strided_slice %48 {offsets = [12, 0], sizes = [1, 128], strides = [1, 1]} : vector<16x128xf32> to vector<1x128xf32>
    %c1_51 = arith.constant 1 : index
    %c1536_52 = arith.constant 1536 : index
    %74 = vector.load %arg8[%c1_51, %c1536_52] : memref<2x2048xf32, #tpu.memory_space<vmem>>, vector<1x128xf32>
    tpu.vector_store %arg8[%c1_51, %c1536_52], %73 {strides = array<i32>} : memref<2x2048xf32, #tpu.memory_space<vmem>>, vector<1x128xf32>,
    %75 = vector.extract_strided_slice %48 {offsets = [13, 0], sizes = [1, 128], strides = [1, 1]} : vector<16x128xf32> to vector<1x128xf32>
    %c1_53 = arith.constant 1 : index
    %c1664_54 = arith.constant 1664 : index
    %76 = vector.load %arg8[%c1_53, %c1664_54] : memref<2x2048xf32, #tpu.memory_space<vmem>>, vector<1x128xf32>
    tpu.vector_store %arg8[%c1_53, %c1664_54], %75 {strides = array<i32>} : memref<2x2048xf32, #tpu.memory_space<vmem>>, vector<1x128xf32>,
    %77 = vector.extract_strided_slice %48 {offsets = [14, 0], sizes = [1, 128], strides = [1, 1]} : vector<16x128xf32> to vector<1x128xf32>
    %c1_55 = arith.constant 1 : index
    %c1792_56 = arith.constant 1792 : index
    %78 = vector.load %arg8[%c1_55, %c1792_56] : memref<2x2048xf32, #tpu.memory_space<vmem>>, vector<1x128xf32>
    tpu.vector_store %arg8[%c1_55, %c1792_56], %77 {strides = array<i32>} : memref<2x2048xf32, #tpu.memory_space<vmem>>, vector<1x128xf32>,
    %79 = vector.extract_strided_slice %48 {offsets = [15, 0], sizes = [1, 128], strides = [1, 1]} : vector<16x128xf32> to vector<1x128xf32>
    %c1_57 = arith.constant 1 : index
    %c1920_58 = arith.constant 1920 : index
    %80 = vector.load %arg8[%c1_57, %c1920_58] : memref<2x2048xf32, #tpu.memory_space<vmem>>, vector<1x128xf32>
    tpu.vector_store %arg8[%c1_57, %c1920_58], %79 {strides = array<i32>} : memref<2x2048xf32, #tpu.memory_space<vmem>>, vector<1x128xf32>,
    %c0_59 = arith.constant 0 : index
    %c0_60 = arith.constant 0 : index
    %81 = vector.load %arg8[%c0_59, %c0_60] : memref<2x2048xf32, #tpu.memory_space<vmem>>, vector<2x2048xf32>
    %82 = arith.truncf %81 : vector<2x2048xf32> to vector<2x2048xbf16>
    %c0_61 = arith.constant 0 : index
    %c0_62 = arith.constant 0 : index
    %83 = vector.load %arg5[%c0_61, %c0_62] : memref<2048x512xbf16, #tpu.memory_space<vmem>>, vector<2048x512xbf16>
    %cst_63 = arith.constant dense<0.000000e+00> : vector<2x512xf32>
    %84 = tpu.matmul %82, %83, %cst_63 {dimension_numbers = #tpu.dot_dimension_numbers<[1], [0], [0], [1], [0, 0, 1, 1], [], []>} : vector<2x2048xbf16>, vector<2048x512xbf16>, vector<2x512xf32> -> vector<2x512xf32>
    %c0_64 = arith.constant 0 : index
    %c0_65 = arith.constant 0 : index
    %85 = vector.load %arg6[%c0_64, %c0_65] : memref<1x512xf32, #tpu.memory_space<vmem>>, vector<1x512xf32>
    %86 = vector.broadcast %85 : vector<1x512xf32> to vector<2x512xf32>
    %87 = arith.addf %84, %86 : vector<2x512xf32>
    %cst_66 = arith.constant 0.000000e+00 : f32
    %88 = vector.broadcast %cst_66 : f32 to vector<2x512xf32>
    %89 = arith.maximumf %87, %88 : vector<2x512xf32>
    %c0_67 = arith.constant 0 : index
    %c0_68 = arith.constant 0 : index
    %90 = vector.load %arg7[%c0_67, %c0_68] : memref<2x512xf32, #tpu.memory_space<vmem>>, vector<2x512xf32>
    tpu.vector_store %arg7[%c0_67, %c0_68], %89 {strides = array<i32>} : memref<2x512xf32, #tpu.memory_space<vmem>>, vector<2x512xf32>,
    return
  }
  func.func @transform_0(%arg0: i32) -> (i32, i32) {
    %c0_i32 = arith.constant 0 : i32
    %c0_i32_0 = arith.constant 0 : i32
    %c0_i32_1 = arith.constant 0 : i32
    return %c0_i32, %c0_i32_0 : i32, i32
  }
  func.func @transform_1(%arg0: i32) -> (i32, i32) {
    %c0_i32 = arith.constant 0 : i32
    %c0_i32_0 = arith.constant 0 : i32
    %c0_i32_1 = arith.constant 0 : i32
    return %c0_i32, %c0_i32_0 : i32, i32
  }
  func.func @transform_2(%arg0: i32) -> (i32, i32) {
    %c0_i32 = arith.constant 0 : i32
    %c0_i32_0 = arith.constant 0 : i32
    %c0_i32_1 = arith.constant 0 : i32
    return %c0_i32, %c0_i32_0 : i32, i32
  }
  func.func @transform_3(%arg0: i32) -> (i32, i32) {
    %c0_i32 = arith.constant 0 : i32
    %c0_i32_0 = arith.constant 0 : i32
    %c0_i32_1 = arith.constant 0 : i32
    return %c0_i32, %c0_i32_0 : i32, i32
  }
  func.func @transform_4(%arg0: i32) -> (i32, i32) {
    %c0_i32 = arith.constant 0 : i32
    %c0_i32_0 = arith.constant 0 : i32
    return %c0_i32, %arg0 : i32, i32
  }
  func.func @transform_5(%arg0: i32) -> (i32, i32) {
    %c0_i32 = arith.constant 0 : i32
    %c0_i32_0 = arith.constant 0 : i32
    return %c0_i32, %arg0 : i32, i32
  }
  func.func @transform_6(%arg0: i32) -> (i32, i32) {
    %c0_i32 = arith.constant 0 : i32
    %c0_i32_0 = arith.constant 0 : i32
    return %c0_i32, %arg0 : i32, i32
  }
}

</mosaic_0001>

<bundles_post_ra>
// kernel: tpu_custom_call.1
= control target key start
LH: loop header
LB: loop body
LE: loop exit
PB: predicated region body
PF: predicated region fallthrough
CT: control target
= control target key end

     0   :  { %s9265_s0 = inlined_call_operand.vmem [shape: f32[256,8], index: 0, kind: input, shape index: {}]   ;;  %s9266_s1 = inlined_call_operand.hbm [shape: f32[16,256], index: 1, kind: input, shape index: {}]   ;;  %s9267_s2 = inlined_call_operand.hbm [shape: f32[4,128], index: 2, kind: input, shape index: {}]   ;;  %s9268_s3 = inlined_call_operand.hbm [shape: f32[1,128], index: 3, kind: input, shape index: {}]   ;;  %s9269_s4 = inlined_call_operand.hbm [shape: bf16[2048,1024], index: 4, kind: input, shape index: {}]   ;;  %s9270_s5 = inlined_call_operand.hbm [shape: f32[1,1024], index: 5, kind: input, shape index: {}]   ;;  %s9271_s6 = inlined_call_operand.hbm [shape: f32[2,1024], index: 6, kind: output, shape index: {}]  }
   0x1   :  { %9278 = sst [smem:[#allocation21_spill]] %s9266_s1 }
   0x2   :  { %9279 = sst [smem:[#allocation22_spill]] %s9267_s2 }
   0x3   :  { %9280 = sst [smem:[#allocation23_spill]] %s9269_s4 }
   0x4   :  { %11 = vsyncpa [#allocation4], 0 }
   0x5   :  { %12 = vsyncpa [#allocation7], 0 }
   0x6   :  { %13 = vsyncpa [#allocation10], 0 }
   0x7   :  { %15 = vsyncpa [#allocation10 + $0x1], 0 }
   0x8   :  { %16 = vsyncpa [#allocation5], 0 }
   0x9   :  { %18 = vsyncpa [#allocation5 + $0x1], 0  ;;  %s7775_s21 = smov 0   ;;  %s7777_s22 = smov 0  }
   0xa   :  { %s7779_s23 = smov 0   ;;  %s7781_s24 = smov 0  }
   0xb LB: > { %9281 = sst [smem:[#allocation17_spill]] %s7719_s21  ;;  %s7796_s25 = sadd.s32 4294967295, %s7731_s24   ;;  %s7731_s24 = sphi %s7781_s24, %s9303_s24   ;;  %s7727_s23 = sphi %s7779_s23, %s9307_s23   ;;  %s7723_s22 = sphi %s7777_s22, %s9306_s22   ;;  %s7719_s21 = sphi %s7775_s21, %s9305_s21  }
   0xc   : > { %s4812_s26 = sadd.s32 4294967294, %s7731_s24   ;;  %s7800_s27 = sadd.s32 1, %s7731_s24  }
   0xd   : > { %9282 = sst [smem:[#allocation18_spill]] %s7800_s27  ;;  %s115_s28 = sadd.s32 1, %s7727_s23 }
   0xe   : > { %s112_s29 = ssub.s32 %s7731_s24, %s7800_s27  ;;  %p122_p0 = scmp.ne.s32.totalorder %s7727_s23, %s7723_s22 }
   0xf   : > { %p113_p1 = scmp.eq.s32.totalorder %s112_s29, 0  ;;  %p123_p2 = scmp.eq.s32.totalorder %s7731_s24, 0 }
  0x10   : > { %p128_p3 = scmp.ne.s32.totalorder %s7723_s22, %s7719_s21  ;;  %p9273_p4 = scmp.eq.s32.totalorder %s7796_s25, 0 }
  0x11   : > { %s7812_s30 = scalar_select %p113_p1, %s7727_s23, %s115_s28  }
  0x12   : > { %p7814_p5 = por %p123_p2, %p122_p0  ;;  %p7820_p6 = por %p9273_p4, %p128_p3 }
  0x13   : > { %9283 = sst [smem:[#allocation19_spill]] %s7812_s30  ;;  %p178_p7 = scmp.eq.s32.totalorder %s7796_s25, 1 }
  0x14   : > { %p184_p8 = scmp.eq.s32.totalorder %s4812_s26, 1  ;;  %p4813_p9 = scmp.ge.s32.totalorder %s7731_s24, 1 }
  0x15   : > { %p191_p10 = scmp.lt.s32.totalorder %s7731_s24, 3  ;;  %p7827_p11 = por %p178_p7, %p122_p0 }
  0x16   : > { %p7831_p12 = por %p184_p8, %p128_p3  ;;  %s9290_s2 = sld [smem:[#allocation22_spill]] }
  0x17   : > { %p7835_p13 = pnand %p4813_p9, %p191_p10  ;;  %s7733_s15 = smov [#allocation6]  }
  0x18   : > { %s9287_s10 = scalar_select %p7831_p12, 1, 0 }
  0x19   : > { %p7437_p0 = pneg %p7835_p13  ;;  %s222_s16 = sshll.u32 %s7733_s15, 4  ;;  %s223_s16 = int_to_ptr.vmem [resolvable:$true] %s222_s16 }
  0x1a   : > { %9288 = sst [smem:[#allocation20_spill]] %s9287_s10  ;;  %p7461_p3 = scmp.lt.s32.totalorder %s7731_s24, 2 }
  0x1b   : > { %p7847_p2 = pnand %p7437_p0, %p9273_p4  ;;  %s245_s19 = sand.u32 1, %s7731_s24  }
  0x1c   : > { %s220_s14 = sshll.u32 %s9290_s2, 4  ;;  %p7856_p7 = pnand %p7461_p3, %p7814_p5  ;;  %s221_s14 = int_to_ptr.hbm [resolvable:$true] %s220_s14 }
  0x1d   : > { %7443 = dma.hbm_to_vmem [thread:$0]  (!%p7847_p2), %s221_s14, 64, %s223_s16, [#allocation7]  }
  0x1e   : > { %s9272_s20 = sand.u32 1, %s7727_s23   ;;  %s6905_s28 = sshll.u32 %s7731_s24, 4 }
  0x1f   : > { %s4818_s26 = sshll.u32 %s9272_s20, 12  ;;  %s9293_s4 = sld [smem:[#allocation23_spill]] }
  0x20   : > { %s249_s15 = scalar_lea.vmem [#allocation9], %s4818_s26  ;;  %s7868_s7 = scalar_lea.sflag [#allocation10], %s245_s19 }
  0x21   : > { %s257_s2 = sshll.u32 %s249_s15, 4  ;;  %p7541_p8 = pneg %p7856_p7  ;;  %s258_s2 = int_to_ptr.vmem [resolvable:$true] %s257_s2 }
  0x25   : > { %s254_s13 = scalar_lea.hbm %s9293_s4, %s6905_s28  ;;  %s7544_s26 = scalar_lea.hbm %s9293_s4, 8192 }
  0x26   : > { %s255_s30 = sshll.u32 %s254_s13, 4  ;;  %s256_s30 = int_to_ptr.hbm [resolvable:$true] %s255_s30 }
  0x27   : > { %s7537_s14 = sshra.s32 %s256_s30, 4  ;;  %s7538_s14 = int_to_ptr.hbm [resolvable:$true] %s7537_s14 }
  0x28   : > { %s7539_s16 = scalar_lea.hbm %s7538_s14, 4096  ;;  %p7545_p0 = scmp.lt.s32.totalorder %s7538_s14, %s9293_s4 }
  0x29   : > { %p7540_p5 = scmp.ne.s32.totalorder %s7538_s14, %s7539_s16  ;;  %p7546_p3 = scmp.lt.s32.totalorder %s7544_s26, %s7539_s16 }
  0x2b   : > { %p7542_p9 = pnand %p7541_p8, %p7540_p5  ;;  %p7547_p1 = por %p7546_p3, %p7545_p0 }
  0x2d   : > { %p7543_p10 = pneg %p7542_p9 }
  0x2f   : > { %p7548_p4 = pnand %p7547_p1, %p7543_p10 }
  0x31   : > { %7551 = shalt.err (!%p7548_p4)
}
  0x32   : > { %s7734_s19 = smov 512   ;;  %s7735_s13 = smov 256  }
  0x33   : > { %s7736_s15 = smov 16   ;;  %s9294_s1 = sld [smem:[#allocation21_spill]] }
  0x34   : > { %7450 = dma.hbm_to_vmem [thread:$0]  (!%p7856_p7), %s256_s30, 65536, %s258_s2, %s7868_s7, %s7734_s19, %s7735_s13, %s7736_s15  }
  0x35   : > { %s7737_s14 = smov [#allocation3]   ;;  %s232_s4 = sshll.u32 %s9268_s3, 4  ;;  %s233_s4 = int_to_ptr.hbm [resolvable:$true] %s232_s4 }
  0x36   : > { %s207_s16 = sshll.u32 %s7737_s14, 4  ;;  %s7738_s27 = smov [#allocation8]   ;;  %s208_s16 = int_to_ptr.vmem [resolvable:$true] %s207_s16 }
  0x37   : > { %s234_s10 = sshll.u32 %s7738_s27, 4  ;;  %s9295_s21 = sand.u32 1, %s7727_s23   ;;  %s235_s10 = int_to_ptr.vmem [resolvable:$true] %s234_s10 }
  0x38   : > { %s4821_s2 = sshll.u32 %s9295_s21, 2  ;;  %s4822_s30 = sshll.u32 %s7731_s24, 2 }
  0x39   : > { %s205_s28 = sshll.u32 %s9294_s1, 4  ;;  %s271_s19 = scalar_lea.vmem [#allocation11], %s4821_s2  ;;  %s206_s28 = int_to_ptr.hbm [resolvable:$true] %s205_s28 }
  0x3a   : > { %7440 = dma.hbm_to_vmem [thread:$0]  (!%p7847_p2), %s206_s28, 512, %s208_s16, [#allocation4], %s7735_s13, %s7735_s13, %s7736_s15  }
  0x3b   : > { %7446 = dma.hbm_to_vmem [thread:$0]  (!%p7847_p2), %s233_s4, 16, %s235_s10, [#allocation7]  }
  0x3c   : > { %s279_s20 = sshll.u32 %s271_s19, 4  ;;  %s275_s1 = scalar_lea.hbm %s9270_s5, %s4822_s30  ;;  %s280_s20 = int_to_ptr.vmem [resolvable:$true] %s279_s20 }
  0x3d   : > { %s277_s26 = sshll.u32 %s275_s1, 4  ;;  %s7634_s27 = scalar_lea.hbm %s9270_s5, 8  ;;  %s278_s26 = int_to_ptr.hbm [resolvable:$true] %s277_s26 }
  0x3e   : > { %s7627_s13 = sshra.s32 %s278_s26, 4  ;;  %s7628_s13 = int_to_ptr.hbm [resolvable:$true] %s7627_s13 }
  0x3f   : > { %s7629_s15 = scalar_lea.hbm %s7628_s13, 4  ;;  %p7635_p2 = scmp.lt.s32.totalorder %s7628_s13, %s9270_s5 }
  0x40   : > { %p7630_p4 = scmp.ne.s32.totalorder %s7628_s13, %s7629_s15  ;;  %p7636_p9 = scmp.lt.s32.totalorder %s7634_s27, %s7629_s15 }
  0x42   : > { %p7632_p1 = pnand %p7630_p4, %p7541_p8  ;;  %p7637_p10 = por %p7636_p9, %p7635_p2 }
  0x44   : > { %p7633_p5 = pneg %p7632_p1 }
  0x46   : > { %p7638_p0 = pnand %p7637_p10, %p7633_p5 }
  0x48   : > { %7641 = shalt.err (!%p7638_p0)
}
  0x49   : > { %7453 = dma.hbm_to_vmem [thread:$0]  (!%p7856_p7), %s278_s26, 64, %s280_s20, %s7868_s7  }
  0x4a   : > { %288 = sbr.rel (%p7835_p13) target bundleno = 1200 (0x4b0), region = 44  ;;  %p9296_p8 = scmp.eq.s32.totalorder (!%p7835_p13), %s7796_s25, 0 }
  0x4f   : > { %7702 = dma.done.wait (%p9296_p8), [#allocation4], 512   ;;  %p9297_p3 = pmov %p9296_p8 }
  0x51   : > { %7704 = vsyncadd (%p9297_p3), [#allocation4], 4294966784  ;;  %p9298_p4 = pmov %p9297_p3 }
  0x52   : > { %p9299_p1 = pmov %p9297_p3 }
  0x53   : > { %7706 = dma.done.wait (%p9298_p4), [#allocation7], 80  }
  0x54   : > { %7708 = vsyncadd (%p9299_p1), [#allocation7], 4294967216  ;;  %s305_s1 = sand.u32 1, %s7796_s25   ;;  %s7924_s18 = sand.u32 1, %s7723_s22  }
  0x55   : > { %s4827_s11 = sshll.u32 %s7924_s18, 12  ;;  %s306_s7 = scalar_lea.sflag [#allocation10], %s305_s1 }
  0x56   : > { %s7927_s28 = scalar_lea.vmem [#allocation9], %s4827_s11 }
  0x57   : > { %7710 = dma.done.wait (%p7820_p6), %s306_s7, 65600  }
  0x58   : > { %7712 = vsyncadd (%p7820_p6), %s306_s7, 4294901696  ;;  %v376_v0 = vld [vmem:[%s9265_s0 + $0x78] sm:$0xff]  ;;  %v375_v2 = vld [vmem:[%s9265_s0 + $0x70] sm:$0xff]  ;;  %vm451_vm0 = vcmask 1043456   ;;  %vm444_vm1 = vcmask 31744   ;;  %s7739_s19 = smov 124  }
  0x59   : > { %v392_v1 = vld [vmem:[%s9265_s0 + $0xf8] sm:$0xff]  ;;  %393 = vmatpush.msra.mxu0 %v376_v0  ;;  %v391_v3 = vld [vmem:[%s9265_s0 + $0xf0] sm:$0xff]  ;;  %v374_v4 = vld [vmem:[%s9265_s0 + $0x68] sm:$0xff]  ;;  %s4828_s20 = sshll.u32 %s7924_s18, 2  ;;  %vm4667_vm2 = vcmask 1041408   ;;  %s7418_s14 = sshll.u32 %s7796_s25, 3 }
  0x5a   : > { %416 = vmatpush.msra.mxu1 %v392_v1  ;;  %v390_v5 = vld [vmem:[%s9265_s0 + $0xe8] sm:$0xff]  ;;  %v373_v6 = vld [vmem:[%s9265_s0 + $0x60] sm:$0xff]  ;;  %v372_v8 = vld [vmem:[%s9265_s0 + $0x58] sm:$0xff]  ;;  %s8528_s29 = scalar_lea.vmem [#allocation11], %s4828_s20  ;;  %s4686_s13 = scalar_lea.hbm %s9271_s6, %s7418_s14  ;;  %vm4669_vm3 = vcmask 1045508  }
  0x5b   : > { %394 = vmatpush.msra.mxu0 %v375_v2  ;;  %v389_v7 = vld [vmem:[%s9265_s0 + $0xe0] sm:$0xff]  ;;  %v388_v9 = vld [vmem:[%s9265_s0 + $0xd8] sm:$0xff]  ;;  %v371_v10 = vld [vmem:[%s9265_s0 + $0x50] sm:$0xff]  ;;  %s4690_s4 = sshll.u32 %s4686_s13, 4  ;;  %s4675_s25 = scalar_lea.sflag [#allocation5], %s7924_s18  ;;  %s4691_s4 = int_to_ptr.hbm [resolvable:$true] %s4690_s4 }
  0x5c   : > { %417 = vmatpush.msra.mxu1 %v391_v3  ;;  %v387_v11 = vld [vmem:[%s9265_s0 + $0xd0] sm:$0xff]  ;;  %v370_v12 = vld [vmem:[%s9265_s0 + $0x48] sm:$0xff]  ;;  %v369_v14 = vld [vmem:[%s9265_s0 + $0x40] sm:$0xff]  ;;  %s7671_s27 = sshra.s32 %s4691_s4, 4  ;;  %s7677_s11 = scalar_lea.hbm %s9271_s6, 16  ;;  %s7672_s27 = int_to_ptr.hbm [resolvable:$true] %s7671_s27 }
  0x5d   : > { %395 = vmatpush.msra.mxu0 %v374_v4  ;;  %v386_v13 = vld [vmem:[%s9265_s0 + $0xc8] sm:$0xff]  ;;  %v385_v15 = vld [vmem:[%s9265_s0 + $0xc0] sm:$0xff]  ;;  %v368_v16 = vld [vmem:[%s9265_s0 + $0x38] sm:$0xff]  ;;  %s7673_s10 = scalar_lea.hbm %s7672_s27, 8  ;;  %p7678_p5 = scmp.lt.s32.totalorder %s7672_s27, %s9271_s6 }
  0x5e   : > { %418 = vmatpush.msra.mxu1 %v390_v5  ;;  %v384_v17 = vld [vmem:[%s9265_s0 + $0xb8] sm:$0xff]  ;;  %v367_v18 = vld [vmem:[%s9265_s0 + $0x30] sm:$0xff]  ;;  %v366_v20 = vld [vmem:[%s9265_s0 + $0x28] sm:$0xff]  ;;  %p7674_p6 = scmp.ne.s32.totalorder %s7672_s27, %s7673_s10  ;;  %p7679_p2 = scmp.lt.s32.totalorder %s7677_s11, %s7673_s10 }
  0x5f   : > { %396 = vmatpush.msra.mxu0 %v373_v6  ;;  %v383_v19 = vld [vmem:[%s9265_s0 + $0xb0] sm:$0xff]  ;;  %v382_v21 = vld [vmem:[%s9265_s0 + $0xa8] sm:$0xff]  ;;  %v365_v22 = vld [vmem:[%s9265_s0 + $0x20] sm:$0xff] }
  0x60   : > { %419 = vmatpush.msra.mxu1 %v389_v7  ;;  %v381_v23 = vld [vmem:[%s9265_s0 + $0xa0] sm:$0xff]  ;;  %v364_v24 = vld [vmem:[%s9265_s0 + $0x18] sm:$0xff]  ;;  %v363_v26 = vld [vmem:[%s9265_s0 + $0x10] sm:$0xff]  ;;  %p7675_p13 = pnand %p7674_p6, %p7827_p11  ;;  %p7680_p9 = por %p7679_p2, %p7678_p5 }
  0x61   : > { %397 = vmatpush.msra.mxu0 %v372_v8  ;;  %v380_v25 = vld [vmem:[%s9265_s0 + $0x98] sm:$0xff]  ;;  %v379_v27 = vld [vmem:[%s9265_s0 + $0x90] sm:$0xff]  ;;  %v362_v28 = vld [vmem:[%s9265_s0 + $0x8] sm:$0xff] }
  0x62   : > { %420 = vmatpush.msra.mxu1 %v388_v9  ;;  %v378_v29 = vld [vmem:[%s9265_s0 + $0x88] sm:$0xff]  ;;  %v361_v30 = vld [vmem:[%s9265_s0] sm:$0xff]  ;;  %v358_v33 = vld [vmem:[#allocation3 + $0x8] sm:$0xff]  ;;  %p7676_p7 = pneg %p7675_p13 }
  0x63   : > { %398 = vmatpush.msra.mxu0 %v371_v10  ;;  %v377_v31 = vld [vmem:[%s9265_s0 + $0x80] sm:$0xff]  ;;  %v357_v32 = vld [vmem:[#allocation3] sm:$0xff]  ;;  %v359_v34 = vld [vmem:[#allocation3 + $0x10] sm:$0xff] }
  0x64   : > { %421 = vmatpush.msra.mxu1 %v387_v11  ;;  %v360_v35 = vld [vmem:[#allocation3 + $0x18] sm:$0xff]  ;;  %v439_v36 = vld [vmem:[#allocation6] sm:$0xf]  ;;  %v8034_v44 = vld [vmem:[#allocation8] ss:$0 sm:$0xff]  ;;  %p7681_p10 = pnand %p7680_p9, %p7676_p7 }
  0x65   : > { %399 = vmatpush.msra.mxu0 %v370_v12  ;;  %4830 = vmatpush.msk.msra.mxu2 %vm451_vm0, %v439_v36  ;;  %v4966_v5 = vld [vmem:[%s7927_s28 + $0xe0] sm:$0xf]  ;;  %v6936_v6 = vld [vmem:[%s7927_s28 + $0xec] sm:$0xf0] }
  0x66   : > { %422 = vmatpush.msra.mxu1 %v386_v13  ;;  %4841 = vmatpush.msk.msra.mxu3 %vm451_vm0, %v439_v36  ;;  %v5094_v7 = vld [vmem:[%s7927_s28 + $0x1e0] sm:$0xf]  ;;  %v4967_v8 = vor.u32 %v6936_v6, %v4966_v5  ;;  %v6968_v9 = vld [vmem:[%s7927_s28 + $0x1ec] sm:$0xf0] }
  0x67   : > { %400 = vmatpush.msra.mxu0 %v369_v14  ;;  %v5222_v10 = vld [vmem:[%s7927_s28 + $0x2e0] sm:$0xf]  ;;  %v7000_v11 = vld [vmem:[%s7927_s28 + $0x2ec] sm:$0xf0]  ;;  %v5095_v12 = vor.u32 %v6968_v9, %v5094_v7 }
  0x68   : > { %423 = vmatpush.msra.mxu1 %v385_v15  ;;  %v5223_v13 = vor.u32 %v7000_v11, %v5222_v10  ;;  %v5350_v14 = vld [vmem:[%s7927_s28 + $0x3e0] sm:$0xf]  ;;  %v7032_v15 = vld [vmem:[%s7927_s28 + $0x3ec] sm:$0xf0]  ;;  %3824 = vmatpush.bf16.msrb.mxu2 %v4967_v8 }
  0x69   : > { %401 = vmatpush.msra.mxu0 %v368_v16  ;;  %3837 = vmatpush.bf16.msrb.mxu3 %v5095_v12  ;;  %v4886_v5 = vld [vmem:[%s7927_s28 + $0x40] sm:$0xf]  ;;  %v6916_v6 = vld [vmem:[%s7927_s28 + $0x4c] sm:$0xf0] }
  0x6a   : > { %424 = vmatpush.msra.mxu1 %v384_v17  ;;  %v5351_v17 = vor.u32 %v7032_v15, %v5350_v14  ;;  %v5014_v7 = vld [vmem:[%s7927_s28 + $0x140] sm:$0xf]  ;;  %v6948_v11 = vld [vmem:[%s7927_s28 + $0x14c] sm:$0xf0] }
  0x6b   : > { %402 = vmatpush.msra.mxu0 %v367_v18  ;;  %v6980_v14 = vld [vmem:[%s7927_s28 + $0x24c] sm:$0xf0]  ;;  %v5270_v15 = vld [vmem:[%s7927_s28 + $0x340] sm:$0xf] }
  0x6c   : > { %425 = vmatpush.msra.mxu1 %v383_v19 }
  0x6d   : > { %403 = vmatpush.msra.mxu0 %v366_v20  ;;  %v4950_v20 = vld [vmem:[%s7927_s28 + $0xc0] sm:$0xf] }
  0x6e   : > { %426 = vmatpush.msra.mxu1 %v382_v21  ;;  %v6932_v21 = vld [vmem:[%s7927_s28 + $0xcc] sm:$0xf0] }
  0x6f   : > { %404 = vmatpush.msra.mxu0 %v365_v22  ;;  %v5078_v22 = vld [vmem:[%s7927_s28 + $0x1c0] sm:$0xf] }
  0x70   : > { %427 = vmatpush.msra.mxu1 %v381_v23  ;;  %v4951_v23 = vor.u32 %v6932_v21, %v4950_v20  ;;  %v4870_v20 = vld [vmem:[%s7927_s28 + $0x20] sm:$0xf]  ;;  %v6912_v21 = vld [vmem:[%s7927_s28 + $0x2c] sm:$0xf0] }
  0x71   : > { %405 = vmatpush.msra.mxu0 %v364_v24  ;;  %v6964_v24 = vld [vmem:[%s7927_s28 + $0x1cc] sm:$0xf0] }
  0x72   : > { %428 = vmatpush.msra.mxu1 %v380_v25  ;;  %v5206_v25 = vld [vmem:[%s7927_s28 + $0x2c0] sm:$0xf]  ;;  %3825 = vmatpush.bf16.msrb.mxu2 %v4951_v23 }
  0x73   : > { %406 = vmatpush.msra.mxu0 %v363_v26  ;;  %v6996_v26 = vld [vmem:[%s7927_s28 + $0x2cc] sm:$0xf0] }
  0x74   : > { %429 = vmatpush.msra.mxu1 %v379_v27  ;;  %v5079_v27 = vor.u32 %v6964_v24, %v5078_v22  ;;  %v4998_v22 = vld [vmem:[%s7927_s28 + $0x120] sm:$0xf]  ;;  %v6944_v24 = vld [vmem:[%s7927_s28 + $0x12c] sm:$0xf0] }
  0x75   : > { %407 = vmatpush.msra.mxu0 %v362_v28  ;;  %v5207_v28 = vor.u32 %v6996_v26, %v5206_v25  ;;  %v5126_v25 = vld [vmem:[%s7927_s28 + $0x220] sm:$0xf]  ;;  %v6976_v26 = vld [vmem:[%s7927_s28 + $0x22c] sm:$0xf0] }
  0x76   : > { %430 = vmatpush.msra.mxu1 %v378_v29  ;;  %v5334_v29 = vld [vmem:[%s7927_s28 + $0x3c0] sm:$0xf]  ;;  %3838 = vmatpush.bf16.msrb.mxu3 %v5079_v27 }
  0x77   : > { %408 = vmatpush.msra.mxu0 %v361_v30  ;;  %v7028_v30 = vld [vmem:[%s7927_s28 + $0x3cc] sm:$0xf0]  ;;  %v5254_v27 = vld [vmem:[%s7927_s28 + $0x320] sm:$0xf] }
  0x78   : > { %431 = vmatpush.msra.mxu1 %v377_v31  ;;  %409 = vmatmul.f32.vlgmr.msra.gmra.mxu0 %v357_v32  ;;  %v4934_v31 = vld [vmem:[%s7927_s28 + $0xa0] sm:$0xf]  ;;  %v5335_v32 = vor.u32 %v7028_v30, %v5334_v29  ;;  %v4871_v29 = vor.u32 %v6912_v21, %v4870_v20 }
  0x79   : > { %432 = vmatmul.f32.vlgmr.msra.gmra.mxu1 %v358_v33  ;;  %3850 = vmatpush.bf16.msrb.mxu0 %v5223_v13  ;;  %v6928_v33 = vld [vmem:[%s7927_s28 + $0xac] sm:$0xf0]  ;;  %v5142_v13 = vld [vmem:[%s7927_s28 + $0x240] sm:$0xf] }
  0x7a   : > { %3863 = vmatpush.bf16.msrb.mxu1 %v5351_v17  ;;  %v4935_v36 = vor.u32 %v6928_v33, %v4934_v31  ;;  %v7012_v17 = vld [vmem:[%s7927_s28 + $0x34c] sm:$0xf0]  ;;  %v4854_v30 = vld [vmem:[%s7927_s28] sm:$0xf]  ;;  %v5127_v33 = vor.u32 %v6976_v26, %v5126_v25 }
  0x7b   : > { %v5271_v23 = vor.u32 %v7012_v17, %v5270_v15  ;;  %v6908_v31 = vld [vmem:[%s7927_s28 + $0xc] sm:$0xf0]  ;;  %v5430_v21 = vld [vmem:[%s7927_s28 + $0x480] sm:$0xf] }
  0x7c   : > { %3826 = vmatpush.bf16.msrb.mxu2 %v4935_v36  ;;  %v5110_v36 = vld [vmem:[%s7927_s28 + $0x200] sm:$0xf]  ;;  %v7120_v15 = vld [vmem:[%s7927_s28 + $0x6ac] sm:$0xf0] }
  0x7d   : > { %3851 = vmatpush.bf16.msrb.mxu0 %v5207_v28  ;;  %v7008_v28 = vld [vmem:[%s7927_s28 + $0x32c] sm:$0xf0]  ;;  %v5686_v26 = vld [vmem:[%s7927_s28 + $0x680] sm:$0xf] }
  0x7e   : > { %3864 = vmatpush.bf16.msrb.mxu1 %v5335_v32  ;;  %v4999_v32 = vor.u32 %v6944_v24, %v4998_v22  ;;  %v7152_v17 = vld [vmem:[%s7927_s28 + $0x7ac] sm:$0xf0] }
  0x7f   : > { %v7052_v22 = vld [vmem:[%s7927_s28 + $0x48c] sm:$0xf0] }
  0x80   : > { %412 = vmatmul.f32.gmra.mxu0 %v359_v34  ;;  %v5062_v34 = vld [vmem:[%s7927_s28 + $0x1a0] sm:$0xf]  ;;  %v7084_v25 = vld [vmem:[%s7927_s28 + $0x58c] sm:$0xf0] }
  0x81   : > { %435 = vmatmul.f32.gmra.mxu1 %v360_v35  ;;  %v6960_v35 = vld [vmem:[%s7927_s28 + $0x1ac] sm:$0xf0] }
  0xf5   : > { %v410_v37 = vpop.f32.mrf.mxu0 }
  0xf6   : > { %v433_v38 = vpop.f32.mrf.mxu1 }
  0xf7   : > { %v434_v39 = vadd.f32 %v433_v38, %v410_v37  ;;  %v5063_v37 = vor.u32 %v6960_v35, %v5062_v34  ;;  %v5190_v38 = vld [vmem:[%s7927_s28 + $0x2a0] sm:$0xf]  ;;  %v6940_v35 = vld [vmem:[%s7927_s28 + $0x10c] sm:$0xf0] }
  0xf8   : > { %v4982_v34 = vld [vmem:[%s7927_s28 + $0x100] sm:$0xf] }
  0xf9   : > { %564 = vrot.lane.b32.xlu0 %v434_v39, %s7739_s19  ;;  %4831 = vmatmul.msk.f32.vlgmr.msra.gmra.mxu2 %vm444_vm1, %v434_v39  ;;  %v6992_v39 = vld [vmem:[%s7927_s28 + $0x2ac] sm:$0xf0] }
  0xfa   : > { %3839 = vmatpush.bf16.msrb.mxu3 %v5063_v37  ;;  %v5255_v37 = vor.u32 %v7008_v28, %v5254_v27  ;;  %v7116_v27 = vld [vmem:[%s7927_s28 + $0x68c] sm:$0xf0]  ;;  %v5814_v28 = vld [vmem:[%s7927_s28 + $0x780] sm:$0xf] }
  0xfd   : > { %v413_v40 = vpop.f32.mrf.mxu0 }
  0xfe   : > { %v436_v41 = vpop.f32.mrf.mxu1 }
  0xff   : > { %v437_v42 = vadd.f32 %v436_v41, %v413_v40  ;;  %v5318_v40 = vld [vmem:[%s7927_s28 + $0x3a0] sm:$0xf]  ;;  %v5191_v41 = vor.u32 %v6992_v39, %v5190_v38  ;;  %v6972_v38 = vld [vmem:[%s7927_s28 + $0x20c] sm:$0xf0] }
 0x100   : > { %v5238_v39 = vld [vmem:[%s7927_s28 + $0x300] sm:$0xf] }
 0x101   : > { %566 = vrot.lane.b32.xlu0 %v437_v42, %s7739_s19  ;;  %4832 = vmatmul.msk.f32.gmra.mxu2 %vm444_vm1, %v437_v42  ;;  %v7024_v42 = vld [vmem:[%s7927_s28 + $0x3ac] sm:$0xf0] }
 0x102   : > { %3852 = vmatpush.bf16.msrb.mxu0 %v5191_v41  ;;  %v5478_v41 = vld [vmem:[%s7927_s28 + $0x4e0] sm:$0xf] }
 0x16b   : > { %v565_v43 = vpop.permute.xlu0 %564 }
 0x16c   : > { %4842 = vmatmul.msk.f32.vlgmr.msra.gmra.mxu3 %vm444_vm1, %v565_v43  ;;  %v4918_v43 = vld [vmem:[%s7927_s28 + $0x80] sm:$0xf] }
 0x173   : > { %v567_v47 = vpop.permute.xlu0 %566 }
 0x174   : > { %4843 = vmatmul.msk.f32.gmra.mxu3 %vm444_vm1, %v567_v47  ;;  %v5046_v47 = vld [vmem:[%s7927_s28 + $0x180] sm:$0xf] }
 0x17c   : > { %v472_v45 = vpop.f32.mrf.mxu2 }
 0x17d   : > { %v473_v46 = vadd.f32 %v8034_v44, %v472_v45  ;;  %v6924_v45 = vld [vmem:[%s7927_s28 + $0x8c] sm:$0xf0] }
 0x17f   : > { %v478_v48 = vmax.f32 %v473_v46, 0.0  ;;  %v5319_v46 = vor.u32 %v7024_v42, %v5318_v40  ;;  %v7004_v40 = vld [vmem:[%s7927_s28 + $0x30c] sm:$0xf0] }
 0x180   : > { %v7064_v42 = vld [vmem:[%s7927_s28 + $0x4ec] sm:$0xf0] }
 0x181   : > { %480 = vst [vmem:[#allocation2] sm:$0x1] %v478_v48  ;;  %v4833_v49 = vrot.slane %v478_v48, 9  ;;  %3865 = vmatpush.bf16.msrb.mxu1 %v5319_v46  ;;  %v7096_v46 = vld [vmem:[%s7927_s28 + $0x5ec] sm:$0xf0] }
 0x182   : > { %486 = vst.sshfl [vmem:[#allocation1] sm:$0xff pattern:$0x73625140] %v478_v48 }
 0x183   : > { %485 = vst [vmem:[#allocation2 + $0x2] sm:$0x1] %v4833_v49  ;;  %v5174_v49 = vld [vmem:[%s7927_s28 + $0x280] sm:$0xf] }
 0x184   : > { %v475_v51 = vpop.f32.mrf.mxu2 }
 0x185   : > { %v476_v52 = vadd.f32 %v8034_v44, %v475_v51  ;;  %v4919_v51 = vor.u32 %v6924_v45, %v4918_v43  ;;  %v5606_v43 = vld [vmem:[%s7927_s28 + $0x5e0] sm:$0xf]  ;;  %v4855_v45 = vor.u32 %v6908_v31, %v4854_v30  ;;  %v5431_v30 = vor.u32 %v7052_v22, %v5430_v21 }
 0x187   : > { %v479_v54 = vmax.f32 %v476_v52, 0.0  ;;  %v6988_v52 = vld [vmem:[%s7927_s28 + $0x28c] sm:$0xf0]  ;;  %3827 = vmatpush.bf16.msrb.mxu2 %v4919_v51  ;;  %v5862_v51 = vld [vmem:[%s7927_s28 + $0x7e0] sm:$0xf] }
 0x189   : > { %v488_v50 = vld [vmem:[#allocation1 + $0x1] ss:$4 sm:$0xff]  ;;  %522 = vst [vmem:[#allocation2 + $0x10] sm:$0x1] %v479_v54  ;;  %v4837_v56 = vrot.slane %v479_v54, 9 }
 0x18a   : > { %491 = vst.sshfl [vmem:[#allocation1] sm:$0xff pattern:$0x73625140] %v478_v48 }
 0x18b   : > { %490 = vst [vmem:[#allocation2 + $0x4] sm:$0x1] %v488_v50 }
 0x18c   : > { %527 = vst [vmem:[#allocation2 + $0x12] sm:$0x1] %v4837_v56 }
 0x191   : > { %v493_v53 = vld [vmem:[#allocation1 + $0x1] ss:$4 sm:$0xff] }
 0x192   : > { %498 = vst.sshfl [vmem:[#allocation1] sm:$0xff pattern:$0x73625140] %v478_v48  ;;  %v4834_v55 = vrot.slane %v493_v53, 9  ;;  %v5302_v53 = vld [vmem:[%s7927_s28 + $0x380] sm:$0xf] }
 0x194   : > { %497 = vst [vmem:[#allocation2 + $0x6] sm:$0x1] %v4834_v55 }
 0x199   : > { %v500_v57 = vld [vmem:[#allocation1 + $0x2] ss:$4 sm:$0xff] }
 0x19a   : > { %503 = vst.sshfl [vmem:[#allocation1] sm:$0xff pattern:$0x73625140] %v478_v48 }
 0x19b   : > { %502 = vst [vmem:[#allocation2 + $0x8] sm:$0x1] %v500_v57  ;;  %v5175_v57 = vor.u32 %v6988_v52, %v5174_v49  ;;  %v4983_v49 = vor.u32 %v6940_v35, %v4982_v34  ;;  %v7160_v52 = vld [vmem:[%s7927_s28 + $0x7ec] sm:$0xf0]  ;;  %v5542_v35 = vld [vmem:[%s7927_s28 + $0x560] sm:$0xf] }
 0x19c   : > { %v7048_v34 = vld [vmem:[%s7927_s28 + $0x46c] sm:$0xf0] }
 0x19d   : > { %3853 = vmatpush.bf16.msrb.mxu0 %v5175_v57  ;;  %v5607_v57 = vor.u32 %v7096_v46, %v5606_v43  ;;  %v5398_v43 = vld [vmem:[%s7927_s28 + $0x440] sm:$0xf] }
 0x1a1   : > { %v505_v58 = vld [vmem:[#allocation1 + $0x2] ss:$4 sm:$0xff] }
 0x1a2   : > { %510 = vst.sshfl [vmem:[#allocation1] sm:$0xff pattern:$0x73625140] %v478_v48  ;;  %v4835_v59 = vrot.slane %v505_v58, 9  ;;  %v4902_v58 = vld [vmem:[%s7927_s28 + $0x60] sm:$0xf] }
 0x1a4   : > { %509 = vst [vmem:[#allocation2 + $0xa] sm:$0x1] %v4835_v59  ;;  %v6920_v59 = vld [vmem:[%s7927_s28 + $0x6c] sm:$0xf0] }
 0x1a9   : > { %v512_v60 = vld [vmem:[#allocation1 + $0x3] ss:$4 sm:$0xff] }
 0x1aa   : > { %515 = vst.sshfl [vmem:[#allocation1] sm:$0xff pattern:$0x73625140] %v478_v48  ;;  %v6956_v48 = vld [vmem:[%s7927_s28 + $0x18c] sm:$0xf0] }
 0x1ab   : > { %514 = vst [vmem:[#allocation2 + $0xc] sm:$0x1] %v512_v60  ;;  %v5047_v56 = vor.u32 %v6956_v48, %v5046_v47  ;;  %v5030_v60 = vld [vmem:[%s7927_s28 + $0x160] sm:$0xf]  ;;  %v7128_v48 = vld [vmem:[%s7927_s28 + $0x6ec] sm:$0xf0] }
 0x1ac   : > { %v5734_v47 = vld [vmem:[%s7927_s28 + $0x6e0] sm:$0xf] }
 0x1ad   : > { %3840 = vmatpush.bf16.msrb.mxu3 %v5047_v56 }
 0x1b1   : > { %v517_v61 = vld [vmem:[#allocation1 + $0x3] ss:$4 sm:$0xff] }
 0x1b2   : > { %528 = vst.sshfl [vmem:[#allocation1] sm:$0xff pattern:$0x73625140] %v479_v54  ;;  %v4836_v62 = vrot.slane %v517_v61, 9 }
 0x1b4   : > { %521 = vst [vmem:[#allocation2 + $0xe] sm:$0x1] %v4836_v62  ;;  %v6952_v62 = vld [vmem:[%s7927_s28 + $0x16c] sm:$0xf0] }
 0x1b5   : > { %v5031_v9 = vor.u32 %v6952_v62, %v5030_v60  ;;  %v7060_v60 = vld [vmem:[%s7927_s28 + $0x4cc] sm:$0xf0]  ;;  %v5863_v62 = vor.u32 %v7160_v52, %v5862_v51  ;;  %v5654_v51 = vld [vmem:[%s7927_s28 + $0x640] sm:$0xf] }
 0x1b6   : > { %v7108_v52 = vld [vmem:[%s7927_s28 + $0x64c] sm:$0xf0] }
 0x1b7   : > { %3841 = vmatpush.bf16.msrb.mxu3 %v5031_v9 }
 0x1b9   : > { %v530_v63 = vld [vmem:[#allocation1 + $0x1] ss:$4 sm:$0xff] }
 0x1ba   : > { %533 = vst.sshfl [vmem:[#allocation1] sm:$0xff pattern:$0x73625140] %v479_v54 }
 0x1bb   : > { %532 = vst [vmem:[#allocation2 + $0x14] sm:$0x1] %v530_v63  ;;  %v5158_v63 = vld [vmem:[%s7927_s28 + $0x260] sm:$0xf] }
 0x1c1   : > { %v535_v0 = vld [vmem:[#allocation1 + $0x1] ss:$4 sm:$0xff] }
 0x1c2   : > { %540 = vst.sshfl [vmem:[#allocation1] sm:$0xff pattern:$0x73625140] %v479_v54  ;;  %v4838_v1 = vrot.slane %v535_v0, 9  ;;  %v6984_v0 = vld [vmem:[%s7927_s28 + $0x26c] sm:$0xf0] }
 0x1c3   : > { %v5159_v10 = vor.u32 %v6984_v0, %v5158_v63  ;;  %v7092_v63 = vld [vmem:[%s7927_s28 + $0x5cc] sm:$0xf0]  ;;  %v5718_v0 = vld [vmem:[%s7927_s28 + $0x6c0] sm:$0xf] }
 0x1c4   : > { %539 = vst [vmem:[#allocation2 + $0x16] sm:$0x1] %v4838_v1 }
 0x1c5   : > { %3854 = vmatpush.bf16.msrb.mxu0 %v5159_v10 }
 0x1c9   : > { %v542_v2 = vld [vmem:[#allocation1 + $0x2] ss:$4 sm:$0xff] }
 0x1ca   : > { %545 = vst.sshfl [vmem:[#allocation1] sm:$0xff pattern:$0x73625140] %v479_v54 }
 0x1cb   : > { %544 = vst [vmem:[#allocation2 + $0x18] sm:$0x1] %v542_v2  ;;  %v5286_v2 = vld [vmem:[%s7927_s28 + $0x360] sm:$0xf] }
 0x1d1   : > { %v547_v3 = vld [vmem:[#allocation1 + $0x2] ss:$4 sm:$0xff] }
 0x1d2   : > { %552 = vst.sshfl [vmem:[#allocation1] sm:$0xff pattern:$0x73625140] %v479_v54  ;;  %v4839_v4 = vrot.slane %v547_v3, 9  ;;  %v7016_v3 = vld [vmem:[%s7927_s28 + $0x36c] sm:$0xf0] }
 0x1d3   : > { %v5287_v12 = vor.u32 %v7016_v3, %v5286_v2  ;;  %v7124_v2 = vld [vmem:[%s7927_s28 + $0x6cc] sm:$0xf0] }
 0x1d4   : > { %551 = vst [vmem:[#allocation2 + $0x1a] sm:$0x1] %v4839_v4  ;;  %v4903_v4 = vor.u32 %v6920_v59, %v4902_v58  ;;  %v5735_v58 = vor.u32 %v7128_v48, %v5734_v47  ;;  %v5462_v59 = vld [vmem:[%s7927_s28 + $0x4c0] sm:$0xf]  ;;  %v5719_v10 = vor.u32 %v7124_v2, %v5718_v0  ;;  %v7044_v47 = vld [vmem:[%s7927_s28 + $0x44c] sm:$0xf0] }
 0x1d5   : > { %v5526_v48 = vld [vmem:[%s7927_s28 + $0x540] sm:$0xf]  ;;  %v7104_v2 = vld [vmem:[%s7927_s28 + $0x62c] sm:$0xf0] }
 0x1d6   : > { %3828 = vmatpush.bf16.msrb.mxu2 %v4903_v4  ;;  %v5846_v4 = vld [vmem:[%s7927_s28 + $0x7c0] sm:$0xf] }
 0x1d7   : > { %v5638_v0 = vld [vmem:[%s7927_s28 + $0x620] sm:$0xf] }
 0x1d9   : > { %v554_v16 = vld [vmem:[#allocation1 + $0x3] ss:$4 sm:$0xff] }
 0x1da   : > { %557 = vst.sshfl [vmem:[#allocation1] sm:$0xff pattern:$0x73625140] %v479_v54  ;;  %v7020_v54 = vld [vmem:[%s7927_s28 + $0x38c] sm:$0xf0] }
 0x1db   : > { %556 = vst [vmem:[#allocation2 + $0x1c] sm:$0x1] %v554_v16  ;;  %v5303_v61 = vor.u32 %v7020_v54, %v5302_v53  ;;  %v4887_v16 = vor.u32 %v6916_v6, %v4886_v5  ;;  %v5239_v54 = vor.u32 %v7004_v40, %v5238_v39  ;;  %v5463_v5 = vor.u32 %v7060_v60, %v5462_v59  ;;  %v5446_v6 = vld [vmem:[%s7927_s28 + $0x4a0] sm:$0xf]  ;;  %v7112_v39 = vld [vmem:[%s7927_s28 + $0x66c] sm:$0xf0] }
 0x1dc   : > { %v5798_v40 = vld [vmem:[%s7927_s28 + $0x760] sm:$0xf]  ;;  %v7040_v60 = vld [vmem:[%s7927_s28 + $0x42c] sm:$0xf0] }
 0x1dd   : > { %3866 = vmatpush.bf16.msrb.mxu1 %v5303_v61  ;;  %3829 = vmatpush.bf16.msrb.mxu2 %v4887_v16  ;;  %v5590_v61 = vld [vmem:[%s7927_s28 + $0x5c0] sm:$0xf] }
 0x1de   : > { %v5591_v9 = vor.u32 %v7092_v63, %v5590_v61  ;;  %v5830_v16 = vld [vmem:[%s7927_s28 + $0x7a0] sm:$0xf]  ;;  %v7072_v63 = vld [vmem:[%s7927_s28 + $0x52c] sm:$0xf0] }
 0x1df   : > { %v5831_v24 = vor.u32 %v7152_v17, %v5830_v16  ;;  %v5382_v59 = vld [vmem:[%s7927_s28 + $0x420] sm:$0xf]  ;;  %v7132_v16 = vld [vmem:[%s7927_s28 + $0x70c] sm:$0xf0] }
 0x1e0   : > { %v5510_v61 = vld [vmem:[%s7927_s28 + $0x520] sm:$0xf] }
 0x1e1   : > { %v559_v18 = vld [vmem:[#allocation1 + $0x3] ss:$4 sm:$0xff]  ;;  %3867 = vmatpush.bf16.msrb.mxu1 %v5287_v12  ;;  %3830 = vmatpush.bf16.msrb.mxu2 %v4871_v29 }
 0x1e2   : > { %v4840_v19 = vrot.slane %v559_v18, 9  ;;  %v5015_v18 = vor.u32 %v6948_v11, %v5014_v7  ;;  %v7056_v7 = vld [vmem:[%s7927_s28 + $0x4ac] sm:$0xf0]  ;;  %v5574_v11 = vld [vmem:[%s7927_s28 + $0x5a0] sm:$0xf] }
 0x1e3   : > { %v7148_v29 = vld [vmem:[%s7927_s28 + $0x78c] sm:$0xf0] }
 0x1e4   : > { %563 = vst [vmem:[#allocation2 + $0x1e] sm:$0x1] %v4840_v19  ;;  %v5143_v19 = vor.u32 %v6980_v14, %v5142_v13  ;;  %3842 = vmatpush.bf16.msrb.mxu3 %v5015_v18  ;;  %v7088_v13 = vld [vmem:[%s7927_s28 + $0x5ac] sm:$0xf0]  ;;  %v5702_v14 = vld [vmem:[%s7927_s28 + $0x6a0] sm:$0xf]  ;;  %v5447_v18 = vor.u32 %v7056_v7, %v5446_v6  ;;  %v5511_v6 = vor.u32 %v7072_v63, %v5510_v61 }
 0x1e5   : > { %3868 = vmatpush.bf16.msrb.mxu1 %v5271_v23  ;;  %3831 = vmatpush.bf16.msrb.mxu2 %v4855_v45  ;;  %v5703_v20 = vor.u32 %v7120_v15, %v5702_v14  ;;  %v5558_v23 = vld [vmem:[%s7927_s28 + $0x580] sm:$0xf]  ;;  %v5639_v7 = vor.u32 %v7104_v2, %v5638_v0  ;;  %v7100_v14 = vld [vmem:[%s7927_s28 + $0x60c] sm:$0xf0] }
 0x1e6   : > { %3855 = vmatpush.bf16.msrb.mxu0 %v5143_v19  ;;  %v5575_v19 = vor.u32 %v7088_v13, %v5574_v11  ;;  %v5559_v31 = vor.u32 %v7084_v25, %v5558_v23  ;;  %v5622_v13 = vld [vmem:[%s7927_s28 + $0x600] sm:$0xf]  ;;  %v7252_v2 = vld [vmem:[%s7927_s28 + $0xacc] sm:$0xf0] }
 0x1e7   : > { %v5750_v15 = vld [vmem:[%s7927_s28 + $0x700] sm:$0xf]  ;;  %v5623_v21 = vor.u32 %v7100_v14, %v5622_v13  ;;  %v7248_v14 = vld [vmem:[%s7927_s28 + $0xaac] sm:$0xf0] }
 0x1e8   : > { %3843 = vmatpush.bf16.msrb.mxu3 %v4999_v32  ;;  %v5687_v32 = vor.u32 %v7116_v27, %v5686_v26  ;;  %v5751_v22 = vor.u32 %v7132_v16, %v5750_v15  ;;  %v6230_v63 = vld [vmem:[%s7927_s28 + $0xac0] sm:$0xf]  ;;  %v7280_v16 = vld [vmem:[%s7927_s28 + $0xbac] sm:$0xf0] }
 0x1e9   : > { %3869 = vmatpush.bf16.msrb.mxu1 %v5255_v37  ;;  %v7080_v37 = vld [vmem:[%s7927_s28 + $0x56c] sm:$0xf0]  ;;  %v6214_v13 = vld [vmem:[%s7927_s28 + $0xaa0] sm:$0xf] }
 0x1ea   : > { %3856 = vmatpush.bf16.msrb.mxu0 %v5127_v33  ;;  %v5414_v33 = vld [vmem:[%s7927_s28 + $0x460] sm:$0xf]  ;;  %v5543_v45 = vor.u32 %v7080_v37, %v5542_v35 }
 0x1eb   : > { %v5990_v37 = vld [vmem:[%s7927_s28 + $0x8e0] sm:$0xf] }
 0x1ec   : > { %3844 = vmatpush.bf16.msrb.mxu3 %v4983_v49  ;;  %v7076_v49 = vld [vmem:[%s7927_s28 + $0x54c] sm:$0xf0]  ;;  %v6342_v15 = vld [vmem:[%s7927_s28 + $0xba0] sm:$0xf] }
 0x1ed   : > { %3870 = vmatpush.bf16.msrb.mxu1 %v5239_v54  ;;  %v5782_v54 = vld [vmem:[%s7927_s28 + $0x740] sm:$0xf] }
 0x1ef   : > { %v589_v50 = vpop.f32.mrf.mxu3 }
 0x1f0   : > { %v590_v55 = vadd.f32 %v8034_v44, %v589_v50  ;;  %v5111_v50 = vor.u32 %v6972_v38, %v5110_v36  ;;  %3889 = vmatpush.bf16.msra.mxu3 %v5607_v57  ;;  %v5815_v36 = vor.u32 %v7148_v29, %v5814_v28  ;;  %v5670_v38 = vld [vmem:[%s7927_s28 + $0x660] sm:$0xf]  ;;  %v5527_v57 = vor.u32 %v7076_v49, %v5526_v48 }
 0x1f1   : > { %3915 = vmatpush.bf16.msra.mxu1 %v5863_v62  ;;  %v5671_v46 = vor.u32 %v7112_v39, %v5670_v38  ;;  %v7192_v38 = vld [vmem:[%s7927_s28 + $0x8ec] sm:$0xf0]  ;;  %v6118_v39 = vld [vmem:[%s7927_s28 + $0x9e0] sm:$0xf] }
 0x1f2   : > { %v8078_v1 = vmax.f32 %v590_v55, 0.0  ;;  %v5479_v55 = vor.u32 %v7064_v42, %v5478_v41  ;;  %3857 = vmatpush.bf16.msrb.mxu0 %v5111_v50  ;;  %v7144_v41 = vld [vmem:[%s7927_s28 + $0x76c] sm:$0xf0]  ;;  %v5415_v42 = vor.u32 %v7048_v34, %v5414_v33 }
 0x1f3   : > { %v5799_v50 = vor.u32 %v7144_v41, %v5798_v40  ;;  %v7224_v40 = vld [vmem:[%s7927_s28 + $0x9ec] sm:$0xf0]  ;;  %v6246_v41 = vld [vmem:[%s7927_s28 + $0xae0] sm:$0xf] }
 0x1f4   : > { %597 = vst [vmem:[#allocation2 + $0x1] sm:$0x1] %v8078_v1  ;;  %v4844_v8 = vrot.slane %v8078_v1, 9  ;;  %3876 = vmatpush.bf16.msra.mxu2 %v5479_v55  ;;  %3890 = vmatpush.bf16.msra.mxu3 %v5591_v9  ;;  %v7140_v55 = vld [vmem:[%s7927_s28 + $0x74c] sm:$0xf0] }
 0x1f5   : > { %603 = vst.sshfl [vmem:[#allocation1] sm:$0xff pattern:$0x73625140] %v8078_v1  ;;  %v5783_v62 = vor.u32 %v7140_v55, %v5782_v54  ;;  %v7036_v9 = vld [vmem:[%s7927_s28 + $0x40c] sm:$0xf0] }
 0x1f6   : > { %602 = vst [vmem:[#allocation2 + $0x3] sm:$0x1] %v4844_v8  ;;  %3902 = vmatpush.bf16.msra.mxu0 %v5735_v58  ;;  %v5655_v58 = vor.u32 %v7108_v52, %v5654_v51  ;;  %v7188_v51 = vld [vmem:[%s7927_s28 + $0x8cc] sm:$0xf0]  ;;  %v6102_v52 = vld [vmem:[%s7927_s28 + $0x9c0] sm:$0xf] }
 0x1f7   : > { %v592_v53 = vpop.f32.mrf.mxu3 }
 0x1f8   : > { %v593_v56 = vadd.f32 %v8034_v44, %v592_v53  ;;  %v7156_v44 = vld [vmem:[%s7927_s28 + $0x7cc] sm:$0xf0]  ;;  %3877 = vmatpush.bf16.msra.mxu2 %v5463_v5  ;;  %3891 = vmatpush.bf16.msra.mxu3 %v5575_v19  ;;  %v5383_v5 = vor.u32 %v7040_v60, %v5382_v59 }
 0x1f9   : > { %v5847_v12 = vor.u32 %v7156_v44, %v5846_v4  ;;  %v5766_v4 = vld [vmem:[%s7927_s28 + $0x720] sm:$0xf]  ;;  %v7136_v44 = vld [vmem:[%s7927_s28 + $0x72c] sm:$0xf0] }
 0x1fa   : > { %v8124_v3 = vmax.f32 %v593_v56, 0.0  ;;  %3903 = vmatpush.bf16.msra.mxu0 %v5719_v10  ;;  %v5399_v56 = vor.u32 %v7044_v47, %v5398_v43  ;;  %v5494_v10 = vld [vmem:[%s7927_s28 + $0x500] sm:$0xf]  ;;  %v5767_v11 = vor.u32 %v7136_v44, %v5766_v4  ;;  %v7284_v44 = vld [vmem:[%s7927_s28 + $0xbcc] sm:$0xf0] }
 0x1fb   : > { %3916 = vmatpush.bf16.msra.mxu1 %v5847_v12  ;;  %v7068_v12 = vld [vmem:[%s7927_s28 + $0x50c] sm:$0xf0]  ;;  %v6374_v43 = vld [vmem:[%s7927_s28 + $0xbe0] sm:$0xf] }
 0x1fc   : > { %639 = vst [vmem:[#allocation2 + $0x11] sm:$0x1] %v8124_v3  ;;  %v4848_v8 = vrot.slane %v8124_v3, 9  ;;  %3878 = vmatpush.bf16.msra.mxu2 %v5447_v18  ;;  %3892 = vmatpush.bf16.msra.mxu3 %v5559_v31  ;;  %v605_v53 = vld [vmem:[#allocation1 + $0x1] ss:$4 sm:$0xff] }
 0x1fd   : > { %607 = vst [vmem:[#allocation2 + $0x5] sm:$0x1] %v605_v53  ;;  %v7220_v53 = vld [vmem:[%s7927_s28 + $0x9cc] sm:$0xf0]  ;;  %v6358_v4 = vld [vmem:[%s7927_s28 + $0xbc0] sm:$0xf] }
 0x1fe   : > { %644 = vst [vmem:[#allocation2 + $0x13] sm:$0x1] %v4848_v8  ;;  %3904 = vmatpush.bf16.msra.mxu0 %v5703_v20  ;;  %v5366_v8 = vld [vmem:[%s7927_s28 + $0x400] sm:$0xf]  ;;  %v5495_v20 = vor.u32 %v7068_v12, %v5494_v10  ;;  %v6359_v10 = vor.u32 %v7284_v44, %v6358_v4  ;;  %v7216_v12 = vld [vmem:[%s7927_s28 + $0x9ac] sm:$0xf0] }
 0x1ff   : > { %3917 = vmatpush.bf16.msra.mxu1 %v5831_v24  ;;  %608 = vst.sshfl [vmem:[#allocation1] sm:$0xff pattern:$0x73625140] %v8078_v1  ;;  %v5367_v18 = vor.u32 %v7036_v9, %v5366_v8  ;;  %v7184_v8 = vld [vmem:[%s7927_s28 + $0x8ac] sm:$0xf0]  ;;  %v6231_v9 = vor.u32 %v7252_v2, %v6230_v63 }
 0x200   : > { %3879 = vmatpush.bf16.msra.mxu2 %v5431_v30  ;;  %3893 = vmatpush.bf16.msra.mxu3 %v5543_v45  ;;  %v6294_v63 = vld [vmem:[%s7927_s28 + $0xb40] sm:$0xf] }
 0x201   : > { %v5894_v44 = vld [vmem:[%s7927_s28 + $0x820] sm:$0xf] }
 0x202   : > { %3905 = vmatpush.bf16.msra.mxu0 %v5687_v32 }
 0x203   : > { %3918 = vmatpush.bf16.msra.mxu1 %v5815_v36 }
 0x204   : > { %3880 = vmatpush.bf16.msra.mxu2 %v5415_v42  ;;  %3894 = vmatpush.bf16.msra.mxu3 %v5527_v57  ;;  %v7256_v42 = vld [vmem:[%s7927_s28 + $0xaec] sm:$0xf0] }
 0x205   : > { %v6247_v59 = vor.u32 %v7256_v42, %v6246_v41  ;;  %v6182_v41 = vld [vmem:[%s7927_s28 + $0xa60] sm:$0xf]  ;;  %v7240_v42 = vld [vmem:[%s7927_s28 + $0xa6c] sm:$0xf0] }
 0x206   : > { %3906 = vmatpush.bf16.msra.mxu0 %v5671_v46  ;;  %v610_v17 = vld [vmem:[#allocation1 + $0x1] ss:$4 sm:$0xff] }
 0x207   : > { %3919 = vmatpush.bf16.msra.mxu1 %v5799_v50  ;;  %v4845_v19 = vrot.slane %v610_v17, 9  ;;  %615 = vst.sshfl [vmem:[#allocation1] sm:$0xff pattern:$0x73625140] %v8078_v1  ;;  %v7288_v46 = vld [vmem:[%s7927_s28 + $0xbec] sm:$0xf0] }
 0x208   : > { %3881 = vmatpush.bf16.msra.mxu2 %v5399_v56  ;;  %3895 = vmatpush.bf16.msra.mxu3 %v5511_v6  ;;  %v5974_v50 = vld [vmem:[%s7927_s28 + $0x8c0] sm:$0xf]  ;;  %v6103_v6 = vor.u32 %v7220_v53, %v6102_v52  ;;  %v6183_v53 = vor.u32 %v7240_v42, %v6182_v41  ;;  %v7348_v41 = vld [vmem:[%s7927_s28 + $0xdcc] sm:$0xf0] }
 0x209   : > { %614 = vst [vmem:[#allocation2 + $0x7] sm:$0x1] %v4845_v19  ;;  %v5942_v19 = vld [vmem:[%s7927_s28 + $0x880] sm:$0xf] }
 0x20a   : > { %3907 = vmatpush.bf16.msra.mxu0 %v5655_v58  ;;  %v6119_v58 = vor.u32 %v7224_v40, %v6118_v39  ;;  %v6054_v39 = vld [vmem:[%s7927_s28 + $0x960] sm:$0xf]  ;;  %v7208_v40 = vld [vmem:[%s7927_s28 + $0x96c] sm:$0xf0] }
 0x20b   : > { %3920 = vmatpush.bf16.msra.mxu1 %v5783_v62  ;;  %v6375_v62 = vor.u32 %v7288_v46, %v6374_v43  ;;  %v6310_v43 = vld [vmem:[%s7927_s28 + $0xb60] sm:$0xf] }
 0x20c   : > { %3882 = vmatpush.bf16.msra.mxu2 %v5383_v5  ;;  %3896 = vmatpush.bf16.msra.mxu3 %v5495_v20  ;;  %v5975_v5 = vor.u32 %v7188_v51, %v5974_v50  ;;  %v7180_v20 = vld [vmem:[%s7927_s28 + $0x88c] sm:$0xf0]  ;;  %v5910_v50 = vld [vmem:[%s7927_s28 + $0x840] sm:$0xf] }
 0x20d   : > { %v7172_v51 = vld [vmem:[%s7927_s28 + $0x84c] sm:$0xf0] }
 0x20e   : > { %3908 = vmatpush.bf16.msra.mxu0 %v5639_v7  ;;  %v617_v23 = vld [vmem:[#allocation1 + $0x2] ss:$4 sm:$0xff]  ;;  %v5911_v2 = vor.u32 %v7172_v51, %v5910_v50 }
 0x20f   : > { %3921 = vmatpush.bf16.msra.mxu1 %v5767_v11  ;;  %620 = vst.sshfl [vmem:[#allocation1] sm:$0xff pattern:$0x73625140] %v8078_v1  ;;  %v5958_v7 = vld [vmem:[%s7927_s28 + $0x8a0] sm:$0xf] }
 0x210   : > { %3883 = vmatpush.bf16.msra.mxu2 %v5367_v18  ;;  %619 = vst [vmem:[#allocation2 + $0x9] sm:$0x1] %v617_v23  ;;  %v681_v36 = vld [vmem:[#allocation2] sm:$0xff]  ;;  %v5959_v17 = vor.u32 %v7184_v8, %v5958_v7 }
 0x211   : > { %v6086_v11 = vld [vmem:[%s7927_s28 + $0x9a0] sm:$0xf] }
 0x212   : > { %3909 = vmatpush.bf16.msra.mxu0 %v5623_v21  ;;  %v6087_v18 = vor.u32 %v7216_v12, %v6086_v11  ;;  %v6070_v21 = vld [vmem:[%s7927_s28 + $0x980] sm:$0xf]  ;;  %v7232_v11 = vld [vmem:[%s7927_s28 + $0xa2c] sm:$0xf0] }
 0x213   : > { %3922 = vmatpush.bf16.msra.mxu1 %v5751_v22  ;;  %v6022_v8 = vld [vmem:[%s7927_s28 + $0x920] sm:$0xf] }
 0x214   : > { %v6278_v12 = vld [vmem:[%s7927_s28 + $0xb20] sm:$0xf] }
 0x216   : > { %v622_v24 = vld [vmem:[#allocation1 + $0x2] ss:$4 sm:$0xff] }
 0x217   : > { %627 = vst.sshfl [vmem:[#allocation1] sm:$0xff pattern:$0x73625140] %v8078_v1  ;;  %v4846_v25 = vrot.slane %v622_v24, 9 }
 0x219   : > { %626 = vst [vmem:[#allocation2 + $0xb] sm:$0x1] %v4846_v25 }
 0x21e   : > { %v629_v26 = vld [vmem:[#allocation1 + $0x3] ss:$4 sm:$0xff] }
 0x21f   : > { %632 = vst.sshfl [vmem:[#allocation1] sm:$0xff pattern:$0x73625140] %v8078_v1 }
 0x220   : > { %631 = vst [vmem:[#allocation2 + $0xd] sm:$0x1] %v629_v26  ;;  %v6215_v26 = vor.u32 %v7248_v14, %v6214_v13  ;;  %v7264_v13 = vld [vmem:[%s7927_s28 + $0xb2c] sm:$0xf0]  ;;  %v5878_v14 = vld [vmem:[%s7927_s28 + $0x800] sm:$0xf] }
 0x226   : > { %v634_v27 = vld [vmem:[#allocation1 + $0x3] ss:$4 sm:$0xff] }
 0x227   : > { %645 = vst.sshfl [vmem:[#allocation1] sm:$0xff pattern:$0x73625140] %v8124_v3  ;;  %v4847_v28 = vrot.slane %v634_v27, 9  ;;  %v6343_v27 = vor.u32 %v7280_v16, %v6342_v15  ;;  %v7164_v15 = vld [vmem:[%s7927_s28 + $0x80c] sm:$0xf0] }
 0x228   : > { %v6006_v16 = vld [vmem:[%s7927_s28 + $0x900] sm:$0xf] }
 0x229   : > { %638 = vst [vmem:[#allocation2 + $0xf] sm:$0x1] %v4847_v28  ;;  %v7212_v28 = vld [vmem:[%s7927_s28 + $0x98c] sm:$0xf0] }
 0x22e   : > { %v647_v29 = vld [vmem:[#allocation1 + $0x1] ss:$4 sm:$0xff] }
 0x22f   : > { %650 = vst.sshfl [vmem:[#allocation1] sm:$0xff pattern:$0x73625140] %v8124_v3 }
 0x230   : > { %649 = vst [vmem:[#allocation2 + $0x15] sm:$0x1] %v647_v29  ;;  %v682_v30 = vld [vmem:[#allocation2 + $0x8] sm:$0xff] }
 0x231   : > { %691 = vst [vmem:[#allocation1 + $0x20] ss:$4 sm:$0xff] %v682_v30  ;;  %v6198_v29 = vld [vmem:[%s7927_s28 + $0xa80] sm:$0xf]  ;;  %v7244_v30 = vld [vmem:[%s7927_s28 + $0xa8c] sm:$0xf0] }
 0x236   : > { %v652_v31 = vld [vmem:[#allocation1 + $0x1] ss:$4 sm:$0xff] }
 0x237   : > { %657 = vst.sshfl [vmem:[#allocation1] sm:$0xff pattern:$0x73625140] %v8124_v3  ;;  %v4849_v32 = vrot.slane %v652_v31, 9  ;;  %v6326_v31 = vld [vmem:[%s7927_s28 + $0xb80] sm:$0xf] }
 0x238   : > { %v696_v22 = vld.sshfl [vmem:[#allocation1 + $0x20] sm:$0xff pattern:$0x73625140]  ;;  %v697_v23 = vld.sshfl [vmem:[#allocation1 + $0x28] sm:$0xff pattern:$0x73625140] }
 0x239   : > { %656 = vst [vmem:[#allocation2 + $0x17] sm:$0x1] %v4849_v32  ;;  %v698_v24 = vld.sshfl [vmem:[#allocation1 + $0x30] sm:$0xff pattern:$0x73625140]  ;;  %v8241_v46 = vpack.c.bf16 %v696_v22, %v696_v22 }
 0x23a   : > { %v699_v25 = vld.sshfl [vmem:[#allocation1 + $0x38] sm:$0xff pattern:$0x73625140]  ;;  %v6262_v22 = vld [vmem:[%s7927_s28 + $0xb00] sm:$0xf] }
 0x23b   : > { %v7276_v32 = vld [vmem:[%s7927_s28 + $0xb8c] sm:$0xf0]  ;;  %v8249_v52 = vpack.c.bf16 %v699_v25, %v699_v25 }
 0x23c   : > { %v7260_v25 = vld [vmem:[%s7927_s28 + $0xb0c] sm:$0xf0] }
 0x23e   : > { %v659_v1 = vld [vmem:[#allocation1 + $0x2] ss:$4 sm:$0xff] }
 0x23f   : > { %662 = vst.sshfl [vmem:[#allocation1] sm:$0xff pattern:$0x73625140] %v8124_v3 }
 0x240   : > { %661 = vst [vmem:[#allocation2 + $0x19] sm:$0x1] %v659_v1  ;;  %v683_v45 = vld [vmem:[#allocation2 + $0x10] sm:$0xff] }
 0x246   : > { %v664_v33 = vld [vmem:[#allocation1 + $0x2] ss:$4 sm:$0xff] }
 0x247   : > { %669 = vst.sshfl [vmem:[#allocation1] sm:$0xff pattern:$0x73625140] %v8124_v3  ;;  %v4850_v34 = vrot.slane %v664_v33, 9  ;;  %v5943_v33 = vor.u32 %v7180_v20, %v5942_v19  ;;  %v6134_v20 = vld [vmem:[%s7927_s28 + $0xa00] sm:$0xf] }
 0x249   : > { %668 = vst [vmem:[#allocation2 + $0x1b] sm:$0x1] %v4850_v34  ;;  %v6071_v34 = vor.u32 %v7212_v28, %v6070_v21  ;;  %v7228_v21 = vld [vmem:[%s7927_s28 + $0xa0c] sm:$0xf0]  ;;  %v6630_v28 = vld [vmem:[%s7927_s28 + $0xde0] sm:$0xf] }
 0x24e   : > { %v671_v35 = vld [vmem:[#allocation1 + $0x3] ss:$4 sm:$0xff] }
 0x24f   : > { %674 = vst.sshfl [vmem:[#allocation1] sm:$0xff pattern:$0x73625140] %v8124_v3  ;;  %v5991_v3 = vor.u32 %v7192_v38, %v5990_v37  ;;  %v6199_v37 = vor.u32 %v7244_v30, %v6198_v29  ;;  %v6327_v38 = vor.u32 %v7276_v32, %v6326_v31  ;;  %v7352_v29 = vld [vmem:[%s7927_s28 + $0xdec] sm:$0xf0] }
 0x250   : > { %689 = vst [vmem:[#allocation1] ss:$4 sm:$0xff] %v681_v36  ;;  %v7176_v36 = vld [vmem:[%s7927_s28 + $0x86c] sm:$0xf0]  ;;  %v6758_v30 = vld [vmem:[%s7927_s28 + $0xee0] sm:$0xf] }
 0x251   : > { %673 = vst [vmem:[#allocation2 + $0x1d] sm:$0x1] %v671_v35  ;;  %v5926_v35 = vld [vmem:[%s7927_s28 + $0x860] sm:$0xf]  ;;  %v7384_v31 = vld [vmem:[%s7927_s28 + $0xeec] sm:$0xf0] }
 0x252   : > { %v6886_v32 = vld [vmem:[%s7927_s28 + $0xfe0] sm:$0xf] }
 0x256   : > { %v676_v47 = vld [vmem:[#allocation1 + $0x3] ss:$4 sm:$0xff] }
 0x257   : > { %v692_v48 = vld.sshfl [vmem:[#allocation1] sm:$0xff pattern:$0x73625140]  ;;  %v693_v49 = vld.sshfl [vmem:[#allocation1 + $0x8] sm:$0xff pattern:$0x73625140] }
 0x258   : > { %v8201_v54 = vpack.c.bf16 %v692_v48, %v692_v48  ;;  %v8203_v55 = vpack.c.bf16 %v693_v49, %v693_v49  ;;  %v694_v56 = vld.sshfl [vmem:[#allocation1 + $0x10] sm:$0xff pattern:$0x73625140]  ;;  %v695_v57 = vld.sshfl [vmem:[#allocation1 + $0x18] sm:$0xff pattern:$0x73625140]  ;;  %v8245_v48 = vpack.c.bf16 %v698_v24, %v698_v24  ;;  %v5927_v49 = vor.u32 %v7176_v36, %v5926_v35 }
 0x259   : > { %v8205_v60 = vpack.c.bf16 %v694_v56, %v694_v56  ;;  %700 = vst [vmem:[#allocation1] ss:$4 sm:$0xff] %v683_v45  ;;  %v8207_v61 = vpack.c.bf16 %v695_v57, %v695_v57  ;;  %v4851_v0 = vrot.slane %v676_v47, 9  ;;  %v7272_v45 = vld [vmem:[%s7927_s28 + $0xb6c] sm:$0xf0]  ;;  %v8243_v47 = vpack.c.bf16 %v697_v23, %v697_v23 }
 0x25a   : > { %3832 = vmatmul.bf16.vlgmr.msrb.gmra.mxu2 %v8201_v54  ;;  %3845 = vmatmul.bf16.vlgmr.msrb.gmra.mxu3 %v8203_v55  ;;  %v6311_v56 = vor.u32 %v7272_v45, %v6310_v43  ;;  %v6038_v57 = vld [vmem:[%s7927_s28 + $0x940] sm:$0xf]  ;;  %v6279_v24 = vor.u32 %v7264_v13, %v6278_v12  ;;  %v7316_v36 = vld [vmem:[%s7927_s28 + $0xccc] sm:$0xf0]  ;;  %v6631_v43 = vor.u32 %v7352_v29, %v6630_v28 }
 0x25b   : > { %3858 = vmatmul.bf16.vlgmr.msrb.gmra.mxu0 %v8205_v60  ;;  %3871 = vmatmul.bf16.vlgmr.msrb.gmra.mxu1 %v8207_v61  ;;  %680 = vst [vmem:[#allocation2 + $0x1f] sm:$0x1] %v4851_v0  ;;  %v7268_v0 = vld [vmem:[%s7927_s28 + $0xb4c] sm:$0xf0]  ;;  %v6486_v35 = vld [vmem:[%s7927_s28 + $0xcc0] sm:$0xf] }
 0x25c   : > { %3928 = vmatpush.bf16.msrb.mxu2 %v5991_v3  ;;  %3941 = vmatpush.bf16.msrb.mxu3 %v6119_v58  ;;  %v6055_v3 = vor.u32 %v7208_v40, %v6054_v39  ;;  %v7204_v58 = vld [vmem:[%s7927_s28 + $0x94c] sm:$0xf0]  ;;  %v6295_v7 = vor.u32 %v7268_v0, %v6294_v63  ;;  %v6263_v39 = vor.u32 %v7260_v25, %v6262_v22  ;;  %v6854_v12 = vld [vmem:[%s7927_s28 + $0xfa0] sm:$0xf] }
 0x25d   : > { %3954 = vmatpush.bf16.msrb.mxu0 %v6247_v59  ;;  %3967 = vmatpush.bf16.msrb.mxu1 %v6375_v62  ;;  %v6166_v59 = vld [vmem:[%s7927_s28 + $0xa40] sm:$0xf]  ;;  %v7236_v62 = vld [vmem:[%s7927_s28 + $0xa4c] sm:$0xf0]  ;;  %v6039_v4 = vor.u32 %v7204_v58, %v6038_v57 }
 0x25e   : > { %v6870_v57 = vld [vmem:[%s7927_s28 + $0xfc0] sm:$0xf]  ;;  %v7412_v58 = vld [vmem:[%s7927_s28 + $0xfcc] sm:$0xf0] }
 0x25f   : > { %v7408_v13 = vld [vmem:[%s7927_s28 + $0xfac] sm:$0xf0]  ;;  %v6710_v22 = vld [vmem:[%s7927_s28 + $0xe80] sm:$0xf] }
 0x260   : > { %3929 = vmatpush.bf16.msrb.mxu2 %v5975_v5  ;;  %3942 = vmatpush.bf16.msrb.mxu3 %v6103_v6  ;;  %v7168_v5 = vld [vmem:[%s7927_s28 + $0x82c] sm:$0xf0]  ;;  %v6167_v6 = vor.u32 %v7236_v62, %v6166_v59  ;;  %v703_v45 = vld.sshfl [vmem:[#allocation1 + $0x8] sm:$0xff pattern:$0x73625140]  ;;  %v6487_v59 = vor.u32 %v7316_v36, %v6486_v35 }
 0x261   : > { %3955 = vmatpush.bf16.msrb.mxu0 %v6231_v9  ;;  %3968 = vmatpush.bf16.msrb.mxu1 %v6359_v10  ;;  %v7200_v9 = vld [vmem:[%s7927_s28 + $0x92c] sm:$0xf0]  ;;  %v6150_v10 = vld [vmem:[%s7927_s28 + $0xa20] sm:$0xf]  ;;  %v8295_v0 = vpack.c.bf16 %v703_v45, %v703_v45 }
 0x262   : > { %v684_v1 = vld [vmem:[#allocation2 + $0x18] sm:$0xff]  ;;  %v6023_v19 = vor.u32 %v7200_v9, %v6022_v8  ;;  %v6151_v23 = vor.u32 %v7232_v11, %v6150_v10  ;;  %v705_v51 = vld.sshfl [vmem:[#allocation1 + $0x18] sm:$0xff pattern:$0x73625140]  ;;  %v6598_v8 = vld [vmem:[%s7927_s28 + $0xda0] sm:$0xf] }
 0x263   : > { %701 = vst [vmem:[#allocation1 + $0x20] ss:$4 sm:$0xff] %v684_v1  ;;  %v7416_v1 = vld [vmem:[%s7927_s28 + $0xfec] sm:$0xf0]  ;;  %v6726_v10 = vld [vmem:[%s7927_s28 + $0xea0] sm:$0xf] }
 0x264   : > { %3930 = vmatpush.bf16.msrb.mxu2 %v5959_v17  ;;  %3943 = vmatpush.bf16.msrb.mxu3 %v6087_v18  ;;  %v7196_v17 = vld [vmem:[%s7927_s28 + $0x90c] sm:$0xf0]  ;;  %v5895_v18 = vor.u32 %v7168_v5, %v5894_v44  ;;  %v6887_v50 = vor.u32 %v7416_v1, %v6886_v32  ;;  %v8301_v5 = vpack.c.bf16 %v705_v51, %v705_v51  ;;  %v6438_v28 = vld [vmem:[%s7927_s28 + $0xc60] sm:$0xf] }
 0x265   : > { %3956 = vmatpush.bf16.msrb.mxu0 %v6215_v26  ;;  %3969 = vmatpush.bf16.msrb.mxu1 %v6343_v27  ;;  %v6502_v26 = vld [vmem:[%s7927_s28 + $0xce0] sm:$0xf]  ;;  %v7320_v27 = vld [vmem:[%s7927_s28 + $0xcec] sm:$0xf0] }
 0x266   : > { %v702_v40 = vld.sshfl [vmem:[#allocation1] sm:$0xff pattern:$0x73625140]  ;;  %v6503_v42 = vor.u32 %v7320_v27, %v6502_v26  ;;  %v6566_v32 = vld [vmem:[%s7927_s28 + $0xd60] sm:$0xf] }
 0x267   : > { %v8293_v63 = vpack.c.bf16 %v702_v40, %v702_v40  ;;  %v7312_v44 = vld [vmem:[%s7927_s28 + $0xcac] sm:$0xf0]  ;;  %v6822_v35 = vld [vmem:[%s7927_s28 + $0xf60] sm:$0xf] }
 0x268   : > { %3931 = vmatpush.bf16.msrb.mxu2 %v5943_v33  ;;  %3944 = vmatpush.bf16.msrb.mxu3 %v6071_v34  ;;  %v5879_v33 = vor.u32 %v7164_v15, %v5878_v14  ;;  %v6007_v34 = vor.u32 %v7196_v17, %v6006_v16  ;;  %v7344_v9 = vld [vmem:[%s7927_s28 + $0xdac] sm:$0xf0]  ;;  %v6454_v16 = vld [vmem:[%s7927_s28 + $0xc80] sm:$0xf] }
 0x269   : > { %3957 = vmatpush.bf16.msrb.mxu0 %v6199_v37  ;;  %3970 = vmatpush.bf16.msrb.mxu1 %v6327_v38  ;;  %v6614_v37 = vld [vmem:[%s7927_s28 + $0xdc0] sm:$0xf]  ;;  %v6135_v38 = vor.u32 %v7228_v21, %v6134_v20  ;;  %v7376_v11 = vld [vmem:[%s7927_s28 + $0xeac] sm:$0xf0]  ;;  %v6599_v15 = vor.u32 %v7344_v9, %v6598_v8 }
 0x26a   : > { %3884 = vmatmul.bf16.vlgmr.msra.gmra.mxu2 %v8241_v46  ;;  %3897 = vmatmul.bf16.vlgmr.msra.gmra.mxu3 %v8243_v47  ;;  %v6615_v62 = vor.u32 %v7348_v41, %v6614_v37  ;;  %v7308_v17 = vld [vmem:[%s7927_s28 + $0xc8c] sm:$0xf0]  ;;  %v6582_v20 = vld [vmem:[%s7927_s28 + $0xd80] sm:$0xf] }
 0x26b   : > { %3910 = vmatmul.bf16.vlgmr.msra.gmra.mxu0 %v8245_v48  ;;  %3923 = vmatmul.bf16.vlgmr.msra.gmra.mxu1 %v8249_v52  ;;  %v7340_v21 = vld [vmem:[%s7927_s28 + $0xd8c] sm:$0xf0]  ;;  %v6455_v26 = vor.u32 %v7308_v17, %v6454_v16  ;;  %v6790_v8 = vld [vmem:[%s7927_s28 + $0xf20] sm:$0xf] }
 0x26c   : > { %3932 = vmatpush.bf16.msrb.mxu2 %v5927_v49  ;;  %3945 = vmatpush.bf16.msrb.mxu3 %v6055_v3  ;;  %v704_v49 = vld.sshfl [vmem:[#allocation1 + $0x10] sm:$0xff pattern:$0x73625140]  ;;  %v6759_v3 = vor.u32 %v7384_v31, %v6758_v30  ;;  %v7404_v25 = vld [vmem:[%s7927_s28 + $0xf8c] sm:$0xf0]  ;;  %v6583_v27 = vor.u32 %v7340_v21, %v6582_v20 }
 0x26d   : > { %3958 = vmatpush.bf16.msrb.mxu0 %v6183_v53  ;;  %3971 = vmatpush.bf16.msrb.mxu1 %v6311_v56  ;;  %v6742_v53 = vld [vmem:[%s7927_s28 + $0xec0] sm:$0xf]  ;;  %v7380_v56 = vld [vmem:[%s7927_s28 + $0xecc] sm:$0xf0] }
 0x26e   : > { %v7304_v29 = vld [vmem:[%s7927_s28 + $0xc6c] sm:$0xf0]  ;;  %v6774_v20 = vld [vmem:[%s7927_s28 + $0xf00] sm:$0xf] }
 0x26f   : > { %v7336_v1 = vld [vmem:[%s7927_s28 + $0xd6c] sm:$0xf0]  ;;  %v6439_v37 = vor.u32 %v7304_v29, %v6438_v28  ;;  %v5224_v29 = vld [vmem:[%s7927_s28 + $0x2f0] sm:$0xf0] }
 0x270   : > { %3933 = vmatpush.bf16.msrb.mxu2 %v5911_v2  ;;  %3946 = vmatpush.bf16.msrb.mxu3 %v6039_v4  ;;  %v8297_v2 = vpack.c.bf16 %v704_v49, %v704_v49  ;;  %v6470_v4 = vld [vmem:[%s7927_s28 + $0xca0] sm:$0xf]  ;;  %v7400_v36 = vld [vmem:[%s7927_s28 + $0xf6c] sm:$0xf0] }
 0x271   : > { %3959 = vmatpush.bf16.msrb.mxu0 %v6167_v6  ;;  %3972 = vmatpush.bf16.msrb.mxu1 %v6295_v7  ;;  %v6743_v6 = vor.u32 %v7380_v56, %v6742_v53  ;;  %v6871_v7 = vor.u32 %v7412_v58, %v6870_v57  ;;  %v6471_v14 = vor.u32 %v7312_v44, %v6470_v4  ;;  %v7300_v40 = vld [vmem:[%s7927_s28 + $0xc4c] sm:$0xf0]  ;;  %v6678_v49 = vld [vmem:[%s7927_s28 + $0xe40] sm:$0xf] }
 0x272   : > { %v7332_v45 = vld [vmem:[%s7927_s28 + $0xd4c] sm:$0xf0]  ;;  %v6406_v57 = vld [vmem:[%s7927_s28 + $0xc20] sm:$0xf] }
 0x273   : > { %v7396_v51 = vld [vmem:[%s7927_s28 + $0xf4c] sm:$0xf0]  ;;  %v6534_v4 = vld [vmem:[%s7927_s28 + $0xd20] sm:$0xf] }
 0x274   : > { %3934 = vmatpush.bf16.msrb.mxu2 %v5895_v18  ;;  %3947 = vmatpush.bf16.msrb.mxu3 %v6023_v19  ;;  %v6727_v18 = vor.u32 %v7376_v11, %v6726_v10  ;;  %v6855_v19 = vor.u32 %v7408_v13, %v6854_v12  ;;  %v7296_v58 = vld [vmem:[%s7927_s28 + $0xc2c] sm:$0xf0]  ;;  %v6390_v10 = vld [vmem:[%s7927_s28 + $0xc00] sm:$0xf] }
 0x275   : > { %3960 = vmatpush.bf16.msrb.mxu0 %v6151_v23  ;;  %3973 = vmatpush.bf16.msrb.mxu1 %v6279_v24  ;;  %v7372_v23 = vld [vmem:[%s7927_s28 + $0xe8c] sm:$0xf0]  ;;  %v6838_v24 = vld [vmem:[%s7927_s28 + $0xf80] sm:$0xf]  ;;  %v6407_v11 = vor.u32 %v7296_v58, %v6406_v57 }
 0x276   : > { %v6711_v30 = vor.u32 %v7372_v23, %v6710_v22  ;;  %v6839_v31 = vor.u32 %v7404_v25, %v6838_v24  ;;  %v7328_v44 = vld [vmem:[%s7927_s28 + $0xd2c] sm:$0xf0]  ;;  %v6934_v22 = vld [vmem:[%s7927_s28 + $0xe4] sm:$0xf]  ;;  %v4968_v23 = vld [vmem:[%s7927_s28 + $0xf0] sm:$0xf0] }
 0x277   : > { %v7392_v9 = vld [vmem:[%s7927_s28 + $0xf2c] sm:$0xf0]  ;;  %v6535_v12 = vor.u32 %v7328_v44, %v6534_v4  ;;  %v6966_v24 = vld [vmem:[%s7927_s28 + $0x1e4] sm:$0xf]  ;;  %v5096_v25 = vld [vmem:[%s7927_s28 + $0x1f0] sm:$0xf0] }
 0x278   : > { %3935 = vmatpush.bf16.msrb.mxu2 %v5879_v33  ;;  %3948 = vmatpush.bf16.msrb.mxu3 %v6007_v34  ;;  %v6694_v33 = vld [vmem:[%s7927_s28 + $0xe60] sm:$0xf]  ;;  %v7368_v34 = vld [vmem:[%s7927_s28 + $0xe6c] sm:$0xf0]  ;;  %v6791_v17 = vor.u32 %v7392_v9, %v6790_v8  ;;  %v4936_v4 = vld [vmem:[%s7927_s28 + $0xb0] sm:$0xf0] }
 0x279   : > { %3961 = vmatpush.bf16.msrb.mxu0 %v6135_v38  ;;  %3974 = vmatpush.bf16.msrb.mxu1 %v6263_v39  ;;  %v6567_v38 = vor.u32 %v7336_v1, %v6566_v32  ;;  %v6422_v39 = vld [vmem:[%s7927_s28 + $0xc40] sm:$0xf]  ;;  %v6695_v41 = vor.u32 %v7368_v34, %v6694_v33  ;;  %v7292_v13 = vld [vmem:[%s7927_s28 + $0xc0c] sm:$0xf0]  ;;  %v6958_v8 = vld [vmem:[%s7927_s28 + $0x1a4] sm:$0xf] }
 0x27a   : > { %v6423_v53 = vor.u32 %v7300_v40, %v6422_v39  ;;  %v7388_v21 = vld [vmem:[%s7927_s28 + $0xf0c] sm:$0xf0]  ;;  %v707_v34 = vld.sshfl [vmem:[#allocation1 + $0x28] sm:$0xff pattern:$0x73625140] }
 0x27b   : > { %3936 = vmatmul.bf16.vlgmr.msrb.gmra.mxu2 %v8293_v63  ;;  %3949 = vmatmul.bf16.vlgmr.msrb.gmra.mxu3 %v8295_v0  ;;  %v706_v32 = vld.sshfl [vmem:[#allocation1 + $0x20] sm:$0xff pattern:$0x73625140]  ;;  %v6775_v33 = vor.u32 %v7388_v21, %v6774_v20  ;;  %v6930_v39 = vld [vmem:[%s7927_s28 + $0xc4] sm:$0xf] }
 0x27c   : > { %3980 = vmatpush.bf16.msra.mxu2 %v6503_v42  ;;  %3993 = vmatpush.bf16.msra.mxu3 %v6631_v43  ;;  %v6823_v42 = vor.u32 %v7400_v36, %v6822_v35  ;;  %v6550_v43 = vld [vmem:[%s7927_s28 + $0xd40] sm:$0xf]  ;;  %v4971_v36 = vor.u32 %v6934_v22, %v4968_v23  ;;  %v4952_v40 = vld [vmem:[%s7927_s28 + $0xd0] sm:$0xf0]  ;;  %v6954_v20 = vld [vmem:[%s7927_s28 + $0x184] sm:$0xf] }
 0x27d   : > { %4006 = vmatpush.bf16.msra.mxu0 %v6759_v3  ;;  %4019 = vmatpush.bf16.msra.mxu1 %v6887_v50  ;;  %v7364_v3 = vld [vmem:[%s7927_s28 + $0xe4c] sm:$0xf0]  ;;  %v6806_v50 = vld [vmem:[%s7927_s28 + $0xf40] sm:$0xf]  ;;  %v6551_v56 = vor.u32 %v7332_v45, %v6550_v43  ;;  %v6962_v43 = vld [vmem:[%s7927_s28 + $0x1c4] sm:$0xf]  ;;  %v4955_v58 = vor.u32 %v6930_v39, %v4952_v40 }
 0x27e   : > { %3962 = vmatmul.bf16.vlgmr.msrb.gmra.mxu0 %v8297_v2  ;;  %3975 = vmatmul.bf16.vlgmr.msrb.gmra.mxu1 %v8301_v5  ;;  %v708_v35 = vld.sshfl [vmem:[#allocation1 + $0x30] sm:$0xff pattern:$0x73625140]  ;;  %v5080_v45 = vld [vmem:[%s7927_s28 + $0x1d0] sm:$0xf0] }
 0x27f   : > { %v8373_v57 = vpack.c.bf16 %v708_v35, %v708_v35  ;;  %v5064_v9 = vld [vmem:[%s7927_s28 + $0x1b0] sm:$0xf0]  ;;  %v6986_v22 = vld [vmem:[%s7927_s28 + $0x284] sm:$0xf] }
 0x280   : > { %3981 = vmatpush.bf16.msra.mxu2 %v6487_v59  ;;  %3994 = vmatpush.bf16.msra.mxu3 %v6615_v62  ;;  %v6679_v59 = vor.u32 %v7364_v3, %v6678_v49  ;;  %v6807_v62 = vor.u32 %v7396_v51, %v6806_v50  ;;  %v6994_v49 = vld [vmem:[%s7927_s28 + $0x2c4] sm:$0xf]  ;;  %v5208_v3 = vld [vmem:[%s7927_s28 + $0x2d0] sm:$0xf0] }
 0x281   : > { %4007 = vmatpush.bf16.msra.mxu0 %v6743_v6  ;;  %4020 = vmatpush.bf16.msra.mxu1 %v6871_v7  ;;  %v6662_v6 = vld [vmem:[%s7927_s28 + $0xe20] sm:$0xf]  ;;  %v7360_v7 = vld [vmem:[%s7927_s28 + $0xe2c] sm:$0xf0]  ;;  %v7026_v50 = vld [vmem:[%s7927_s28 + $0x3c4] sm:$0xf] }
 0x282   : > { %v6663_v16 = vor.u32 %v7360_v7, %v6662_v6  ;;  %v5336_v51 = vld [vmem:[%s7927_s28 + $0x3d0] sm:$0xf0]  ;;  %v5211_v6 = vor.u32 %v6994_v49, %v5208_v3  ;;  %v7014_v35 = vld [vmem:[%s7927_s28 + $0x364] sm:$0xf] }
 0x283   : > { %v5339_v7 = vor.u32 %v7026_v50, %v5336_v51  ;;  %v5048_v21 = vld [vmem:[%s7927_s28 + $0x190] sm:$0xf0]  ;;  %v6914_v39 = vld [vmem:[%s7927_s28 + $0x44] sm:$0xf] }
 0x284   : > { %3982 = vmatpush.bf16.msra.mxu2 %v6471_v14  ;;  %3995 = vmatpush.bf16.msra.mxu3 %v6599_v15  ;;  %v6518_v14 = vld [vmem:[%s7927_s28 + $0xd00] sm:$0xf]  ;;  %v7324_v15 = vld [vmem:[%s7927_s28 + $0xd0c] sm:$0xf0]  ;;  %v5176_v23 = vld [vmem:[%s7927_s28 + $0x290] sm:$0xf0] }
 0x285   : > { %4008 = vmatpush.bf16.msra.mxu0 %v6727_v18  ;;  %4021 = vmatpush.bf16.msra.mxu1 %v6855_v19  ;;  %v6646_v18 = vld [vmem:[%s7927_s28 + $0xe00] sm:$0xf]  ;;  %v7356_v19 = vld [vmem:[%s7927_s28 + $0xe0c] sm:$0xf0]  ;;  %v6519_v28 = vor.u32 %v7324_v15, %v6518_v14  ;;  %v5067_v15 = vor.u32 %v6958_v8, %v5064_v9  ;;  %v4888_v40 = vld [vmem:[%s7927_s28 + $0x50] sm:$0xf0] }
 0x286   : > { %v6647_v1 = vor.u32 %v7356_v19, %v6646_v18  ;;  %v6978_v49 = vld [vmem:[%s7927_s28 + $0x244] sm:$0xf]  ;;  %v5144_v3 = vld [vmem:[%s7927_s28 + $0x250] sm:$0xf0] }
 0x287   : > { %v7010_v50 = vld [vmem:[%s7927_s28 + $0x344] sm:$0xf]  ;;  %v5272_v51 = vld [vmem:[%s7927_s28 + $0x350] sm:$0xf0] }
 0x288   : > { %3983 = vmatpush.bf16.msra.mxu2 %v6455_v26  ;;  %3996 = vmatpush.bf16.msra.mxu3 %v6583_v27  ;;  %v6998_v26 = vld [vmem:[%s7927_s28 + $0x2e4] sm:$0xf]  ;;  %v6391_v27 = vor.u32 %v7292_v13, %v6390_v10  ;;  %v5320_v13 = vld [vmem:[%s7927_s28 + $0x3b0] sm:$0xf0] }
 0x289   : > { %4009 = vmatpush.bf16.msra.mxu0 %v6711_v30  ;;  %4022 = vmatpush.bf16.msra.mxu1 %v6839_v31  ;;  %v7030_v30 = vld [vmem:[%s7927_s28 + $0x3e4] sm:$0xf]  ;;  %v5352_v31 = vld [vmem:[%s7927_s28 + $0x3f0] sm:$0xf0] }
 0x28a   : > { %v6990_v10 = vld [vmem:[%s7927_s28 + $0x2a4] sm:$0xf]  ;;  %v5000_v9 = vld [vmem:[%s7927_s28 + $0x130] sm:$0xf0] }
 0x28b   : > { %v6942_v8 = vld [vmem:[%s7927_s28 + $0x124] sm:$0xf] }
 0x28c   : > { %3984 = vmatpush.bf16.msra.mxu2 %v6439_v37  ;;  %3997 = vmatpush.bf16.msra.mxu3 %v6567_v38  ;;  %v5099_v37 = vor.u32 %v6966_v24, %v5096_v25  ;;  %v709_v38 = vld.sshfl [vmem:[#allocation1 + $0x38] sm:$0xff pattern:$0x73625140]  ;;  %v7018_v24 = vld [vmem:[%s7927_s28 + $0x384] sm:$0xf] }
 0x28d   : > { %4010 = vmatpush.bf16.msra.mxu0 %v6695_v41  ;;  %4023 = vmatpush.bf16.msra.mxu1 %v6823_v42  ;;  %v5227_v41 = vor.u32 %v6998_v26, %v5224_v29  ;;  %v5355_v42 = vor.u32 %v7030_v30, %v5352_v31  ;;  %v8377_v44 = vpack.c.bf16 %v709_v38, %v709_v38  ;;  %v5304_v25 = vld [vmem:[%s7927_s28 + $0x390] sm:$0xf0] }
 0x28e   : > { %v4904_v29 = vld [vmem:[%s7927_s28 + $0x70] sm:$0xf0]  ;;  %v5179_v30 = vor.u32 %v6986_v22, %v5176_v23  ;;  %v5307_v31 = vor.u32 %v7018_v24, %v5304_v25  ;;  %v6970_v22 = vld [vmem:[%s7927_s28 + $0x204] sm:$0xf] }
 0x28f   : > { %v5112_v23 = vld [vmem:[%s7927_s28 + $0x210] sm:$0xf0]  ;;  %v7002_v24 = vld [vmem:[%s7927_s28 + $0x304] sm:$0xf] }
 0x290   : > { %3985 = vmatpush.bf16.msra.mxu2 %v6423_v53  ;;  %3998 = vmatpush.bf16.msra.mxu3 %v6551_v56  ;;  %v8369_v53 = vpack.c.bf16 %v706_v32, %v706_v32  ;;  %v8371_v56 = vpack.c.bf16 %v707_v34, %v707_v34  ;;  %v6950_v32 = vld [vmem:[%s7927_s28 + $0x164] sm:$0xf]  ;;  %v5160_v34 = vld [vmem:[%s7927_s28 + $0x270] sm:$0xf0] }
 0x291   : > { %4011 = vmatpush.bf16.msra.mxu0 %v6679_v59  ;;  %4024 = vmatpush.bf16.msra.mxu1 %v6807_v62  ;;  %v5083_v59 = vor.u32 %v6962_v43, %v5080_v45  ;;  %v6926_v62 = vld [vmem:[%s7927_s28 + $0xa4] sm:$0xf]  ;;  %v5016_v45 = vld [vmem:[%s7927_s28 + $0x150] sm:$0xf0] }
 0x292   : > { %v4939_v14 = vor.u32 %v6926_v62, %v4936_v4  ;;  %v6946_v43 = vld [vmem:[%s7927_s28 + $0x144] sm:$0xf]  ;;  %v4872_v4 = vld [vmem:[%s7927_s28 + $0x30] sm:$0xf0] }
 0x293   : > { %v6910_v62 = vld [vmem:[%s7927_s28 + $0x24] sm:$0xf]  ;;  %v5240_v25 = vld [vmem:[%s7927_s28 + $0x310] sm:$0xf0] }
 0x294   : > { %3986 = vmatpush.bf16.msra.mxu2 %v6407_v11  ;;  %3999 = vmatpush.bf16.msra.mxu3 %v6535_v12  ;;  %v5192_v11 = vld [vmem:[%s7927_s28 + $0x2b0] sm:$0xf0]  ;;  %v7022_v12 = vld [vmem:[%s7927_s28 + $0x3a4] sm:$0xf] }
 0x295   : > { %4012 = vmatpush.bf16.msra.mxu0 %v6663_v16  ;;  %4025 = vmatpush.bf16.msra.mxu1 %v6791_v17  ;;  %v6922_v16 = vld [vmem:[%s7927_s28 + $0x84] sm:$0xf]  ;;  %v4920_v17 = vld [vmem:[%s7927_s28 + $0x90] sm:$0xf0]  ;;  %v5195_v18 = vor.u32 %v6990_v10, %v5192_v11  ;;  %v5323_v19 = vor.u32 %v7022_v12, %v5320_v13 }
 0x296   : > { %v4923_v26 = vor.u32 %v6922_v16, %v4920_v17  ;;  %v6974_v10 = vld [vmem:[%s7927_s28 + $0x224] sm:$0xf]  ;;  %v5128_v11 = vld [vmem:[%s7927_s28 + $0x230] sm:$0xf0]  ;;  %v5003_v16 = vor.u32 %v6942_v8, %v5000_v9 }
 0x297   : > { %v7006_v12 = vld [vmem:[%s7927_s28 + $0x324] sm:$0xf]  ;;  %v5256_v13 = vld [vmem:[%s7927_s28 + $0x330] sm:$0xf0] }
 0x298   : > { %3987 = vmatpush.bf16.msra.mxu2 %v6391_v27  ;;  %4000 = vmatpush.bf16.msra.mxu3 %v6519_v28  ;;  %v5051_v27 = vor.u32 %v6954_v20, %v5048_v21  ;;  %v6918_v28 = vld [vmem:[%s7927_s28 + $0x64] sm:$0xf]  ;;  %v4856_v17 = vld [vmem:[%s7927_s28 + $0x10] sm:$0xf0]  ;;  %v5131_v20 = vor.u32 %v6974_v10, %v5128_v11  ;;  %v5259_v21 = vor.u32 %v7006_v12, %v5256_v13 }
 0x299   : > { %4013 = vmatpush.bf16.msra.mxu0 %v6647_v1  ;;  %4026 = vmatpush.bf16.msra.mxu1 %v6775_v33  ;;  %v5032_v1 = vld [vmem:[%s7927_s28 + $0x170] sm:$0xf0]  ;;  %v6982_v33 = vld [vmem:[%s7927_s28 + $0x264] sm:$0xf] }
 0x29a   : > { %v5035_v38 = vor.u32 %v6950_v32, %v5032_v1  ;;  %v5736_v1 = vld [vmem:[%s7927_s28 + $0x6f0] sm:$0xf0]  ;;  %v7086_v8 = vld [vmem:[%s7927_s28 + $0x5a4] sm:$0xf] }
 0x29b   : > { %3988 = vmatmul.bf16.vlgmr.msra.gmra.mxu2 %v8369_v53  ;;  %4001 = vmatmul.bf16.vlgmr.msra.gmra.mxu3 %v8371_v56  ;;  %v5576_v9 = vld [vmem:[%s7927_s28 + $0x5b0] sm:$0xf0]  ;;  %v7118_v10 = vld [vmem:[%s7927_s28 + $0x6a4] sm:$0xf] }
 0x29c   : > { %4032 = vmatpush.bf16.msrb.mxu2 %v4971_v36  ;;  %4045 = vmatpush.bf16.msrb.mxu3 %v5099_v37  ;;  %v5288_v36 = vld [vmem:[%s7927_s28 + $0x370] sm:$0xf0]  ;;  %v4907_v37 = vor.u32 %v6918_v28, %v4904_v29  ;;  %v7094_v28 = vld [vmem:[%s7927_s28 + $0x5e4] sm:$0xf] }
 0x29d   : > { %4058 = vmatpush.bf16.msrb.mxu0 %v5227_v41  ;;  %4071 = vmatpush.bf16.msrb.mxu1 %v5355_v42  ;;  %v5163_v41 = vor.u32 %v6982_v33, %v5160_v34  ;;  %v5291_v42 = vor.u32 %v7014_v35, %v5288_v36  ;;  %v5608_v29 = vld [vmem:[%s7927_s28 + $0x5f0] sm:$0xf0]  ;;  %v7158_v33 = vld [vmem:[%s7927_s28 + $0x7e4] sm:$0xf]  ;;  %v5115_v35 = vor.u32 %v6970_v22, %v5112_v23 }
 0x29e   : > { %4014 = vmatmul.bf16.vlgmr.msra.gmra.mxu0 %v8373_v57  ;;  %4027 = vmatmul.bf16.vlgmr.msra.gmra.mxu1 %v8377_v44  ;;  %v5864_v34 = vld [vmem:[%s7927_s28 + $0x7f0] sm:$0xf0]  ;;  %v5243_v36 = vor.u32 %v7002_v24, %v5240_v25  ;;  %v7150_v12 = vld [vmem:[%s7927_s28 + $0x7a4] sm:$0xf] }
 0x29f   : > { %v5704_v11 = vld [vmem:[%s7927_s28 + $0x6b0] sm:$0xf0]  ;;  %v7114_v22 = vld [vmem:[%s7927_s28 + $0x684] sm:$0xf] }
 0x2a0   : > { %4033 = vmatpush.bf16.msrb.mxu2 %v4955_v58  ;;  %4046 = vmatpush.bf16.msrb.mxu3 %v5083_v59  ;;  %v4891_v58 = vor.u32 %v6914_v39, %v4888_v40  ;;  %v5019_v59 = vor.u32 %v6946_v43, %v5016_v45  ;;  %v7058_v39 = vld [vmem:[%s7927_s28 + $0x4c4] sm:$0xf]  ;;  %v5464_v40 = vld [vmem:[%s7927_s28 + $0x4d0] sm:$0xf0] }
 0x2a1   : > { %4059 = vmatpush.bf16.msrb.mxu0 %v5211_v6  ;;  %4072 = vmatpush.bf16.msrb.mxu1 %v5339_v7  ;;  %v5147_v6 = vor.u32 %v6978_v49, %v5144_v3  ;;  %v5275_v7 = vor.u32 %v7010_v50, %v5272_v51  ;;  %v7090_v43 = vld [vmem:[%s7927_s28 + $0x5c4] sm:$0xf]  ;;  %v5592_v45 = vld [vmem:[%s7927_s28 + $0x5d0] sm:$0xf0] }
 0x2a2   : > { %v7122_v49 = vld [vmem:[%s7927_s28 + $0x6c4] sm:$0xf]  ;;  %v5720_v3 = vld [vmem:[%s7927_s28 + $0x6d0] sm:$0xf0] }
 0x2a3   : > { %v7154_v50 = vld [vmem:[%s7927_s28 + $0x7c4] sm:$0xf]  ;;  %v5848_v51 = vld [vmem:[%s7927_s28 + $0x7d0] sm:$0xf0] }
 0x2a4   : > { %4034 = vmatpush.bf16.msrb.mxu2 %v4939_v14  ;;  %4047 = vmatpush.bf16.msrb.mxu3 %v5067_v15  ;;  %v6906_v14 = vld [vmem:[%s7927_s28 + $0x4] sm:$0xf]  ;;  %v4875_v15 = vor.u32 %v6910_v62, %v4872_v4  ;;  %v5448_v4 = vld [vmem:[%s7927_s28 + $0x4b0] sm:$0xf0] }
 0x2a5   : > { %4060 = vmatpush.bf16.msrb.mxu0 %v5195_v18  ;;  %4073 = vmatpush.bf16.msrb.mxu1 %v5323_v19  ;;  %v6938_v18 = vld [vmem:[%s7927_s28 + $0x104] sm:$0xf]  ;;  %v4984_v19 = vld [vmem:[%s7927_s28 + $0x110] sm:$0xf0] }
 0x2a6   : > { %v4987_v32 = vor.u32 %v6938_v18, %v4984_v19  ;;  %v7054_v62 = vld [vmem:[%s7927_s28 + $0x4a4] sm:$0xf]  ;;  %v5832_v13 = vld [vmem:[%s7927_s28 + $0x7b0] sm:$0xf0]  ;;  %v5707_v18 = vor.u32 %v7118_v10, %v5704_v11 }
 0x2a7   : > { %v5835_v19 = vor.u32 %v7150_v12, %v5832_v13  ;;  %v5688_v23 = vld [vmem:[%s7927_s28 + $0x690] sm:$0xf0]  ;;  %v7146_v24 = vld [vmem:[%s7927_s28 + $0x784] sm:$0xf] }
 0x2a8   : > { %4035 = vmatpush.bf16.msrb.mxu2 %v4923_v26  ;;  %4048 = vmatpush.bf16.msrb.mxu3 %v5051_v27  ;;  %v7062_v26 = vld [vmem:[%s7927_s28 + $0x4e4] sm:$0xf]  ;;  %v5480_v27 = vld [vmem:[%s7927_s28 + $0x4f0] sm:$0xf0] }
 0x2a9   : > { %4061 = vmatpush.bf16.msrb.mxu0 %v5179_v30  ;;  %4074 = vmatpush.bf16.msrb.mxu1 %v5307_v31  ;;  %v7126_v30 = vld [vmem:[%s7927_s28 + $0x6e4] sm:$0xf]  ;;  %v4859_v31 = vor.u32 %v6906_v14, %v4856_v17  ;;  %v5451_v14 = vor.u32 %v7054_v62, %v5448_v4  ;;  %v5432_v17 = vld [vmem:[%s7927_s28 + $0x490] sm:$0xf0] }
 0x2aa   : > { %v5816_v25 = vld [vmem:[%s7927_s28 + $0x790] sm:$0xf0]  ;;  %v7038_v62 = vld [vmem:[%s7927_s28 + $0x424] sm:$0xf] }
 0x2ab   : > { %v5384_v4 = vld [vmem:[%s7927_s28 + $0x430] sm:$0xf0]  ;;  %v7102_v10 = vld [vmem:[%s7927_s28 + $0x624] sm:$0xf] }
 0x2ac   : > { %4036 = vmatpush.bf16.msrb.mxu2 %v4907_v37  ;;  %4049 = vmatpush.bf16.msrb.mxu3 %v5035_v38  ;;  %v5483_v37 = vor.u32 %v7062_v26, %v5480_v27  ;;  %v5611_v38 = vor.u32 %v7094_v28, %v5608_v29  ;;  %v7046_v28 = vld [vmem:[%s7927_s28 + $0x464] sm:$0xf]  ;;  %v5416_v29 = vld [vmem:[%s7927_s28 + $0x470] sm:$0xf0] }
 0x2ad   : > { %4062 = vmatpush.bf16.msrb.mxu0 %v5163_v41  ;;  %4075 = vmatpush.bf16.msrb.mxu1 %v5291_v42  ;;  %v5739_v41 = vor.u32 %v7126_v30, %v5736_v1  ;;  %v5867_v42 = vor.u32 %v7158_v33, %v5864_v34  ;;  %v5691_v30 = vor.u32 %v7114_v22, %v5688_v23  ;;  %v5544_v1 = vld [vmem:[%s7927_s28 + $0x570] sm:$0xf0]  ;;  %v7110_v33 = vld [vmem:[%s7927_s28 + $0x664] sm:$0xf] }
 0x2ae   : > { %v5672_v34 = vld [vmem:[%s7927_s28 + $0x670] sm:$0xf0]  ;;  %v7134_v12 = vld [vmem:[%s7927_s28 + $0x724] sm:$0xf] }
 0x2af   : > { %v5640_v11 = vld [vmem:[%s7927_s28 + $0x630] sm:$0xf0]  ;;  %v7098_v22 = vld [vmem:[%s7927_s28 + $0x604] sm:$0xf] }
 0x2b0   : > { %4037 = vmatpush.bf16.msrb.mxu2 %v4891_v58  ;;  %4050 = vmatpush.bf16.msrb.mxu3 %v5019_v59  ;;  %v5467_v58 = vor.u32 %v7058_v39, %v5464_v40  ;;  %v5595_v59 = vor.u32 %v7090_v43, %v5592_v45  ;;  %v7042_v39 = vld [vmem:[%s7927_s28 + $0x444] sm:$0xf]  ;;  %v5400_v40 = vld [vmem:[%s7927_s28 + $0x450] sm:$0xf0] }
 0x2b1   : > { %4063 = vmatpush.bf16.msrb.mxu0 %v5147_v6  ;;  %4076 = vmatpush.bf16.msrb.mxu1 %v5275_v7  ;;  %v5723_v6 = vor.u32 %v7122_v49, %v5720_v3  ;;  %v5851_v7 = vor.u32 %v7154_v50, %v5848_v51  ;;  %v7074_v43 = vld [vmem:[%s7927_s28 + $0x544] sm:$0xf]  ;;  %v5528_v45 = vld [vmem:[%s7927_s28 + $0x550] sm:$0xf0] }
 0x2b2   : > { %v7106_v49 = vld [vmem:[%s7927_s28 + $0x644] sm:$0xf]  ;;  %v5656_v3 = vld [vmem:[%s7927_s28 + $0x650] sm:$0xf0] }
 0x2b3   : > { %v7138_v50 = vld [vmem:[%s7927_s28 + $0x744] sm:$0xf]  ;;  %v5784_v51 = vld [vmem:[%s7927_s28 + $0x750] sm:$0xf0] }
 0x2b4   : > { %4038 = vmatpush.bf16.msrb.mxu2 %v4875_v15  ;;  %4051 = vmatpush.bf16.msrb.mxu3 %v5003_v16  ;;  %v5579_v15 = vor.u32 %v7086_v8, %v5576_v9  ;;  %v7050_v16 = vld [vmem:[%s7927_s28 + $0x484] sm:$0xf]  ;;  %v5512_v9 = vld [vmem:[%s7927_s28 + $0x530] sm:$0xf0] }
 0x2b5   : > { %4064 = vmatpush.bf16.msrb.mxu0 %v5131_v20  ;;  %4077 = vmatpush.bf16.msrb.mxu1 %v5259_v21  ;;  %v7082_v20 = vld [vmem:[%s7927_s28 + $0x584] sm:$0xf]  ;;  %v5560_v21 = vld [vmem:[%s7927_s28 + $0x590] sm:$0xf0]  ;;  %v5435_v26 = vor.u32 %v7050_v16, %v5432_v17 }
 0x2b6   : > { %v5563_v27 = vor.u32 %v7082_v20, %v5560_v21  ;;  %v7070_v8 = vld [vmem:[%s7927_s28 + $0x524] sm:$0xf]  ;;  %v5768_v13 = vld [vmem:[%s7927_s28 + $0x730] sm:$0xf0]  ;;  %v5643_v20 = vor.u32 %v7102_v10, %v5640_v11 }
 0x2b7   : > { %v5515_v16 = vor.u32 %v7070_v8, %v5512_v9  ;;  %v5368_v17 = vld [vmem:[%s7927_s28 + $0x410] sm:$0xf0]  ;;  %v5771_v21 = vor.u32 %v7134_v12, %v5768_v13  ;;  %v7214_v8 = vld [vmem:[%s7927_s28 + $0x9a4] sm:$0xf] }
 0x2b8   : > { %4039 = vmatpush.bf16.msrb.mxu2 %v4859_v31  ;;  %4052 = vmatpush.bf16.msrb.mxu3 %v4987_v32  ;;  %v5819_v31 = vor.u32 %v7146_v24, %v5816_v25  ;;  %v7078_v32 = vld [vmem:[%s7927_s28 + $0x564] sm:$0xf]  ;;  %v5624_v23 = vld [vmem:[%s7927_s28 + $0x610] sm:$0xf0] }
 0x2b9   : > { %4065 = vmatpush.bf16.msrb.mxu0 %v5115_v35  ;;  %4078 = vmatpush.bf16.msrb.mxu1 %v5243_v36  ;;  %v7142_v35 = vld [vmem:[%s7927_s28 + $0x764] sm:$0xf]  ;;  %v5800_v36 = vld [vmem:[%s7927_s28 + $0x770] sm:$0xf0] }
 0x2ba   : > { %v7130_v24 = vld [vmem:[%s7927_s28 + $0x704] sm:$0xf]  ;;  %v5752_v25 = vld [vmem:[%s7927_s28 + $0x710] sm:$0xf0] }
 0x2bb   : > { %4040 = vmatmul.bf16.vlgmr.msrb.gmra.mxu2 %v8201_v54  ;;  %4053 = vmatmul.bf16.vlgmr.msrb.gmra.mxu3 %v8203_v55  ;;  %v6088_v9 = vld [vmem:[%s7927_s28 + $0x9b0] sm:$0xf0]  ;;  %v7246_v10 = vld [vmem:[%s7927_s28 + $0xaa4] sm:$0xf] }
 0x2bc   : > { %4084 = vmatpush.bf16.msra.mxu2 %v5483_v37  ;;  %4097 = vmatpush.bf16.msra.mxu3 %v5611_v38  ;;  %v5419_v37 = vor.u32 %v7046_v28, %v5416_v29  ;;  %v5547_v38 = vor.u32 %v7078_v32, %v5544_v1  ;;  %v7222_v28 = vld [vmem:[%s7927_s28 + $0x9e4] sm:$0xf]  ;;  %v6120_v29 = vld [vmem:[%s7927_s28 + $0x9f0] sm:$0xf0] }
 0x2bd   : > { %4110 = vmatpush.bf16.msra.mxu0 %v5739_v41  ;;  %4123 = vmatpush.bf16.msra.mxu1 %v5867_v42  ;;  %v5675_v41 = vor.u32 %v7110_v33, %v5672_v34  ;;  %v5803_v42 = vor.u32 %v7142_v35, %v5800_v36  ;;  %v6248_v1 = vld [vmem:[%s7927_s28 + $0xaf0] sm:$0xf0]  ;;  %v7286_v33 = vld [vmem:[%s7927_s28 + $0xbe4] sm:$0xf]  ;;  %v5627_v35 = vor.u32 %v7098_v22, %v5624_v23 }
 0x2be   : > { %4066 = vmatmul.bf16.vlgmr.msrb.gmra.mxu0 %v8205_v60  ;;  %4079 = vmatmul.bf16.vlgmr.msrb.gmra.mxu1 %v8207_v61  ;;  %v6376_v34 = vld [vmem:[%s7927_s28 + $0xbf0] sm:$0xf0]  ;;  %v5755_v36 = vor.u32 %v7130_v24, %v5752_v25  ;;  %v7278_v12 = vld [vmem:[%s7927_s28 + $0xba4] sm:$0xf] }
 0x2bf   : > { %v6216_v11 = vld [vmem:[%s7927_s28 + $0xab0] sm:$0xf0]  ;;  %v7242_v25 = vld [vmem:[%s7927_s28 + $0xa84] sm:$0xf] }
 0x2c0   : > { %4085 = vmatpush.bf16.msra.mxu2 %v5467_v58  ;;  %4098 = vmatpush.bf16.msra.mxu3 %v5595_v59  ;;  %v5403_v58 = vor.u32 %v7042_v39, %v5400_v40  ;;  %v5531_v59 = vor.u32 %v7074_v43, %v5528_v45  ;;  %v7186_v39 = vld [vmem:[%s7927_s28 + $0x8c4] sm:$0xf]  ;;  %v5976_v40 = vld [vmem:[%s7927_s28 + $0x8d0] sm:$0xf0]  ;;  %v6219_v22 = vor.u32 %v7246_v10, %v6216_v11 }
 0x2c1   : > { %4111 = vmatpush.bf16.msra.mxu0 %v5723_v6  ;;  %4124 = vmatpush.bf16.msra.mxu1 %v5851_v7  ;;  %v5659_v6 = vor.u32 %v7106_v49, %v5656_v3  ;;  %v5787_v7 = vor.u32 %v7138_v50, %v5784_v51  ;;  %v7218_v43 = vld [vmem:[%s7927_s28 + $0x9c4] sm:$0xf]  ;;  %v6104_v45 = vld [vmem:[%s7927_s28 + $0x9d0] sm:$0xf0] }
 0x2c2   : > { %v7250_v49 = vld [vmem:[%s7927_s28 + $0xac4] sm:$0xf]  ;;  %v6232_v3 = vld [vmem:[%s7927_s28 + $0xad0] sm:$0xf0] }
 0x2c3   : > { %v7282_v50 = vld [vmem:[%s7927_s28 + $0xbc4] sm:$0xf]  ;;  %v6360_v51 = vld [vmem:[%s7927_s28 + $0xbd0] sm:$0xf0] }
 0x2c4   : > { %4086 = vmatpush.bf16.msra.mxu2 %v5451_v14  ;;  %4099 = vmatpush.bf16.msra.mxu3 %v5579_v15  ;;  %v7034_v14 = vld [vmem:[%s7927_s28 + $0x404] sm:$0xf]  ;;  %v5387_v15 = vor.u32 %v7038_v62, %v5384_v4  ;;  %v5960_v4 = vld [vmem:[%s7927_s28 + $0x8b0] sm:$0xf0] }
 0x2c5   : > { %4112 = vmatpush.bf16.msra.mxu0 %v5707_v18  ;;  %4125 = vmatpush.bf16.msra.mxu1 %v5835_v19  ;;  %v7066_v18 = vld [vmem:[%s7927_s28 + $0x504] sm:$0xf]  ;;  %v5496_v19 = vld [vmem:[%s7927_s28 + $0x510] sm:$0xf0] }
 0x2c6   : > { %v5499_v32 = vor.u32 %v7066_v18, %v5496_v19  ;;  %v7182_v62 = vld [vmem:[%s7927_s28 + $0x8a4] sm:$0xf]  ;;  %v6344_v13 = vld [vmem:[%s7927_s28 + $0xbb0] sm:$0xf0] }
 0x2c7   : > { %v7178_v19 = vld [vmem:[%s7927_s28 + $0x884] sm:$0xf]  ;;  %v6347_v23 = vor.u32 %v7278_v12, %v6344_v13  ;;  %v6072_v24 = vld [vmem:[%s7927_s28 + $0x990] sm:$0xf0] }
 0x2c8   : > { %4087 = vmatpush.bf16.msra.mxu2 %v5435_v26  ;;  %4100 = vmatpush.bf16.msra.mxu3 %v5563_v27  ;;  %v7190_v26 = vld [vmem:[%s7927_s28 + $0x8e4] sm:$0xf]  ;;  %v5992_v27 = vld [vmem:[%s7927_s28 + $0x8f0] sm:$0xf0] }
 0x2c9   : > { %4113 = vmatpush.bf16.msra.mxu0 %v5691_v30  ;;  %4126 = vmatpush.bf16.msra.mxu1 %v5819_v31  ;;  %v7254_v30 = vld [vmem:[%s7927_s28 + $0xae4] sm:$0xf]  ;;  %v5371_v31 = vor.u32 %v7034_v14, %v5368_v17  ;;  %v6168_v10 = vld [vmem:[%s7927_s28 + $0xa50] sm:$0xf0] }
 0x2ca   : > { %v8531_v14 = vld [vmem:[%s8528_s29] sm:$0xf]  ;;  %v6296_v12 = vld [vmem:[%s7927_s28 + $0xb50] sm:$0xf0] }
 0x2cb   : > { %v7266_v11 = vld [vmem:[%s7927_s28 + $0xb44] sm:$0xf] }
 0x2cc   : > { %4088 = vmatpush.bf16.msra.mxu2 %v5419_v37  ;;  %4101 = vmatpush.bf16.msra.mxu3 %v5547_v38  ;;  %v5995_v37 = vor.u32 %v7190_v26, %v5992_v27  ;;  %v6123_v38 = vor.u32 %v7222_v28, %v6120_v29  ;;  %v6200_v26 = vld [vmem:[%s7927_s28 + $0xa90] sm:$0xf0]  ;;  %v7274_v27 = vld [vmem:[%s7927_s28 + $0xb84] sm:$0xf]  ;;  %v1256_v29 = vperm.slane %v8531_v14, 0 }
 0x2cd   : > { %4114 = vmatpush.bf16.msra.mxu0 %v5675_v41  ;;  %4127 = vmatpush.bf16.msra.mxu1 %v5803_v42  ;;  %v6251_v41 = vor.u32 %v7254_v30, %v6248_v1  ;;  %v6379_v42 = vor.u32 %v7286_v33, %v6376_v34  ;;  %v6328_v28 = vld [vmem:[%s7927_s28 + $0xb90] sm:$0xf0]  ;;  %v6203_v33 = vor.u32 %v7242_v25, %v6200_v26  ;;  %v7230_v26 = vld [vmem:[%s7927_s28 + $0xa24] sm:$0xf] }
 0x2ce   : > { %v5928_v1 = vld [vmem:[%s7927_s28 + $0x870] sm:$0xf0]  ;;  %v6331_v34 = vor.u32 %v7274_v27, %v6328_v28  ;;  %v7262_v28 = vld [vmem:[%s7927_s28 + $0xb24] sm:$0xf] }
 0x2cf   : > { %v6024_v25 = vld [vmem:[%s7927_s28 + $0x930] sm:$0xf0] }
 0x2d0   : > { %4089 = vmatpush.bf16.msra.mxu2 %v5403_v58  ;;  %4102 = vmatpush.bf16.msra.mxu3 %v5531_v59  ;;  %v5979_v58 = vor.u32 %v7186_v39, %v5976_v40  ;;  %v6107_v59 = vor.u32 %v7218_v43, %v6104_v45  ;;  %v7238_v39 = vld [vmem:[%s7927_s28 + $0xa64] sm:$0xf]  ;;  %v6312_v43 = vld [vmem:[%s7927_s28 + $0xb70] sm:$0xf0] }
 0x2d1   : > { %4115 = vmatpush.bf16.msra.mxu0 %v5659_v6  ;;  %4128 = vmatpush.bf16.msra.mxu1 %v5787_v7  ;;  %v6235_v6 = vor.u32 %v7250_v49, %v6232_v3  ;;  %v6363_v7 = vor.u32 %v7282_v50, %v6360_v51  ;;  %v6152_v27 = vld [vmem:[%s7927_s28 + $0xa30] sm:$0xf0] }
 0x2d4   : > { %4090 = vmatpush.bf16.msra.mxu2 %v5387_v15  ;;  %4103 = vmatpush.bf16.msra.mxu3 %v5515_v16  ;;  %v5963_v15 = vor.u32 %v7182_v62, %v5960_v4  ;;  %v6091_v16 = vor.u32 %v7214_v8, %v6088_v9  ;;  %v7234_v8 = vld [vmem:[%s7927_s28 + $0xa44] sm:$0xf] }
 0x2d5   : > { %4116 = vmatpush.bf16.msra.mxu0 %v5643_v20  ;;  %4129 = vmatpush.bf16.msra.mxu1 %v5771_v21  ;;  %v5944_v20 = vld [vmem:[%s7927_s28 + $0x890] sm:$0xf0]  ;;  %v7210_v21 = vld [vmem:[%s7927_s28 + $0x984] sm:$0xf] }
 0x2d6   : > { %v5947_v30 = vor.u32 %v7178_v19, %v5944_v20  ;;  %v5896_v19 = vld [vmem:[%s7927_s28 + $0x830] sm:$0xf0] }
 0x2d8   : > { %4091 = vmatpush.bf16.msra.mxu2 %v5371_v31  ;;  %4104 = vmatpush.bf16.msra.mxu3 %v5499_v32  ;;  %v3859_v17 = vpop.f32.mrf.mxu0  ;;  %v3872_v18 = vpop.f32.mrf.mxu1  ;;  %v6075_v31 = vor.u32 %v7210_v21, %v6072_v24  ;;  %v7174_v32 = vld [vmem:[%s7927_s28 + $0x864] sm:$0xf]  ;;  %v6299_v21 = vor.u32 %v7266_v11, %v6296_v12 }
 0x2d9   : > { %4117 = vmatpush.bf16.msra.mxu0 %v5627_v35  ;;  %4130 = vmatpush.bf16.msra.mxu1 %v5755_v36  ;;  %v5931_v49 = vor.u32 %v7174_v32, %v5928_v1  ;;  %v7198_v24 = vld [vmem:[%s7927_s28 + $0x924] sm:$0xf] }
 0x2da   : > { %v7314_v12 = vld [vmem:[%s7927_s28 + $0xcc4] sm:$0xf] }
 0x2db   : > { %4092 = vmatmul.bf16.vlgmr.msra.gmra.mxu2 %v8241_v46  ;;  %4105 = vmatmul.bf16.vlgmr.msra.gmra.mxu3 %v8243_v47 }
 0x2dc   : > { %4136 = vmatpush.bf16.msrb.mxu2 %v5995_v37  ;;  %4149 = vmatpush.bf16.msrb.mxu3 %v6123_v38  ;;  %v7206_v37 = vld [vmem:[%s7927_s28 + $0x964] sm:$0xf]  ;;  %v6056_v38 = vld [vmem:[%s7927_s28 + $0x970] sm:$0xf0] }
 0x2dd   : > { %4162 = vmatpush.bf16.msrb.mxu0 %v6251_v41  ;;  %4175 = vmatpush.bf16.msrb.mxu1 %v6379_v42  ;;  %v3833_v35 = vpop.f32.mrf.mxu2  ;;  %v3846_v36 = vpop.f32.mrf.mxu3  ;;  %v6184_v41 = vld [vmem:[%s7927_s28 + $0xa70] sm:$0xf0]  ;;  %v7270_v42 = vld [vmem:[%s7927_s28 + $0xb64] sm:$0xf]  ;;  %v6059_v3 = vor.u32 %v7206_v37, %v6056_v38 }
 0x2de   : > { %4118 = vmatmul.bf16.vlgmr.msra.gmra.mxu0 %v8245_v48  ;;  %4131 = vmatmul.bf16.vlgmr.msra.gmra.mxu1 %v8249_v52  ;;  %v3834_v40 = vadd.f32 %v3833_v35, %v1256_v29  ;;  %v6187_v62 = vor.u32 %v7238_v39, %v6184_v41  ;;  %v6315_v4 = vor.u32 %v7270_v42, %v6312_v43  ;;  %v6280_v29 = vld [vmem:[%s7927_s28 + $0xb30] sm:$0xf0]  ;;  %v7226_v38 = vld [vmem:[%s7927_s28 + $0xa04] sm:$0xf] }
 0x2df   : > { %v6008_v35 = vld [vmem:[%s7927_s28 + $0x910] sm:$0xf0]  ;;  %v6283_v37 = vor.u32 %v7262_v28, %v6280_v29  ;;  %v7318_v42 = vld [vmem:[%s7927_s28 + $0xce4] sm:$0xf] }
 0x2e0   : > { %4137 = vmatpush.bf16.msrb.mxu2 %v5979_v58  ;;  %4150 = vmatpush.bf16.msrb.mxu3 %v6107_v59  ;;  %v3847_v45 = vadd.f32 %v3846_v36, %v3834_v40  ;;  %v3861_v50 = vpop.f32.mrf.mxu0  ;;  %v3874_v51 = vpop.f32.mrf.mxu1  ;;  %v7170_v58 = vld [vmem:[%s7927_s28 + $0x844] sm:$0xf]  ;;  %v5912_v59 = vld [vmem:[%s7927_s28 + $0x850] sm:$0xf0]  ;;  %v6155_v36 = vor.u32 %v7230_v26, %v6152_v27 }
 0x2e1   : > { %4163 = vmatpush.bf16.msrb.mxu0 %v6235_v6  ;;  %4176 = vmatpush.bf16.msrb.mxu1 %v6363_v7  ;;  %v7202_v6 = vld [vmem:[%s7927_s28 + $0x944] sm:$0xf]  ;;  %v6040_v7 = vld [vmem:[%s7927_s28 + $0x950] sm:$0xf0]  ;;  %v5915_v13 = vor.u32 %v7170_v58, %v5912_v59 }
 0x2e2   : > { %v3860_v9 = vadd.f32 %v3859_v17, %v3847_v45  ;;  %v6171_v17 = vor.u32 %v7234_v8, %v6168_v10  ;;  %v6136_v39 = vld [vmem:[%s7927_s28 + $0xa10] sm:$0xf0]  ;;  %v7258_v40 = vld [vmem:[%s7927_s28 + $0xb04] sm:$0xf] }
 0x2e3   : > { %v6264_v41 = vld [vmem:[%s7927_s28 + $0xb10] sm:$0xf0]  ;;  %v7350_v45 = vld [vmem:[%s7927_s28 + $0xde4] sm:$0xf] }
 0x2e4   : > { %4138 = vmatpush.bf16.msrb.mxu2 %v5963_v15  ;;  %4151 = vmatpush.bf16.msrb.mxu3 %v6091_v16  ;;  %v6043_v15 = vor.u32 %v7202_v6, %v6040_v7  ;;  %v7166_v16 = vld [vmem:[%s7927_s28 + $0x824] sm:$0xf]  ;;  %v3873_v20 = vadd.f32 %v3872_v18, %v3860_v9  ;;  %v6504_v43 = vld [vmem:[%s7927_s28 + $0xcf0] sm:$0xf0]  ;;  %v6267_v6 = vor.u32 %v7258_v40, %v6264_v41 }
 0x2e5   : > { %4164 = vmatpush.bf16.msrb.mxu0 %v6219_v22  ;;  %4177 = vmatpush.bf16.msrb.mxu1 %v6347_v23  ;;  %v3835_v22 = vpop.f32.mrf.mxu2  ;;  %v3848_v23 = vpop.f32.mrf.mxu3  ;;  %v5899_v18 = vor.u32 %v7166_v16, %v5896_v19  ;;  %v6760_v58 = vld [vmem:[%s7927_s28 + $0xef0] sm:$0xf0]  ;;  %v7414_v59 = vld [vmem:[%s7927_s28 + $0xfe4] sm:$0xf]  ;;  %v6507_v9 = vor.u32 %v7318_v42, %v6504_v43 }
 0x2e6   : > { %v7346_v19 = vld [vmem:[%s7927_s28 + $0xdc4] sm:$0xf]  ;;  %v6872_v27 = vld [vmem:[%s7927_s28 + $0xfd0] sm:$0xf0] }
 0x2e7   : > { %v7410_v26 = vld [vmem:[%s7927_s28 + $0xfc4] sm:$0xf] }
 0x2e8   : > { %4139 = vmatpush.bf16.msrb.mxu2 %v5947_v30  ;;  %4152 = vmatpush.bf16.msrb.mxu3 %v6075_v31  ;;  %v7162_v30 = vld [vmem:[%s7927_s28 + $0x804] sm:$0xf]  ;;  %v6027_v31 = vor.u32 %v7198_v24, %v6024_v25  ;;  %v3911_v32 = vpop.f32.mrf.mxu0  ;;  %v8567_v1 = vpop.f32.mrf.mxu1  ;;  %v6744_v25 = vld [vmem:[%s7927_s28 + $0xed0] sm:$0xf0] }
 0x2e9   : > { %4165 = vmatpush.bf16.msrb.mxu0 %v6203_v33  ;;  %4178 = vmatpush.bf16.msrb.mxu1 %v6331_v34  ;;  %v5880_v33 = vld [vmem:[%s7927_s28 + $0x810] sm:$0xf0]  ;;  %v7194_v34 = vld [vmem:[%s7927_s28 + $0x904] sm:$0xf] }
 0x2ea   : > { %v5883_v50 = vor.u32 %v7162_v30, %v5880_v33  ;;  %v6011_v51 = vor.u32 %v7194_v34, %v6008_v35  ;;  %v7310_v30 = vld [vmem:[%s7927_s28 + $0xca4] sm:$0xf]  ;;  %v6875_v33 = vor.u32 %v7410_v26, %v6872_v27  ;;  %v6600_v35 = vld [vmem:[%s7927_s28 + $0xdb0] sm:$0xf0] }
 0x2eb   : > { %v7342_v34 = vld [vmem:[%s7927_s28 + $0xda4] sm:$0xf]  ;;  %v6424_v26 = vld [vmem:[%s7927_s28 + $0xc50] sm:$0xf0] }
 0x2ec   : > { %4140 = vmatpush.bf16.msrb.mxu2 %v5931_v49  ;;  %4153 = vmatpush.bf16.msrb.mxu3 %v6059_v3  ;;  %v6632_v49 = vld [vmem:[%s7927_s28 + $0xdf0] sm:$0xf0]  ;;  %v7382_v3 = vld [vmem:[%s7927_s28 + $0xee4] sm:$0xf]  ;;  %v6603_v43 = vor.u32 %v7342_v34, %v6600_v35 }
 0x2ed   : > { %4166 = vmatpush.bf16.msrb.mxu0 %v6187_v62  ;;  %4179 = vmatpush.bf16.msrb.mxu1 %v6315_v4  ;;  %v6888_v62 = vld [vmem:[%s7927_s28 + $0xff0] sm:$0xf0]  ;;  %v6139_v4 = vor.u32 %v7226_v38, %v6136_v39  ;;  %v3885_v7 = vpop.f32.mrf.mxu2  ;;  %v3898_v8 = vpop.f32.mrf.mxu3  ;;  %v6635_v10 = vor.u32 %v7350_v45, %v6632_v49  ;;  %v7306_v45 = vld [vmem:[%s7927_s28 + $0xc84] sm:$0xf] }
 0x2ee   : > { %v3886_v11 = vadd.f32 %v3885_v7, %v3873_v20  ;;  %v6891_v16 = vor.u32 %v7414_v59, %v6888_v62  ;;  %v6856_v38 = vld [vmem:[%s7927_s28 + $0xfb0] sm:$0xf0]  ;;  %v7402_v62 = vld [vmem:[%s7927_s28 + $0xf84] sm:$0xf] }
 0x2ef   : > { %v6456_v49 = vld [vmem:[%s7927_s28 + $0xc90] sm:$0xf0]  ;;  %v7394_v35 = vld [vmem:[%s7927_s28 + $0xf44] sm:$0xf] }
 0x2f0   : > { %4141 = vmatpush.bf16.msrb.mxu2 %v5915_v13  ;;  %4154 = vmatpush.bf16.msrb.mxu3 %v6043_v15  ;;  %v6488_v13 = vld [vmem:[%s7927_s28 + $0xcd0] sm:$0xf0]  ;;  %v6763_v15 = vor.u32 %v7382_v3, %v6760_v58  ;;  %v3899_v22 = vadd.f32 %v3898_v8, %v3886_v11  ;;  %v3913_v23 = vpop.f32.mrf.mxu0  ;;  %v3926_v24 = vpop.f32.mrf.mxu1  ;;  %v7370_v58 = vld [vmem:[%s7927_s28 + $0xe84] sm:$0xf]  ;;  %v6459_v8 = vor.u32 %v7306_v45, %v6456_v49 }
 0x2f1   : > { %4167 = vmatpush.bf16.msrb.mxu0 %v6171_v17  ;;  %4180 = vmatpush.bf16.msrb.mxu1 %v6299_v21  ;;  %v6616_v17 = vld [vmem:[%s7927_s28 + $0xdd0] sm:$0xf0]  ;;  %v7378_v21 = vld [vmem:[%s7927_s28 + $0xec4] sm:$0xf]  ;;  %v6491_v28 = vor.u32 %v7314_v12, %v6488_v13 }
 0x2f2   : > { %v3912_v20 = vadd.f32 %v3911_v32, %v3899_v22  ;;  %v6619_v29 = vor.u32 %v7346_v19, %v6616_v17  ;;  %v7406_v32 = vld [vmem:[%s7927_s28 + $0xfa4] sm:$0xf]  ;;  %v6712_v59 = vld [vmem:[%s7927_s28 + $0xe90] sm:$0xf0] }
 0x2f3   : > { %v6859_v3 = vor.u32 %v7406_v32, %v6856_v38  ;;  %v6440_v11 = vld [vmem:[%s7927_s28 + $0xc70] sm:$0xf0]  ;;  %v6715_v12 = vor.u32 %v7370_v58, %v6712_v59  ;;  %v7366_v19 = vld [vmem:[%s7927_s28 + $0xe64] sm:$0xf] }
 0x2f4   : > { %4142 = vmatpush.bf16.msrb.mxu2 %v5899_v18  ;;  %4155 = vmatpush.bf16.msrb.mxu3 %v6027_v31  ;;  %v6472_v18 = vld [vmem:[%s7927_s28 + $0xcb0] sm:$0xf0]  ;;  %v6747_v31 = vor.u32 %v7378_v21, %v6744_v25  ;;  %v3925_v39 = vadd.f32 %v8567_v1, %v3912_v20  ;;  %v7398_v21 = vld [vmem:[%s7927_s28 + $0xf64] sm:$0xf] }
 0x2f5   : > { %4168 = vmatpush.bf16.msrb.mxu0 %v6155_v36  ;;  %4181 = vmatpush.bf16.msrb.mxu1 %v6283_v37  ;;  %v7374_v36 = vld [vmem:[%s7927_s28 + $0xea4] sm:$0xf]  ;;  %v6728_v37 = vld [vmem:[%s7927_s28 + $0xeb0] sm:$0xf0]  ;;  %v3887_v40 = vpop.f32.mrf.mxu2  ;;  %v3900_v41 = vpop.f32.mrf.mxu3  ;;  %v6475_v42 = vor.u32 %v7310_v30, %v6472_v18 }
 0x2f6   : > { %v6731_v1 = vor.u32 %v7374_v36, %v6728_v37  ;;  %v6696_v17 = vld [vmem:[%s7927_s28 + $0xe70] sm:$0xf0]  ;;  %v7298_v25 = vld [vmem:[%s7927_s28 + $0xc44] sm:$0xf] }
 0x2f7   : > { %v6824_v22 = vld [vmem:[%s7927_s28 + $0xf70] sm:$0xf0]  ;;  %v6699_v27 = vor.u32 %v7366_v19, %v6696_v17  ;;  %v7330_v30 = vld [vmem:[%s7927_s28 + $0xd44] sm:$0xf]  ;;  %v6427_v40 = vor.u32 %v7298_v25, %v6424_v26  ;;  %v5102_v25 = vld [vmem:[%s7927_s28 + $0x1e8] sm:$0xf] }
 0x2f8   : > { %4143 = vmatpush.bf16.msrb.mxu2 %v5883_v50  ;;  %4156 = vmatpush.bf16.msrb.mxu3 %v6011_v51  ;;  %v7338_v50 = vld [vmem:[%s7927_s28 + $0xd84] sm:$0xf]  ;;  %v6584_v51 = vld [vmem:[%s7927_s28 + $0xd90] sm:$0xf0]  ;;  %v6827_v20 = vor.u32 %v7398_v21, %v6824_v22  ;;  %v6969_v26 = vld [vmem:[%s7927_s28 + $0x1f4] sm:$0xf0] }
 0x2f9   : > { %4169 = vmatpush.bf16.msrb.mxu0 %v6139_v4  ;;  %4182 = vmatpush.bf16.msrb.mxu1 %v6267_v6  ;;  %v6840_v4 = vld [vmem:[%s7927_s28 + $0xf90] sm:$0xf0]  ;;  %v7326_v49 = vld [vmem:[%s7927_s28 + $0xd24] sm:$0xf] }
 0x2fa   : > { %v6843_v13 = vor.u32 %v7402_v62, %v6840_v4  ;;  %v6552_v18 = vld [vmem:[%s7927_s28 + $0xd50] sm:$0xf0]  ;;  %v7390_v58 = vld [vmem:[%s7927_s28 + $0xf24] sm:$0xf] }
 0x2fb   : > { %4144 = vmatmul.bf16.vlgmr.msrb.gmra.mxu2 %v8293_v63  ;;  %4157 = vmatmul.bf16.vlgmr.msrb.gmra.mxu3 %v8295_v0  ;;  %v3963_v6 = vpop.f32.mrf.mxu0  ;;  %v3976_v7 = vpop.f32.mrf.mxu1  ;;  %v6680_v34 = vld [vmem:[%s7927_s28 + $0xe50] sm:$0xf0]  ;;  %v6555_v41 = vor.u32 %v7330_v30, %v6552_v18  ;;  %v7290_v62 = vld [vmem:[%s7927_s28 + $0xc04] sm:$0xf]  ;;  %v7033_v30 = vld [vmem:[%s7927_s28 + $0x3f4] sm:$0xf0] }
 0x2fc   : > { %4188 = vmatpush.bf16.msra.mxu2 %v6507_v9  ;;  %4201 = vmatpush.bf16.msra.mxu3 %v6635_v10  ;;  %v6587_v9 = vor.u32 %v7338_v50, %v6584_v51  ;;  %v7302_v10 = vld [vmem:[%s7927_s28 + $0xc64] sm:$0xf]  ;;  %v6808_v36 = vld [vmem:[%s7927_s28 + $0xf50] sm:$0xf0] }
 0x2fd   : > { %4214 = vmatpush.bf16.msra.mxu0 %v6763_v15  ;;  %4227 = vmatpush.bf16.msra.mxu1 %v6891_v16  ;;  %v7334_v15 = vld [vmem:[%s7927_s28 + $0xd64] sm:$0xf]  ;;  %v6568_v16 = vld [vmem:[%s7927_s28 + $0xd70] sm:$0xf0]  ;;  %v6443_v23 = vor.u32 %v7302_v10, %v6440_v11  ;;  %v6811_v45 = vor.u32 %v7394_v35, %v6808_v36  ;;  %v4958_v35 = vld [vmem:[%s7927_s28 + $0xc8] sm:$0xf] }
 0x2fe   : > { %4170 = vmatmul.bf16.vlgmr.msrb.gmra.mxu0 %v8297_v2  ;;  %4183 = vmatmul.bf16.vlgmr.msrb.gmra.mxu1 %v8301_v5  ;;  %v6571_v24 = vor.u32 %v7334_v15, %v6568_v16  ;;  %v6664_v51 = vld [vmem:[%s7927_s28 + $0xe30] sm:$0xf0]  ;;  %v7322_v10 = vld [vmem:[%s7927_s28 + $0xd04] sm:$0xf]  ;;  %v6933_v36 = vld [vmem:[%s7927_s28 + $0xd4] sm:$0xf0] }
 0x2ff   : > { %v6792_v59 = vld [vmem:[%s7927_s28 + $0xf30] sm:$0xf0]  ;;  %v7354_v19 = vld [vmem:[%s7927_s28 + $0xe04] sm:$0xf] }
 0x300   : > { %4189 = vmatpush.bf16.msra.mxu2 %v6491_v28  ;;  %4202 = vmatpush.bf16.msra.mxu3 %v6619_v29  ;;  %v3937_v28 = vpop.f32.mrf.mxu2  ;;  %v3950_v29 = vpop.f32.mrf.mxu3  ;;  %v6520_v11 = vld [vmem:[%s7927_s28 + $0xd10] sm:$0xf0]  ;;  %v7386_v21 = vld [vmem:[%s7927_s28 + $0xf04] sm:$0xf] }
 0x301   : > { %4215 = vmatpush.bf16.msra.mxu0 %v6747_v31  ;;  %4228 = vmatpush.bf16.msra.mxu1 %v6875_v33  ;;  %v7362_v31 = vld [vmem:[%s7927_s28 + $0xe44] sm:$0xf]  ;;  %v3938_v33 = vadd.f32 %v3937_v28, %v3925_v39  ;;  %v6648_v17 = vld [vmem:[%s7927_s28 + $0xe10] sm:$0xf0]  ;;  %v7001_v28 = vld [vmem:[%s7927_s28 + $0x2f4] sm:$0xf0] }
 0x302   : > { %v6683_v39 = vor.u32 %v7362_v31, %v6680_v34  ;;  %v6776_v22 = vld [vmem:[%s7927_s28 + $0xf10] sm:$0xf0]  ;;  %v6651_v18 = vor.u32 %v7354_v19, %v6648_v17  ;;  %v5103_v34 = vor.u32 %v6969_v26, %v5102_v25  ;;  %v5054_v19 = vld [vmem:[%s7927_s28 + $0x188] sm:$0xf]  ;;  %v6957_v17 = vld [vmem:[%s7927_s28 + $0x194] sm:$0xf0] }
 0x303   : > { %v3951_v37 = vadd.f32 %v3950_v29, %v3938_v33  ;;  %v3965_v32 = vpop.f32.mrf.mxu0  ;;  %v3978_v38 = vpop.f32.mrf.mxu1  ;;  %v5358_v29 = vld [vmem:[%s7927_s28 + $0x3e8] sm:$0xf]  ;;  %v6779_v31 = vor.u32 %v7386_v21, %v6776_v22  ;;  %v6989_v22 = vld [vmem:[%s7927_s28 + $0x294] sm:$0xf0] }
 0x304   : > { %4190 = vmatpush.bf16.msra.mxu2 %v6475_v42  ;;  %4203 = vmatpush.bf16.msra.mxu3 %v6603_v43  ;;  %v7294_v42 = vld [vmem:[%s7927_s28 + $0xc24] sm:$0xf]  ;;  %v6408_v43 = vld [vmem:[%s7927_s28 + $0xc30] sm:$0xf0]  ;;  %v5359_v32 = vor.u32 %v7033_v30, %v5358_v29  ;;  %v5086_v38 = vld [vmem:[%s7927_s28 + $0x1c8] sm:$0xf] }
 0x305   : > { %4216 = vmatpush.bf16.msra.mxu0 %v6731_v1  ;;  %4229 = vmatpush.bf16.msra.mxu1 %v6859_v3  ;;  %v6536_v1 = vld [vmem:[%s7927_s28 + $0xd30] sm:$0xf0]  ;;  %v7358_v3 = vld [vmem:[%s7927_s28 + $0xe24] sm:$0xf]  ;;  %v3964_v50 = vadd.f32 %v3963_v6, %v3951_v37  ;;  %v6411_v4 = vor.u32 %v7294_v42, %v6408_v43  ;;  %v6997_v42 = vld [vmem:[%s7927_s28 + $0x2d4] sm:$0xf0] }
 0x306   : > { %v5342_v43 = vld [vmem:[%s7927_s28 + $0x3c8] sm:$0xf] }
 0x307   : > { %v8641_v6 = vadd.f32 %v3976_v7, %v3964_v50  ;;  %v5230_v7 = vld [vmem:[%s7927_s28 + $0x2e8] sm:$0xf] }
 0x308   : > { %4191 = vmatpush.bf16.msra.mxu2 %v6459_v8  ;;  %4204 = vmatpush.bf16.msra.mxu3 %v6587_v9  ;;  %v6539_v8 = vor.u32 %v7326_v49, %v6536_v1  ;;  %v6392_v9 = vld [vmem:[%s7927_s28 + $0xc10] sm:$0xf0]  ;;  %v3939_v15 = vpop.f32.mrf.mxu2  ;;  %v3952_v16 = vpop.f32.mrf.mxu3  ;;  %v5231_v37 = vor.u32 %v7001_v28, %v5230_v7  ;;  %v4942_v1 = vld [vmem:[%s7927_s28 + $0xa8] sm:$0xf]  ;;  %v6921_v28 = vld [vmem:[%s7927_s28 + $0x74] sm:$0xf0] }
 0x309   : > { %4217 = vmatpush.bf16.msra.mxu0 %v6715_v12  ;;  %4230 = vmatpush.bf16.msra.mxu1 %v6843_v13  ;;  %v6667_v12 = vor.u32 %v7358_v3, %v6664_v51  ;;  %v6795_v13 = vor.u32 %v7390_v58, %v6792_v59  ;;  %v6929_v3 = vld [vmem:[%s7927_s28 + $0xb4] sm:$0xf0]  ;;  %v5070_v58 = vld [vmem:[%s7927_s28 + $0x1a8] sm:$0xf] }
 0x30a   : > { %v6961_v59 = vld [vmem:[%s7927_s28 + $0x1b4] sm:$0xf0]  ;;  %v5182_v21 = vld [vmem:[%s7927_s28 + $0x288] sm:$0xf] }
 0x30b   : > { %v5183_v29 = vor.u32 %v6989_v22, %v5182_v21  ;;  %v5262_v21 = vld [vmem:[%s7927_s28 + $0x328] sm:$0xf]  ;;  %v7009_v22 = vld [vmem:[%s7927_s28 + $0x334] sm:$0xf0] }
 0x30c   : > { %4192 = vmatpush.bf16.msra.mxu2 %v6443_v23  ;;  %4205 = vmatpush.bf16.msra.mxu3 %v6571_v24  ;;  %v4974_v23 = vld [vmem:[%s7927_s28 + $0xe8] sm:$0xf]  ;;  %v6937_v24 = vld [vmem:[%s7927_s28 + $0xf4] sm:$0xf0] }
 0x30d   : > { %4218 = vmatpush.bf16.msra.mxu0 %v6699_v27  ;;  %4231 = vmatpush.bf16.msra.mxu1 %v6827_v20  ;;  %v6395_v27 = vor.u32 %v7290_v62, %v6392_v9  ;;  %v6523_v20 = vor.u32 %v7322_v10, %v6520_v11  ;;  %v4975_v33 = vor.u32 %v6937_v24, %v4974_v23  ;;  %v5198_v62 = vld [vmem:[%s7927_s28 + $0x2a8] sm:$0xf]  ;;  %v7025_v9 = vld [vmem:[%s7927_s28 + $0x3b4] sm:$0xf0] }
 0x30e   : > { %v4943_v10 = vor.u32 %v6929_v3, %v4942_v1  ;;  %v5071_v11 = vor.u32 %v6961_v59, %v5070_v58  ;;  %v5310_v23 = vld [vmem:[%s7927_s28 + $0x388] sm:$0xf]  ;;  %v7021_v24 = vld [vmem:[%s7927_s28 + $0x394] sm:$0xf0] }
 0x30f   : > { %v5311_v30 = vor.u32 %v7021_v24, %v5310_v23  ;;  %v5150_v1 = vld [vmem:[%s7927_s28 + $0x248] sm:$0xf]  ;;  %v7013_v58 = vld [vmem:[%s7927_s28 + $0x354] sm:$0xf0] }
 0x310   : > { %4193 = vmatpush.bf16.msra.mxu2 %v6427_v40  ;;  %4206 = vmatpush.bf16.msra.mxu3 %v6555_v41  ;;  %v6965_v40 = vld [vmem:[%s7927_s28 + $0x1d4] sm:$0xf0]  ;;  %v5214_v41 = vld [vmem:[%s7927_s28 + $0x2c8] sm:$0xf] }
 0x311   : > { %4219 = vmatpush.bf16.msra.mxu0 %v6683_v39  ;;  %4232 = vmatpush.bf16.msra.mxu1 %v6811_v45  ;;  %v7029_v39 = vld [vmem:[%s7927_s28 + $0x3d4] sm:$0xf0]  ;;  %v4959_v45 = vor.u32 %v6933_v36, %v4958_v35  ;;  %v5087_v49 = vor.u32 %v6965_v40, %v5086_v38  ;;  %v5215_v50 = vor.u32 %v6997_v42, %v5214_v41  ;;  %v5294_v35 = vld [vmem:[%s7927_s28 + $0x368] sm:$0xf] }
 0x312   : > { %v5343_v51 = vor.u32 %v7029_v39, %v5342_v43  ;;  %v7017_v36 = vld [vmem:[%s7927_s28 + $0x374] sm:$0xf0]  ;;  %v4894_v38 = vld [vmem:[%s7927_s28 + $0x48] sm:$0xf] }
 0x313   : > { %v6917_v40 = vld [vmem:[%s7927_s28 + $0x54] sm:$0xf0]  ;;  %v5295_v42 = vor.u32 %v7017_v36, %v5294_v35  ;;  %v4862_v23 = vld [vmem:[%s7927_s28 + $0x8] sm:$0xf] }
 0x314   : > { %4194 = vmatpush.bf16.msra.mxu2 %v6411_v4  ;;  %4207 = vmatpush.bf16.msra.mxu3 %v6539_v8  ;;  %v6993_v4 = vld [vmem:[%s7927_s28 + $0x2b4] sm:$0xf0]  ;;  %v5326_v8 = vld [vmem:[%s7927_s28 + $0x3a8] sm:$0xf] }
 0x315   : > { %4220 = vmatpush.bf16.msra.mxu0 %v6667_v12  ;;  %4233 = vmatpush.bf16.msra.mxu1 %v6795_v13  ;;  %v4926_v12 = vld [vmem:[%s7927_s28 + $0x88] sm:$0xf]  ;;  %v6925_v13 = vld [vmem:[%s7927_s28 + $0x94] sm:$0xf0]  ;;  %v5199_v15 = vor.u32 %v6993_v4, %v5198_v62  ;;  %v5327_v16 = vor.u32 %v7025_v9, %v5326_v8  ;;  %v4895_v8 = vor.u32 %v6917_v40, %v4894_v38 }
 0x316   : > { %v4927_v7 = vor.u32 %v6925_v13, %v4926_v12  ;;  %v5006_v13 = vld [vmem:[%s7927_s28 + $0x128] sm:$0xf]  ;;  %v7005_v35 = vld [vmem:[%s7927_s28 + $0x314] sm:$0xf0] }
 0x317   : > { %v5486_v36 = vld [vmem:[%s7927_s28 + $0x4e8] sm:$0xf]  ;;  %v7097_v38 = vld [vmem:[%s7927_s28 + $0x5f4] sm:$0xf0] }
 0x318   : > { %4195 = vmatpush.bf16.msra.mxu2 %v6395_v27  ;;  %4208 = vmatpush.bf16.msra.mxu3 %v6523_v20  ;;  %v5055_v27 = vor.u32 %v6957_v17, %v5054_v19  ;;  %v4910_v20 = vld [vmem:[%s7927_s28 + $0x68] sm:$0xf]  ;;  %v6977_v17 = vld [vmem:[%s7927_s28 + $0x234] sm:$0xf0] }
 0x319   : > { %4221 = vmatpush.bf16.msra.mxu0 %v6651_v18  ;;  %4234 = vmatpush.bf16.msra.mxu1 %v6779_v31  ;;  %v5038_v18 = vld [vmem:[%s7927_s28 + $0x168] sm:$0xf]  ;;  %v6953_v31 = vld [vmem:[%s7927_s28 + $0x174] sm:$0xf0] }
 0x31a   : > { %v5742_v40 = vld [vmem:[%s7927_s28 + $0x6e8] sm:$0xf] }
 0x31b   : > { %4196 = vmatmul.bf16.vlgmr.msra.gmra.mxu2 %v8369_v53  ;;  %4209 = vmatmul.bf16.vlgmr.msra.gmra.mxu3 %v8371_v56  ;;  %v4015_v25 = vpop.f32.mrf.mxu0  ;;  %v4028_v26 = vpop.f32.mrf.mxu1 }
 0x31c   : > { %4240 = vmatpush.bf16.msrb.mxu2 %v4975_v33  ;;  %4253 = vmatpush.bf16.msrb.mxu3 %v5103_v34  ;;  %v5166_v33 = vld [vmem:[%s7927_s28 + $0x268] sm:$0xf]  ;;  %v6985_v34 = vld [vmem:[%s7927_s28 + $0x274] sm:$0xf0] }
 0x31d   : > { %4266 = vmatpush.bf16.msrb.mxu0 %v5231_v37  ;;  %4279 = vmatpush.bf16.msrb.mxu1 %v5359_v32  ;;  %v4911_v37 = vor.u32 %v6921_v28, %v4910_v20  ;;  %v5039_v32 = vor.u32 %v6953_v31, %v5038_v18  ;;  %v5167_v41 = vor.u32 %v6985_v34, %v5166_v33  ;;  %v6909_v20 = vld [vmem:[%s7927_s28 + $0x14] sm:$0xf0]  ;;  %v5118_v31 = vld [vmem:[%s7927_s28 + $0x208] sm:$0xf] }
 0x31e   : > { %4222 = vmatmul.bf16.vlgmr.msra.gmra.mxu0 %v8373_v57  ;;  %4235 = vmatmul.bf16.vlgmr.msra.gmra.mxu1 %v8377_v44  ;;  %v3989_v43 = vpop.f32.mrf.mxu2  ;;  %v4002_v39 = vpop.f32.mrf.mxu3  ;;  %v6941_v28 = vld [vmem:[%s7927_s28 + $0x114] sm:$0xf0]  ;;  %v5246_v34 = vld [vmem:[%s7927_s28 + $0x308] sm:$0xf] }
 0x31f   : > { %v3990_v3 = vadd.f32 %v3989_v43, %v8641_v6  ;;  %v6973_v33 = vld [vmem:[%s7927_s28 + $0x214] sm:$0xf0] }
 0x320   : > { %4241 = vmatpush.bf16.msrb.mxu2 %v4959_v45  ;;  %4254 = vmatpush.bf16.msrb.mxu3 %v5087_v49  ;;  %v5022_v45 = vld [vmem:[%s7927_s28 + $0x148] sm:$0xf]  ;;  %v6949_v49 = vld [vmem:[%s7927_s28 + $0x154] sm:$0xf0] }
 0x321   : > { %4267 = vmatpush.bf16.msrb.mxu0 %v5215_v50  ;;  %4280 = vmatpush.bf16.msrb.mxu1 %v5343_v51  ;;  %v6981_v50 = vld [vmem:[%s7927_s28 + $0x254] sm:$0xf0]  ;;  %v5278_v51 = vld [vmem:[%s7927_s28 + $0x348] sm:$0xf]  ;;  %v4003_v59 = vadd.f32 %v4002_v39, %v3990_v3  ;;  %v5023_v9 = vor.u32 %v6949_v49, %v5022_v45  ;;  %v5119_v49 = vor.u32 %v6973_v33, %v5118_v31 }
 0x322   : > { %v5151_v6 = vor.u32 %v6981_v50, %v5150_v1  ;;  %v5279_v12 = vor.u32 %v7013_v58, %v5278_v51  ;;  %v7129_v43 = vld [vmem:[%s7927_s28 + $0x6f4] sm:$0xf0]  ;;  %v5870_v39 = vld [vmem:[%s7927_s28 + $0x7e8] sm:$0xf]  ;;  %v5247_v1 = vor.u32 %v7005_v35, %v5246_v34 }
 0x323   : > { %v4017_v62 = vpop.f32.mrf.mxu0  ;;  %v4030_v4 = vpop.f32.mrf.mxu1  ;;  %v4016_v19 = vadd.f32 %v4015_v25, %v4003_v59  ;;  %v4990_v25 = vld [vmem:[%s7927_s28 + $0x108] sm:$0xf]  ;;  %v7161_v45 = vld [vmem:[%s7927_s28 + $0x7f4] sm:$0xf0]  ;;  %v5743_v59 = vor.u32 %v7129_v43, %v5742_v40 }
 0x324   : > { %4242 = vmatpush.bf16.msrb.mxu2 %v4943_v10  ;;  %4255 = vmatpush.bf16.msrb.mxu3 %v5071_v11  ;;  %v4878_v10 = vld [vmem:[%s7927_s28 + $0x28] sm:$0xf]  ;;  %v6913_v11 = vld [vmem:[%s7927_s28 + $0x34] sm:$0xf0]  ;;  %v5871_v62 = vor.u32 %v7161_v45, %v5870_v39 }
 0x325   : > { %4268 = vmatpush.bf16.msrb.mxu0 %v5199_v15  ;;  %4281 = vmatpush.bf16.msrb.mxu1 %v5327_v16  ;;  %v6945_v15 = vld [vmem:[%s7927_s28 + $0x134] sm:$0xf0]  ;;  %v5134_v16 = vld [vmem:[%s7927_s28 + $0x228] sm:$0xf]  ;;  %v8709_v24 = vadd.f32 %v4028_v26, %v4016_v19 }
 0x326   : > { %v3991_v26 = vpop.f32.mrf.mxu2  ;;  %v4004_v18 = vpop.f32.mrf.mxu3  ;;  %v5470_v51 = vld [vmem:[%s7927_s28 + $0x4c8] sm:$0xf]  ;;  %v7061_v58 = vld [vmem:[%s7927_s28 + $0x4d4] sm:$0xf0] }
 0x327   : > { %v5598_v4 = vld [vmem:[%s7927_s28 + $0x5c8] sm:$0xf]  ;;  %v7085_v33 = vld [vmem:[%s7927_s28 + $0x594] sm:$0xf0] }
 0x328   : > { %4243 = vmatpush.bf16.msrb.mxu2 %v4927_v7  ;;  %4256 = vmatpush.bf16.msrb.mxu3 %v5055_v27  ;;  %v4879_v7 = vor.u32 %v6913_v11, %v4878_v10  ;;  %v5007_v27 = vor.u32 %v6945_v15, %v5006_v13  ;;  %v7125_v10 = vld [vmem:[%s7927_s28 + $0x6d4] sm:$0xf0]  ;;  %v5854_v11 = vld [vmem:[%s7927_s28 + $0x7c8] sm:$0xf] }
 0x329   : > { %4269 = vmatpush.bf16.msrb.mxu0 %v5183_v29  ;;  %4282 = vmatpush.bf16.msrb.mxu1 %v5311_v30  ;;  %v5135_v29 = vor.u32 %v6977_v17, %v5134_v16  ;;  %v5263_v30 = vor.u32 %v7009_v22, %v5262_v21  ;;  %v5454_v15 = vld [vmem:[%s7927_s28 + $0x4a8] sm:$0xf]  ;;  %v7057_v16 = vld [vmem:[%s7927_s28 + $0x4b4] sm:$0xf0] }
 0x32a   : > { %v5582_v21 = vld [vmem:[%s7927_s28 + $0x5a8] sm:$0xf]  ;;  %v7089_v22 = vld [vmem:[%s7927_s28 + $0x5b4] sm:$0xf0] }
 0x32b   : > { %v5566_v31 = vld [vmem:[%s7927_s28 + $0x588] sm:$0xf]  ;;  %v7117_v35 = vld [vmem:[%s7927_s28 + $0x694] sm:$0xf0] }
 0x32c   : > { %4244 = vmatpush.bf16.msrb.mxu2 %v4911_v37  ;;  %4257 = vmatpush.bf16.msrb.mxu3 %v5039_v32  ;;  %v7065_v37 = vld [vmem:[%s7927_s28 + $0x4f4] sm:$0xf0]  ;;  %v5614_v32 = vld [vmem:[%s7927_s28 + $0x5e8] sm:$0xf] }
 0x32d   : > { %4270 = vmatpush.bf16.msrb.mxu0 %v5167_v41  ;;  %4283 = vmatpush.bf16.msrb.mxu1 %v5295_v42  ;;  %v4863_v41 = vor.u32 %v6909_v20, %v4862_v23  ;;  %v4991_v42 = vor.u32 %v6941_v28, %v4990_v25  ;;  %v5487_v3 = vor.u32 %v7065_v37, %v5486_v36  ;;  %v5710_v23 = vld [vmem:[%s7927_s28 + $0x6a8] sm:$0xf]  ;;  %v7153_v20 = vld [vmem:[%s7927_s28 + $0x7b4] sm:$0xf0] }
 0x32e   : > { %v5615_v50 = vor.u32 %v7097_v38, %v5614_v32  ;;  %v5455_v25 = vor.u32 %v7057_v16, %v5454_v15  ;;  %v5583_v28 = vor.u32 %v7089_v22, %v5582_v21  ;;  %v5694_v34 = vld [vmem:[%s7927_s28 + $0x688] sm:$0xf]  ;;  %v7149_v37 = vld [vmem:[%s7927_s28 + $0x794] sm:$0xf0] }
 0x32f   : > { %v5822_v36 = vld [vmem:[%s7927_s28 + $0x788] sm:$0xf]  ;;  %v7049_v43 = vld [vmem:[%s7927_s28 + $0x474] sm:$0xf0]  ;;  %v5695_v45 = vor.u32 %v7117_v35, %v5694_v34 }
 0x330   : > { %4245 = vmatpush.bf16.msrb.mxu2 %v4895_v8  ;;  %4258 = vmatpush.bf16.msrb.mxu3 %v5023_v9  ;;  %v7093_v8 = vld [vmem:[%s7927_s28 + $0x5d4] sm:$0xf0]  ;;  %v5726_v9 = vld [vmem:[%s7927_s28 + $0x6c8] sm:$0xf] }
 0x331   : > { %4271 = vmatpush.bf16.msrb.mxu0 %v5151_v6  ;;  %4284 = vmatpush.bf16.msrb.mxu1 %v5279_v12  ;;  %v7157_v6 = vld [vmem:[%s7927_s28 + $0x7d4] sm:$0xf0]  ;;  %v5471_v12 = vor.u32 %v7061_v58, %v5470_v51  ;;  %v5599_v13 = vor.u32 %v7093_v8, %v5598_v4  ;;  %v5727_v19 = vor.u32 %v7125_v10, %v5726_v9  ;;  %v5550_v39 = vld [vmem:[%s7927_s28 + $0x568] sm:$0xf] }
 0x332   : > { %v5855_v17 = vor.u32 %v7157_v6, %v5854_v11  ;;  %v5806_v51 = vld [vmem:[%s7927_s28 + $0x768] sm:$0xf]  ;;  %v7145_v58 = vld [vmem:[%s7927_s28 + $0x774] sm:$0xf0] }
 0x333   : > { %v5406_v8 = vld [vmem:[%s7927_s28 + $0x448] sm:$0xf]  ;;  %v7045_v9 = vld [vmem:[%s7927_s28 + $0x454] sm:$0xf0]  ;;  %v5807_v11 = vor.u32 %v7145_v58, %v5806_v51 }
 0x334   : > { %4246 = vmatpush.bf16.msrb.mxu2 %v4879_v7  ;;  %4259 = vmatpush.bf16.msrb.mxu3 %v5007_v27  ;;  %v7121_v7 = vld [vmem:[%s7927_s28 + $0x6b4] sm:$0xf0]  ;;  %v5838_v27 = vld [vmem:[%s7927_s28 + $0x7a8] sm:$0xf] }
 0x335   : > { %4272 = vmatpush.bf16.msrb.mxu0 %v5135_v29  ;;  %4285 = vmatpush.bf16.msrb.mxu1 %v5263_v30  ;;  %v5438_v29 = vld [vmem:[%s7927_s28 + $0x488] sm:$0xf]  ;;  %v7053_v30 = vld [vmem:[%s7927_s28 + $0x494] sm:$0xf0]  ;;  %v5711_v26 = vor.u32 %v7121_v7, %v5710_v23  ;;  %v5839_v18 = vor.u32 %v7153_v20, %v5838_v27  ;;  %v5407_v27 = vor.u32 %v7045_v9, %v5406_v8 }
 0x336   : > { %v5439_v40 = vor.u32 %v7053_v30, %v5438_v29  ;;  %v7077_v15 = vld [vmem:[%s7927_s28 + $0x554] sm:$0xf0]  ;;  %v5774_v35 = vld [vmem:[%s7927_s28 + $0x728] sm:$0xf] }
 0x337   : > { %v7141_v21 = vld [vmem:[%s7927_s28 + $0x754] sm:$0xf0]  ;;  %v5758_v58 = vld [vmem:[%s7927_s28 + $0x708] sm:$0xf] }
 0x338   : > { %4247 = vmatpush.bf16.msrb.mxu2 %v4863_v41  ;;  %4260 = vmatpush.bf16.msrb.mxu3 %v4991_v42  ;;  %v5567_v41 = vor.u32 %v7085_v33, %v5566_v31  ;;  %v5422_v42 = vld [vmem:[%s7927_s28 + $0x468] sm:$0xf]  ;;  %v7105_v34 = vld [vmem:[%s7927_s28 + $0x634] sm:$0xf0] }
 0x339   : > { %4273 = vmatpush.bf16.msrb.mxu0 %v5119_v49  ;;  %4286 = vmatpush.bf16.msrb.mxu1 %v5247_v1  ;;  %v5823_v49 = vor.u32 %v7149_v37, %v5822_v36  ;;  %v7081_v1 = vld [vmem:[%s7927_s28 + $0x574] sm:$0xf0]  ;;  %v5646_v31 = vld [vmem:[%s7927_s28 + $0x628] sm:$0xf] }
 0x33a   : > { %v5551_v4 = vor.u32 %v7081_v1, %v5550_v39  ;;  %v7137_v36 = vld [vmem:[%s7927_s28 + $0x734] sm:$0xf0]  ;;  %v5374_v37 = vld [vmem:[%s7927_s28 + $0x408] sm:$0xf] }
 0x33b   : > { %4248 = vmatmul.bf16.vlgmr.msrb.gmra.mxu2 %v8201_v54  ;;  %4261 = vmatmul.bf16.vlgmr.msrb.gmra.mxu3 %v8203_v55  ;;  %v4067_v32 = vpop.f32.mrf.mxu0  ;;  %v8754_v38 = vpop.f32.mrf.mxu1  ;;  %v7069_v39 = vld [vmem:[%s7927_s28 + $0x514] sm:$0xf0]  ;;  %v6126_v8 = vld [vmem:[%s7927_s28 + $0x9e8] sm:$0xf] }
 0x33c   : > { %4292 = vmatpush.bf16.msra.mxu2 %v5487_v3  ;;  %4305 = vmatpush.bf16.msra.mxu3 %v5615_v50  ;;  %v5678_v3 = vld [vmem:[%s7927_s28 + $0x668] sm:$0xf]  ;;  %v7113_v50 = vld [vmem:[%s7927_s28 + $0x674] sm:$0xf0] }
 0x33d   : > { %4318 = vmatpush.bf16.msra.mxu0 %v5743_v59  ;;  %4331 = vmatpush.bf16.msra.mxu1 %v5871_v62  ;;  %v1257_v59 = vperm.slane %v8531_v14, 1  ;;  %v5423_v62 = vor.u32 %v7049_v43, %v5422_v42  ;;  %v5679_v10 = vor.u32 %v7113_v50, %v5678_v3  ;;  %v5662_v14 = vld [vmem:[%s7927_s28 + $0x648] sm:$0xf]  ;;  %v7037_v42 = vld [vmem:[%s7927_s28 + $0x414] sm:$0xf0] }
 0x33e   : > { %4274 = vmatmul.bf16.vlgmr.msrb.gmra.mxu0 %v8205_v60  ;;  %4287 = vmatmul.bf16.vlgmr.msrb.gmra.mxu1 %v8207_v61  ;;  %v4041_v6 = vpop.f32.mrf.mxu2  ;;  %v5502_v43 = vld [vmem:[%s7927_s28 + $0x508] sm:$0xf]  ;;  %v7101_v51 = vld [vmem:[%s7927_s28 + $0x614] sm:$0xf0] }
 0x33f   : > { %v4042_v16 = vadd.f32 %v4041_v6, %v1257_v59  ;;  %v5630_v50 = vld [vmem:[%s7927_s28 + $0x608] sm:$0xf]  ;;  %v7133_v59 = vld [vmem:[%s7927_s28 + $0x714] sm:$0xf0] }
 0x340   : > { %4293 = vmatpush.bf16.msra.mxu2 %v5471_v12  ;;  %4306 = vmatpush.bf16.msra.mxu3 %v5599_v13  ;;  %v4054_v12 = vpop.f32.mrf.mxu3  ;;  %v5534_v13 = vld [vmem:[%s7927_s28 + $0x548] sm:$0xf]  ;;  %v7225_v9 = vld [vmem:[%s7927_s28 + $0x9f4] sm:$0xf0] }
 0x341   : > { %4319 = vmatpush.bf16.msra.mxu0 %v5727_v19  ;;  %4332 = vmatpush.bf16.msra.mxu1 %v5855_v17  ;;  %v7109_v19 = vld [vmem:[%s7927_s28 + $0x654] sm:$0xf0]  ;;  %v5790_v17 = vld [vmem:[%s7927_s28 + $0x748] sm:$0xf]  ;;  %v4055_v22 = vadd.f32 %v4054_v12, %v4042_v16  ;;  %v5535_v20 = vor.u32 %v7077_v15, %v5534_v13  ;;  %v5631_v15 = vor.u32 %v7101_v51, %v5630_v50 }
 0x342   : > { %v5663_v29 = vor.u32 %v7109_v19, %v5662_v14  ;;  %v5791_v30 = vor.u32 %v7141_v21, %v5790_v17  ;;  %v7257_v6 = vld [vmem:[%s7927_s28 + $0xaf4] sm:$0xf0]  ;;  %v6382_v12 = vld [vmem:[%s7927_s28 + $0xbe8] sm:$0xf]  ;;  %v5759_v14 = vor.u32 %v7133_v59, %v5758_v58  ;;  %v6127_v19 = vor.u32 %v7225_v9, %v6126_v8 }
 0x343   : > { %v4069_v23 = vpop.f32.mrf.mxu0  ;;  %v4082_v7 = vpop.f32.mrf.mxu1  ;;  %v4068_v33 = vadd.f32 %v4067_v32, %v4055_v22  ;;  %v7289_v13 = vld [vmem:[%s7927_s28 + $0xbf4] sm:$0xf0]  ;;  %v5982_v17 = vld [vmem:[%s7927_s28 + $0x8c8] sm:$0xf] }
 0x344   : > { %4294 = vmatpush.bf16.msra.mxu2 %v5455_v25  ;;  %4307 = vmatpush.bf16.msra.mxu3 %v5583_v28  ;;  %v5390_v25 = vld [vmem:[%s7927_s28 + $0x428] sm:$0xf]  ;;  %v7041_v28 = vld [vmem:[%s7927_s28 + $0x434] sm:$0xf0]  ;;  %v6383_v23 = vor.u32 %v7289_v13, %v6382_v12 }
 0x345   : > { %4320 = vmatpush.bf16.msra.mxu0 %v5711_v26  ;;  %4333 = vmatpush.bf16.msra.mxu1 %v5839_v18  ;;  %v5518_v26 = vld [vmem:[%s7927_s28 + $0x528] sm:$0xf]  ;;  %v7073_v18 = vld [vmem:[%s7927_s28 + $0x534] sm:$0xf0]  ;;  %v8786_v32 = vadd.f32 %v8754_v38, %v4068_v33 }
 0x346   : > { %v4043_v1 = vpop.f32.mrf.mxu2  ;;  %v6254_v38 = vld [vmem:[%s7927_s28 + $0xae8] sm:$0xf]  ;;  %v7189_v21 = vld [vmem:[%s7927_s28 + $0x8d4] sm:$0xf0] }
 0x347   : > { %v6255_v22 = vor.u32 %v7257_v6, %v6254_v38  ;;  %v6110_v7 = vld [vmem:[%s7927_s28 + $0x9c8] sm:$0xf]  ;;  %v7213_v51 = vld [vmem:[%s7927_s28 + $0x994] sm:$0xf0] }
 0x348   : > { %4295 = vmatpush.bf16.msra.mxu2 %v5439_v40  ;;  %4308 = vmatpush.bf16.msra.mxu3 %v5567_v41  ;;  %v5391_v40 = vor.u32 %v7041_v28, %v5390_v25  ;;  %v5519_v41 = vor.u32 %v7073_v18, %v5518_v26  ;;  %v4056_v3 = vpop.f32.mrf.mxu3  ;;  %v7253_v25 = vld [vmem:[%s7927_s28 + $0xad4] sm:$0xf0]  ;;  %v6366_v28 = vld [vmem:[%s7927_s28 + $0xbc8] sm:$0xf] }
 0x349   : > { %4321 = vmatpush.bf16.msra.mxu0 %v5695_v45  ;;  %4334 = vmatpush.bf16.msra.mxu1 %v5823_v49  ;;  %v5647_v45 = vor.u32 %v7105_v34, %v5646_v31  ;;  %v5775_v49 = vor.u32 %v7137_v36, %v5774_v35  ;;  %v5966_v18 = vld [vmem:[%s7927_s28 + $0x8a8] sm:$0xf]  ;;  %v7185_v31 = vld [vmem:[%s7927_s28 + $0x8b4] sm:$0xf0] }
 0x34a   : > { %v6094_v35 = vld [vmem:[%s7927_s28 + $0x9a8] sm:$0xf]  ;;  %v7217_v36 = vld [vmem:[%s7927_s28 + $0x9b4] sm:$0xf0] }
 0x34b   : > { %v6078_v50 = vld [vmem:[%s7927_s28 + $0x988] sm:$0xf]  ;;  %v7245_v59 = vld [vmem:[%s7927_s28 + $0xa94] sm:$0xf0] }
 0x34c   : > { %4296 = vmatpush.bf16.msra.mxu2 %v5423_v62  ;;  %4309 = vmatpush.bf16.msra.mxu3 %v5551_v4  ;;  %v5998_v62 = vld [vmem:[%s7927_s28 + $0x8e8] sm:$0xf]  ;;  %v7193_v4 = vld [vmem:[%s7927_s28 + $0x8f4] sm:$0xf0] }
 0x34d   : > { %4322 = vmatpush.bf16.msra.mxu0 %v5679_v10  ;;  %4335 = vmatpush.bf16.msra.mxu1 %v5807_v11  ;;  %v5375_v10 = vor.u32 %v7037_v42, %v5374_v37  ;;  %v5503_v11 = vor.u32 %v7069_v39, %v5502_v43  ;;  %v5999_v16 = vor.u32 %v7193_v4, %v5998_v62  ;;  %v6222_v37 = vld [vmem:[%s7927_s28 + $0xaa8] sm:$0xf]  ;;  %v7281_v42 = vld [vmem:[%s7927_s28 + $0xbb4] sm:$0xf0] }
 0x34e   : > { %v5967_v43 = vor.u32 %v7185_v31, %v5966_v18  ;;  %v6095_v39 = vor.u32 %v7217_v36, %v6094_v35  ;;  %v6206_v58 = vld [vmem:[%s7927_s28 + $0xa88] sm:$0xf]  ;;  %v7277_v4 = vld [vmem:[%s7927_s28 + $0xb94] sm:$0xf0] }
 0x34f   : > { %v6334_v62 = vld [vmem:[%s7927_s28 + $0xb88] sm:$0xf]  ;;  %v7177_v6 = vld [vmem:[%s7927_s28 + $0x874] sm:$0xf0]  ;;  %v6207_v12 = vor.u32 %v7245_v59, %v6206_v58 }
 0x350   : > { %4297 = vmatpush.bf16.msra.mxu2 %v5407_v27  ;;  %4310 = vmatpush.bf16.msra.mxu3 %v5535_v20  ;;  %v7221_v27 = vld [vmem:[%s7927_s28 + $0x9d4] sm:$0xf0]  ;;  %v6238_v20 = vld [vmem:[%s7927_s28 + $0xac8] sm:$0xf]  ;;  %v6335_v13 = vor.u32 %v7277_v4, %v6334_v62 }
 0x351   : > { %4323 = vmatpush.bf16.msra.mxu0 %v5663_v29  ;;  %4336 = vmatpush.bf16.msra.mxu1 %v5791_v30  ;;  %v7285_v29 = vld [vmem:[%s7927_s28 + $0xbd4] sm:$0xf0]  ;;  %v5983_v30 = vor.u32 %v7189_v21, %v5982_v17  ;;  %v6111_v26 = vor.u32 %v7221_v27, %v6110_v7  ;;  %v6239_v33 = vor.u32 %v7253_v25, %v6238_v20  ;;  %v6318_v17 = vld [vmem:[%s7927_s28 + $0xb68] sm:$0xf] }
 0x352   : > { %v6367_v34 = vor.u32 %v7285_v29, %v6366_v28  ;;  %v7273_v21 = vld [vmem:[%s7927_s28 + $0xb74] sm:$0xf0]  ;;  %v5918_v7 = vld [vmem:[%s7927_s28 + $0x848] sm:$0xf] }
 0x353   : > { %v7173_v27 = vld [vmem:[%s7927_s28 + $0x854] sm:$0xf0]  ;;  %v6319_v25 = vor.u32 %v7273_v21, %v6318_v17  ;;  %v6174_v18 = vld [vmem:[%s7927_s28 + $0xa48] sm:$0xf] }
 0x354   : > { %4298 = vmatpush.bf16.msra.mxu2 %v5391_v40  ;;  %4311 = vmatpush.bf16.msra.mxu3 %v5519_v41  ;;  %v7249_v40 = vld [vmem:[%s7927_s28 + $0xab4] sm:$0xf0]  ;;  %v6350_v41 = vld [vmem:[%s7927_s28 + $0xba8] sm:$0xf] }
 0x355   : > { %4324 = vmatpush.bf16.msra.mxu0 %v5647_v45  ;;  %4337 = vmatpush.bf16.msra.mxu1 %v5775_v49  ;;  %v5950_v45 = vld [vmem:[%s7927_s28 + $0x888] sm:$0xf]  ;;  %v7181_v49 = vld [vmem:[%s7927_s28 + $0x894] sm:$0xf0]  ;;  %v6223_v1 = vor.u32 %v7249_v40, %v6222_v37  ;;  %v6351_v3 = vor.u32 %v7281_v42, %v6350_v41  ;;  %v5919_v41 = vor.u32 %v7173_v27, %v5918_v7 }
 0x356   : > { %v5951_v38 = vor.u32 %v7181_v49, %v5950_v45  ;;  %v7269_v35 = vld [vmem:[%s7927_s28 + $0xb54] sm:$0xf0]  ;;  %v6030_v49 = vld [vmem:[%s7927_s28 + $0x928] sm:$0xf] }
 0x357   : > { %v6286_v58 = vld [vmem:[%s7927_s28 + $0xb28] sm:$0xf]  ;;  %v7265_v59 = vld [vmem:[%s7927_s28 + $0xb34] sm:$0xf0] }
 0x358   : > { %4299 = vmatpush.bf16.msra.mxu2 %v5375_v10  ;;  %4312 = vmatpush.bf16.msra.mxu3 %v5503_v11  ;;  %v6079_v10 = vor.u32 %v7213_v51, %v6078_v50  ;;  %v5934_v11 = vld [vmem:[%s7927_s28 + $0x868] sm:$0xf]  ;;  %v7233_v51 = vld [vmem:[%s7927_s28 + $0xa34] sm:$0xf0] }
 0x359   : > { %4325 = vmatpush.bf16.msra.mxu0 %v5631_v15  ;;  %4338 = vmatpush.bf16.msra.mxu1 %v5759_v14  ;;  %v6062_v15 = vld [vmem:[%s7927_s28 + $0x968] sm:$0xf]  ;;  %v7209_v14 = vld [vmem:[%s7927_s28 + $0x974] sm:$0xf0] }
 0x35a   : > { %v5886_v62 = vld [vmem:[%s7927_s28 + $0x808] sm:$0xf]  ;;  %v7261_v21 = vld [vmem:[%s7927_s28 + $0xb14] sm:$0xf0] }
 0x35b   : > { %4300 = vmatmul.bf16.vlgmr.msra.gmra.mxu2 %v8241_v46  ;;  %4313 = vmatmul.bf16.vlgmr.msra.gmra.mxu3 %v8243_v47  ;;  %v4119_v8 = vpop.f32.mrf.mxu0  ;;  %v4132_v9 = vpop.f32.mrf.mxu1  ;;  %v6270_v17 = vld [vmem:[%s7927_s28 + $0xb08] sm:$0xf]  ;;  %v7353_v27 = vld [vmem:[%s7927_s28 + $0xdf4] sm:$0xf0] }
 0x35c   : > { %4344 = vmatpush.bf16.msrb.mxu2 %v5999_v16  ;;  %4357 = vmatpush.bf16.msrb.mxu3 %v6127_v19  ;;  %v6190_v16 = vld [vmem:[%s7927_s28 + $0xa68] sm:$0xf]  ;;  %v7241_v19 = vld [vmem:[%s7927_s28 + $0xa74] sm:$0xf0] }
 0x35d   : > { %4370 = vmatpush.bf16.msrb.mxu0 %v6255_v22  ;;  %4383 = vmatpush.bf16.msrb.mxu1 %v6383_v23  ;;  %v5935_v22 = vor.u32 %v7177_v6, %v5934_v11  ;;  %v6063_v23 = vor.u32 %v7209_v14, %v6062_v15  ;;  %v6191_v20 = vor.u32 %v7241_v19, %v6190_v16  ;;  %v6014_v11 = vld [vmem:[%s7927_s28 + $0x908] sm:$0xf]  ;;  %v7197_v6 = vld [vmem:[%s7927_s28 + $0x914] sm:$0xf0] }
 0x35e   : > { %4326 = vmatmul.bf16.vlgmr.msra.gmra.mxu0 %v8245_v48  ;;  %4339 = vmatmul.bf16.vlgmr.msra.gmra.mxu1 %v8249_v52  ;;  %v4093_v28 = vpop.f32.mrf.mxu2  ;;  %v4106_v29 = vpop.f32.mrf.mxu3  ;;  %v6142_v16 = vld [vmem:[%s7927_s28 + $0xa08] sm:$0xf]  ;;  %v7229_v19 = vld [vmem:[%s7927_s28 + $0xa14] sm:$0xf0] }
 0x35f   : > { %v4094_v31 = vadd.f32 %v4093_v28, %v8786_v32  ;;  %v6638_v7 = vld [vmem:[%s7927_s28 + $0xde8] sm:$0xf]  ;;  %v7385_v28 = vld [vmem:[%s7927_s28 + $0xef4] sm:$0xf0] }
 0x360   : > { %4345 = vmatpush.bf16.msrb.mxu2 %v5983_v30  ;;  %4358 = vmatpush.bf16.msrb.mxu3 %v6111_v26  ;;  %v6046_v30 = vld [vmem:[%s7927_s28 + $0x948] sm:$0xf]  ;;  %v7205_v26 = vld [vmem:[%s7927_s28 + $0x954] sm:$0xf0] }
 0x361   : > { %4371 = vmatpush.bf16.msrb.mxu0 %v6239_v33  ;;  %4384 = vmatpush.bf16.msrb.mxu1 %v6367_v34  ;;  %v7237_v33 = vld [vmem:[%s7927_s28 + $0xa54] sm:$0xf0]  ;;  %v6302_v34 = vld [vmem:[%s7927_s28 + $0xb48] sm:$0xf]  ;;  %v4107_v36 = vadd.f32 %v4106_v29, %v4094_v31  ;;  %v6047_v42 = vor.u32 %v7205_v26, %v6046_v30  ;;  %v6143_v26 = vor.u32 %v7229_v19, %v6142_v16 }
 0x362   : > { %v6175_v32 = vor.u32 %v7237_v33, %v6174_v18  ;;  %v6303_v45 = vor.u32 %v7269_v35, %v6302_v34  ;;  %v6894_v29 = vld [vmem:[%s7927_s28 + $0xfe8] sm:$0xf]  ;;  %v7417_v30 = vld [vmem:[%s7927_s28 + $0xff4] sm:$0xf0]  ;;  %v6271_v18 = vor.u32 %v7261_v21, %v6270_v17  ;;  %v6639_v33 = vor.u32 %v7353_v27, %v6638_v7 }
 0x363   : > { %v4121_v37 = vpop.f32.mrf.mxu0  ;;  %v4134_v40 = vpop.f32.mrf.mxu1  ;;  %v4120_v50 = vadd.f32 %v4119_v8, %v4107_v36  ;;  %v6494_v34 = vld [vmem:[%s7927_s28 + $0xcc8] sm:$0xf]  ;;  %v7317_v35 = vld [vmem:[%s7927_s28 + $0xcd4] sm:$0xf0] }
 0x364   : > { %4346 = vmatpush.bf16.msrb.mxu2 %v5967_v43  ;;  %4359 = vmatpush.bf16.msrb.mxu3 %v6095_v39  ;;  %v5902_v43 = vld [vmem:[%s7927_s28 + $0x828] sm:$0xf]  ;;  %v7169_v39 = vld [vmem:[%s7927_s28 + $0x834] sm:$0xf0]  ;;  %v6895_v37 = vor.u32 %v7417_v30, %v6894_v29 }
 0x365   : > { %4372 = vmatpush.bf16.msrb.mxu0 %v6223_v1  ;;  %4385 = vmatpush.bf16.msrb.mxu1 %v6351_v3  ;;  %v7201_v1 = vld [vmem:[%s7927_s28 + $0x934] sm:$0xf0]  ;;  %v6158_v3 = vld [vmem:[%s7927_s28 + $0xa28] sm:$0xf]  ;;  %v5903_v4 = vor.u32 %v7169_v39, %v5902_v43  ;;  %v8857_v8 = vadd.f32 %v4132_v9, %v4120_v50 }
 0x366   : > { %v4095_v15 = vpop.f32.mrf.mxu2  ;;  %v4108_v14 = vpop.f32.mrf.mxu3  ;;  %v6766_v9 = vld [vmem:[%s7927_s28 + $0xee8] sm:$0xf]  ;;  %v7381_v43 = vld [vmem:[%s7927_s28 + $0xed4] sm:$0xf0] }
 0x367   : > { %v6767_v36 = vor.u32 %v7385_v28, %v6766_v9  ;;  %v6622_v40 = vld [vmem:[%s7927_s28 + $0xdc8] sm:$0xf]  ;;  %v7341_v19 = vld [vmem:[%s7927_s28 + $0xd94] sm:$0xf0] }
 0x368   : > { %4347 = vmatpush.bf16.msrb.mxu2 %v5951_v38  ;;  %4360 = vmatpush.bf16.msrb.mxu3 %v6079_v10  ;;  %v6031_v38 = vor.u32 %v7201_v1, %v6030_v49  ;;  %v7165_v10 = vld [vmem:[%s7927_s28 + $0x814] sm:$0xf0]  ;;  %v6878_v39 = vld [vmem:[%s7927_s28 + $0xfc8] sm:$0xf] }
 0x369   : > { %4373 = vmatpush.bf16.msrb.mxu0 %v6207_v12  ;;  %4386 = vmatpush.bf16.msrb.mxu1 %v6335_v13  ;;  %v6159_v12 = vor.u32 %v7233_v51, %v6158_v3  ;;  %v6287_v13 = vor.u32 %v7265_v59, %v6286_v58  ;;  %v6478_v1 = vld [vmem:[%s7927_s28 + $0xca8] sm:$0xf]  ;;  %v7313_v3 = vld [vmem:[%s7927_s28 + $0xcb4] sm:$0xf0] }
 0x36a   : > { %v6606_v58 = vld [vmem:[%s7927_s28 + $0xda8] sm:$0xf]  ;;  %v7345_v59 = vld [vmem:[%s7927_s28 + $0xdb4] sm:$0xf0] }
 0x36b   : > { %v6590_v16 = vld [vmem:[%s7927_s28 + $0xd88] sm:$0xf]  ;;  %v7373_v21 = vld [vmem:[%s7927_s28 + $0xe94] sm:$0xf0] }
 0x36c   : > { %4348 = vmatpush.bf16.msrb.mxu2 %v5935_v22  ;;  %4361 = vmatpush.bf16.msrb.mxu3 %v6063_v23  ;;  %v6510_v22 = vld [vmem:[%s7927_s28 + $0xce8] sm:$0xf]  ;;  %v7321_v23 = vld [vmem:[%s7927_s28 + $0xcf4] sm:$0xf0] }
 0x36d   : > { %4374 = vmatpush.bf16.msrb.mxu0 %v6191_v20  ;;  %4387 = vmatpush.bf16.msrb.mxu1 %v6319_v25  ;;  %v5887_v20 = vor.u32 %v7165_v10, %v5886_v62  ;;  %v6015_v25 = vor.u32 %v7197_v6, %v6014_v11  ;;  %v6511_v31 = vor.u32 %v7321_v23, %v6510_v22  ;;  %v6734_v62 = vld [vmem:[%s7927_s28 + $0xea8] sm:$0xf]  ;;  %v7409_v10 = vld [vmem:[%s7927_s28 + $0xfb4] sm:$0xf0] }
 0x36e   : > { %v6479_v11 = vor.u32 %v7313_v3, %v6478_v1  ;;  %v6607_v6 = vor.u32 %v7345_v59, %v6606_v58  ;;  %v6718_v17 = vld [vmem:[%s7927_s28 + $0xe88] sm:$0xf]  ;;  %v7405_v23 = vld [vmem:[%s7927_s28 + $0xf94] sm:$0xf0] }
 0x36f   : > { %v6846_v22 = vld [vmem:[%s7927_s28 + $0xf88] sm:$0xf]  ;;  %v7305_v28 = vld [vmem:[%s7927_s28 + $0xc74] sm:$0xf0]  ;;  %v6719_v29 = vor.u32 %v7373_v21, %v6718_v17 }
 0x370   : > { %4349 = vmatpush.bf16.msrb.mxu2 %v5919_v41  ;;  %4362 = vmatpush.bf16.msrb.mxu3 %v6047_v42  ;;  %v7349_v41 = vld [vmem:[%s7927_s28 + $0xdd4] sm:$0xf0]  ;;  %v6750_v42 = vld [vmem:[%s7927_s28 + $0xec8] sm:$0xf]  ;;  %v6847_v30 = vor.u32 %v7405_v23, %v6846_v22 }
 0x371   : > { %4375 = vmatpush.bf16.msrb.mxu0 %v6175_v32  ;;  %4388 = vmatpush.bf16.msrb.mxu1 %v6303_v45  ;;  %v7413_v32 = vld [vmem:[%s7927_s28 + $0xfd4] sm:$0xf0]  ;;  %v6495_v45 = vor.u32 %v7317_v35, %v6494_v34  ;;  %v6623_v49 = vor.u32 %v7349_v41, %v6622_v40  ;;  %v6751_v50 = vor.u32 %v7381_v43, %v6750_v42  ;;  %v6830_v34 = vld [vmem:[%s7927_s28 + $0xf68] sm:$0xf] }
 0x372   : > { %v6879_v51 = vor.u32 %v7413_v32, %v6878_v39  ;;  %v7401_v35 = vld [vmem:[%s7927_s28 + $0xf74] sm:$0xf0]  ;;  %v6430_v40 = vld [vmem:[%s7927_s28 + $0xc48] sm:$0xf] }
 0x373   : > { %v7301_v41 = vld [vmem:[%s7927_s28 + $0xc54] sm:$0xf0]  ;;  %v6831_v43 = vor.u32 %v7401_v35, %v6830_v34  ;;  %v6686_v1 = vld [vmem:[%s7927_s28 + $0xe48] sm:$0xf] }
 0x374   : > { %4350 = vmatpush.bf16.msrb.mxu2 %v5903_v4  ;;  %4363 = vmatpush.bf16.msrb.mxu3 %v6031_v38  ;;  %v7377_v4 = vld [vmem:[%s7927_s28 + $0xeb4] sm:$0xf0]  ;;  %v6862_v38 = vld [vmem:[%s7927_s28 + $0xfa8] sm:$0xf] }
 0x375   : > { %4376 = vmatpush.bf16.msrb.mxu0 %v6159_v12  ;;  %4389 = vmatpush.bf16.msrb.mxu1 %v6287_v13  ;;  %v6462_v12 = vld [vmem:[%s7927_s28 + $0xc88] sm:$0xf]  ;;  %v7309_v13 = vld [vmem:[%s7927_s28 + $0xc94] sm:$0xf0]  ;;  %v6735_v15 = vor.u32 %v7377_v4, %v6734_v62  ;;  %v6863_v14 = vor.u32 %v7409_v10, %v6862_v38  ;;  %v6431_v38 = vor.u32 %v7301_v41, %v6430_v40  ;;  %v6967_v40 = vld [vmem:[%s7927_s28 + $0x1ec] sm:$0xf] }
 0x376   : > { %v6463_v9 = vor.u32 %v7309_v13, %v6462_v12  ;;  %v7397_v58 = vld [vmem:[%s7927_s28 + $0xf54] sm:$0xf0]  ;;  %v6542_v13 = vld [vmem:[%s7927_s28 + $0xd28] sm:$0xf]  ;;  %v5104_v41 = vld [vmem:[%s7927_s28 + $0x1f8] sm:$0xf0] }
 0x377   : > { %v6798_v17 = vld [vmem:[%s7927_s28 + $0xf28] sm:$0xf]  ;;  %v7393_v21 = vld [vmem:[%s7927_s28 + $0xf34] sm:$0xf0] }
 0x378   : > { %4351 = vmatpush.bf16.msrb.mxu2 %v5887_v20  ;;  %4364 = vmatpush.bf16.msrb.mxu3 %v6015_v25  ;;  %v6591_v20 = vor.u32 %v7341_v19, %v6590_v16  ;;  %v6446_v25 = vld [vmem:[%s7927_s28 + $0xc68] sm:$0xf]  ;;  %v7361_v19 = vld [vmem:[%s7927_s28 + $0xe34] sm:$0xf0] }
 0x379   : > { %4377 = vmatpush.bf16.msrb.mxu0 %v6143_v26  ;;  %4390 = vmatpush.bf16.msrb.mxu1 %v6271_v18  ;;  %v6574_v26 = vld [vmem:[%s7927_s28 + $0xd68] sm:$0xf]  ;;  %v7337_v18 = vld [vmem:[%s7927_s28 + $0xd74] sm:$0xf0] }
 0x37a   : > { %v6398_v22 = vld [vmem:[%s7927_s28 + $0xc08] sm:$0xf]  ;;  %v7389_v35 = vld [vmem:[%s7927_s28 + $0xf14] sm:$0xf0] }
 0x37b   : > { %4352 = vmatmul.bf16.vlgmr.msrb.gmra.mxu2 %v8293_v63  ;;  %4365 = vmatmul.bf16.vlgmr.msrb.gmra.mxu3 %v8295_v0  ;;  %v4171_v7 = vpop.f32.mrf.mxu0  ;;  %v4184_v27 = vpop.f32.mrf.mxu1  ;;  %v6782_v34 = vld [vmem:[%s7927_s28 + $0xf08] sm:$0xf] }
 0x37c   : > { %4396 = vmatpush.bf16.msra.mxu2 %v6511_v31  ;;  %4409 = vmatpush.bf16.msra.mxu3 %v6639_v33  ;;  %v6702_v31 = vld [vmem:[%s7927_s28 + $0xe68] sm:$0xf]  ;;  %v7369_v33 = vld [vmem:[%s7927_s28 + $0xe74] sm:$0xf0] }
 0x37d   : > { %4422 = vmatpush.bf16.msra.mxu0 %v6767_v36  ;;  %4435 = vmatpush.bf16.msra.mxu1 %v6895_v37  ;;  %v6447_v36 = vor.u32 %v7305_v28, %v6446_v25  ;;  %v6575_v37 = vor.u32 %v7337_v18, %v6574_v26  ;;  %v6703_v42 = vor.u32 %v7369_v33, %v6702_v31  ;;  %v6526_v25 = vld [vmem:[%s7927_s28 + $0xd08] sm:$0xf]  ;;  %v7325_v28 = vld [vmem:[%s7927_s28 + $0xd14] sm:$0xf0] }
 0x37e   : > { %4378 = vmatmul.bf16.vlgmr.msrb.gmra.mxu0 %v8297_v2  ;;  %4391 = vmatmul.bf16.vlgmr.msrb.gmra.mxu1 %v8301_v5  ;;  %v4145_v39 = vpop.f32.mrf.mxu2  ;;  %v4158_v32 = vpop.f32.mrf.mxu3  ;;  %v6654_v31 = vld [vmem:[%s7927_s28 + $0xe08] sm:$0xf]  ;;  %v7357_v33 = vld [vmem:[%s7927_s28 + $0xe14] sm:$0xf0] }
 0x37f   : > { %v4146_v3 = vadd.f32 %v4145_v39, %v8857_v8  ;;  %v5232_v39 = vld [vmem:[%s7927_s28 + $0x2f8] sm:$0xf0] }
 0x380   : > { %4397 = vmatpush.bf16.msra.mxu2 %v6495_v45  ;;  %4410 = vmatpush.bf16.msra.mxu3 %v6623_v49  ;;  %v6558_v45 = vld [vmem:[%s7927_s28 + $0xd48] sm:$0xf]  ;;  %v7333_v49 = vld [vmem:[%s7927_s28 + $0xd54] sm:$0xf0] }
 0x381   : > { %4423 = vmatpush.bf16.msra.mxu0 %v6751_v50  ;;  %4436 = vmatpush.bf16.msra.mxu1 %v6879_v51  ;;  %v7365_v50 = vld [vmem:[%s7927_s28 + $0xe54] sm:$0xf0]  ;;  %v6814_v51 = vld [vmem:[%s7927_s28 + $0xf48] sm:$0xf]  ;;  %v4159_v59 = vadd.f32 %v4158_v32, %v4146_v3  ;;  %v6559_v10 = vor.u32 %v7333_v49, %v6558_v45  ;;  %v7031_v32 = vld [vmem:[%s7927_s28 + $0x3ec] sm:$0xf]  ;;  %v6655_v49 = vor.u32 %v7357_v33, %v6654_v31 }
 0x382   : > { %v6687_v8 = vor.u32 %v7365_v50, %v6686_v1  ;;  %v6815_v12 = vor.u32 %v7397_v58, %v6814_v51  ;;  %v5360_v45 = vld [vmem:[%s7927_s28 + $0x3f8] sm:$0xf0]  ;;  %v6783_v1 = vor.u32 %v7389_v35, %v6782_v34  ;;  %v5107_v50 = vor.u32 %v6967_v40, %v5104_v41  ;;  %v6931_v51 = vld [vmem:[%s7927_s28 + $0xcc] sm:$0xf] }
 0x383   : > { %v4173_v62 = vpop.f32.mrf.mxu0  ;;  %v4186_v4 = vpop.f32.mrf.mxu1  ;;  %v4172_v16 = vadd.f32 %v4171_v7, %v4159_v59  ;;  %v4960_v58 = vld [vmem:[%s7927_s28 + $0xd8] sm:$0xf0]  ;;  %v6955_v31 = vld [vmem:[%s7927_s28 + $0x18c] sm:$0xf] }
 0x384   : > { %4398 = vmatpush.bf16.msra.mxu2 %v6479_v11  ;;  %4411 = vmatpush.bf16.msra.mxu3 %v6607_v6  ;;  %v6414_v11 = vld [vmem:[%s7927_s28 + $0xc28] sm:$0xf]  ;;  %v7297_v6 = vld [vmem:[%s7927_s28 + $0xc34] sm:$0xf0]  ;;  %v5363_v62 = vor.u32 %v7031_v32, %v5360_v45  ;;  %v6963_v4 = vld [vmem:[%s7927_s28 + $0x1cc] sm:$0xf] }
 0x385   : > { %4424 = vmatpush.bf16.msra.mxu0 %v6735_v15  ;;  %4437 = vmatpush.bf16.msra.mxu1 %v6863_v14  ;;  %v7329_v15 = vld [vmem:[%s7927_s28 + $0xd34] sm:$0xf0]  ;;  %v6670_v14 = vld [vmem:[%s7927_s28 + $0xe28] sm:$0xf]  ;;  %v6415_v23 = vor.u32 %v7297_v6, %v6414_v11  ;;  %v8928_v7 = vadd.f32 %v4184_v27, %v4172_v16  ;;  %v6999_v27 = vld [vmem:[%s7927_s28 + $0x2ec] sm:$0xf] }
 0x386   : > { %v4147_v26 = vpop.f32.mrf.mxu2  ;;  %v4160_v18 = vpop.f32.mrf.mxu3  ;;  %v5235_v59 = vor.u32 %v6999_v27, %v5232_v39  ;;  %v5216_v11 = vld [vmem:[%s7927_s28 + $0x2d8] sm:$0xf0]  ;;  %v7027_v6 = vld [vmem:[%s7927_s28 + $0x3cc] sm:$0xf] }
 0x387   : > { %v5056_v33 = vld [vmem:[%s7927_s28 + $0x198] sm:$0xf0]  ;;  %v6987_v34 = vld [vmem:[%s7927_s28 + $0x28c] sm:$0xf] }
 0x388   : > { %4399 = vmatpush.bf16.msra.mxu2 %v6463_v9  ;;  %4412 = vmatpush.bf16.msra.mxu3 %v6591_v20  ;;  %v6543_v9 = vor.u32 %v7329_v15, %v6542_v13  ;;  %v7293_v20 = vld [vmem:[%s7927_s28 + $0xc14] sm:$0xf0]  ;;  %v6927_v15 = vld [vmem:[%s7927_s28 + $0xac] sm:$0xf]  ;;  %v5184_v35 = vld [vmem:[%s7927_s28 + $0x298] sm:$0xf0] }
 0x389   : > { %4425 = vmatpush.bf16.msra.mxu0 %v6719_v29  ;;  %4438 = vmatpush.bf16.msra.mxu1 %v6847_v30  ;;  %v6671_v29 = vor.u32 %v7361_v19, %v6670_v14  ;;  %v6799_v30 = vor.u32 %v7393_v21, %v6798_v17  ;;  %v4944_v14 = vld [vmem:[%s7927_s28 + $0xb8] sm:$0xf0]  ;;  %v6959_v17 = vld [vmem:[%s7927_s28 + $0x1ac] sm:$0xf]  ;;  %v5187_v32 = vor.u32 %v6987_v34, %v5184_v35 }
 0x38a   : > { %v5072_v21 = vld [vmem:[%s7927_s28 + $0x1b8] sm:$0xf0]  ;;  %v7007_v34 = vld [vmem:[%s7927_s28 + $0x32c] sm:$0xf] }
 0x38b   : > { %v4912_v39 = vld [vmem:[%s7927_s28 + $0x78] sm:$0xf0] }
 0x38c   : > { %4400 = vmatpush.bf16.msra.mxu2 %v6447_v36  ;;  %4413 = vmatpush.bf16.msra.mxu3 %v6575_v37  ;;  %v6935_v36 = vld [vmem:[%s7927_s28 + $0xec] sm:$0xf]  ;;  %v4976_v37 = vld [vmem:[%s7927_s28 + $0xf8] sm:$0xf0] }
 0x38d   : > { %4426 = vmatpush.bf16.msra.mxu0 %v6703_v42  ;;  %4439 = vmatpush.bf16.msra.mxu1 %v6831_v43  ;;  %v6399_v42 = vor.u32 %v7293_v20, %v6398_v22  ;;  %v6527_v43 = vor.u32 %v7325_v28, %v6526_v25  ;;  %v4979_v3 = vor.u32 %v6935_v36, %v4976_v37  ;;  %v6991_v22 = vld [vmem:[%s7927_s28 + $0x2ac] sm:$0xf]  ;;  %v5328_v20 = vld [vmem:[%s7927_s28 + $0x3b8] sm:$0xf0] }
 0x38e   : > { %v4947_v25 = vor.u32 %v6927_v15, %v4944_v14  ;;  %v5075_v28 = vor.u32 %v6959_v17, %v5072_v21  ;;  %v7019_v36 = vld [vmem:[%s7927_s28 + $0x38c] sm:$0xf]  ;;  %v5312_v37 = vld [vmem:[%s7927_s28 + $0x398] sm:$0xf0] }
 0x38f   : > { %v5315_v45 = vor.u32 %v7019_v36, %v5312_v37  ;;  %v6979_v15 = vld [vmem:[%s7927_s28 + $0x24c] sm:$0xf]  ;;  %v5280_v17 = vld [vmem:[%s7927_s28 + $0x358] sm:$0xf0] }
 0x390   : > { %4401 = vmatpush.bf16.msra.mxu2 %v6431_v38  ;;  %4414 = vmatpush.bf16.msra.mxu3 %v6559_v10  ;;  %v5088_v38 = vld [vmem:[%s7927_s28 + $0x1d8] sm:$0xf0]  ;;  %v6995_v10 = vld [vmem:[%s7927_s28 + $0x2cc] sm:$0xf] }
 0x391   : > { %4427 = vmatpush.bf16.msra.mxu0 %v6687_v8  ;;  %4440 = vmatpush.bf16.msra.mxu1 %v6815_v12  ;;  %v5344_v8 = vld [vmem:[%s7927_s28 + $0x3d8] sm:$0xf0]  ;;  %v4963_v12 = vor.u32 %v6931_v51, %v4960_v58  ;;  %v5091_v13 = vor.u32 %v6963_v4, %v5088_v38  ;;  %v5219_v16 = vor.u32 %v6995_v10, %v5216_v11  ;;  %v7015_v51 = vld [vmem:[%s7927_s28 + $0x36c] sm:$0xf] }
 0x392   : > { %v5347_v19 = vor.u32 %v7027_v6, %v5344_v8  ;;  %v5296_v58 = vld [vmem:[%s7927_s28 + $0x378] sm:$0xf0]  ;;  %v6915_v4 = vld [vmem:[%s7927_s28 + $0x4c] sm:$0xf] }
 0x393   : > { %v4896_v38 = vld [vmem:[%s7927_s28 + $0x58] sm:$0xf0]  ;;  %v5299_v11 = vor.u32 %v7015_v51, %v5296_v58  ;;  %v6907_v36 = vld [vmem:[%s7927_s28 + $0xc] sm:$0xf] }
 0x394   : > { %4402 = vmatpush.bf16.msra.mxu2 %v6415_v23  ;;  %4415 = vmatpush.bf16.msra.mxu3 %v6543_v9  ;;  %v5200_v23 = vld [vmem:[%s7927_s28 + $0x2b8] sm:$0xf0]  ;;  %v7023_v9 = vld [vmem:[%s7927_s28 + $0x3ac] sm:$0xf] }
 0x395   : > { %4428 = vmatpush.bf16.msra.mxu0 %v6671_v29  ;;  %4441 = vmatpush.bf16.msra.mxu1 %v6799_v30  ;;  %v6923_v29 = vld [vmem:[%s7927_s28 + $0x8c] sm:$0xf]  ;;  %v4928_v30 = vld [vmem:[%s7927_s28 + $0x98] sm:$0xf0]  ;;  %v5203_v26 = vor.u32 %v6991_v22, %v5200_v23  ;;  %v5331_v18 = vor.u32 %v7023_v9, %v5328_v20  ;;  %v4899_v9 = vor.u32 %v6915_v4, %v4896_v38 }
 0x396   : > { %v4931_v27 = vor.u32 %v6923_v29, %v4928_v30  ;;  %v6943_v30 = vld [vmem:[%s7927_s28 + $0x12c] sm:$0xf]  ;;  %v5264_v35 = vld [vmem:[%s7927_s28 + $0x338] sm:$0xf0] }
 0x397   : > { %v4864_v37 = vld [vmem:[%s7927_s28 + $0x18] sm:$0xf0]  ;;  %v7063_v58 = vld [vmem:[%s7927_s28 + $0x4ec] sm:$0xf] }
 0x398   : > { %4403 = vmatpush.bf16.msra.mxu2 %v6399_v42  ;;  %4416 = vmatpush.bf16.msra.mxu3 %v6527_v43  ;;  %v5059_v42 = vor.u32 %v6955_v31, %v5056_v33  ;;  %v6919_v43 = vld [vmem:[%s7927_s28 + $0x6c] sm:$0xf]  ;;  %v5136_v33 = vld [vmem:[%s7927_s28 + $0x238] sm:$0xf0] }
 0x399   : > { %4429 = vmatpush.bf16.msra.mxu0 %v6655_v49  ;;  %4442 = vmatpush.bf16.msra.mxu1 %v6783_v1  ;;  %v6951_v49 = vld [vmem:[%s7927_s28 + $0x16c] sm:$0xf]  ;;  %v5040_v1 = vld [vmem:[%s7927_s28 + $0x178] sm:$0xf0] }
 0x39a   : > { %v5248_v51 = vld [vmem:[%s7927_s28 + $0x318] sm:$0xf0]  ;;  %v7095_v4 = vld [vmem:[%s7927_s28 + $0x5ec] sm:$0xf] }
 0x39b   : > { %4404 = vmatmul.bf16.vlgmr.msra.gmra.mxu2 %v8369_v53  ;;  %4417 = vmatmul.bf16.vlgmr.msra.gmra.mxu3 %v8371_v56  ;;  %v4223_v40 = vpop.f32.mrf.mxu0  ;;  %v4236_v41 = vpop.f32.mrf.mxu1  ;;  %v5616_v38 = vld [vmem:[%s7927_s28 + $0x5f8] sm:$0xf0] }
 0x39c   : > { %4448 = vmatpush.bf16.msrb.mxu2 %v4979_v3  ;;  %4461 = vmatpush.bf16.msrb.mxu3 %v5107_v50  ;;  %v6983_v3 = vld [vmem:[%s7927_s28 + $0x26c] sm:$0xf]  ;;  %v5168_v50 = vld [vmem:[%s7927_s28 + $0x278] sm:$0xf0] }
 0x39d   : > { %4474 = vmatpush.bf16.msrb.mxu0 %v5235_v59  ;;  %4487 = vmatpush.bf16.msrb.mxu1 %v5363_v62  ;;  %v4915_v59 = vor.u32 %v6919_v43, %v4912_v39  ;;  %v5043_v62 = vor.u32 %v6951_v49, %v5040_v1  ;;  %v5171_v10 = vor.u32 %v6983_v3, %v5168_v50 }
 0x39e   : > { %4430 = vmatmul.bf16.vlgmr.msra.gmra.mxu0 %v8373_v57  ;;  %4443 = vmatmul.bf16.vlgmr.msra.gmra.mxu1 %v8377_v44  ;;  %v4197_v6 = vpop.f32.mrf.mxu2  ;;  %v4210_v8 = vpop.f32.mrf.mxu3  ;;  %v5267_v1 = vor.u32 %v7007_v34, %v5264_v35  ;;  %v5456_v34 = vld [vmem:[%s7927_s28 + $0x4b8] sm:$0xf0] }
 0x39f   : > { %v4198_v14 = vadd.f32 %v4197_v6, %v8928_v7  ;;  %v6911_v7 = vld [vmem:[%s7927_s28 + $0x2c] sm:$0xf]  ;;  %v4656_v6 = vmax.f32 %v8709_v24, 0.0 }
 0x3a0   : > { %4449 = vmatpush.bf16.msrb.mxu2 %v4963_v12  ;;  %4462 = vmatpush.bf16.msrb.mxu3 %v5091_v13  ;;  %v6947_v12 = vld [vmem:[%s7927_s28 + $0x14c] sm:$0xf]  ;;  %v5024_v13 = vld [vmem:[%s7927_s28 + $0x158] sm:$0xf0] }
 0x3a1   : > { %4475 = vmatpush.bf16.msrb.mxu0 %v5219_v16  ;;  %4488 = vmatpush.bf16.msrb.mxu1 %v5347_v19  ;;  %v5152_v16 = vld [vmem:[%s7927_s28 + $0x258] sm:$0xf0]  ;;  %v7011_v19 = vld [vmem:[%s7927_s28 + $0x34c] sm:$0xf]  ;;  %v4211_v21 = vadd.f32 %v4210_v8, %v4198_v14  ;;  %v5027_v20 = vor.u32 %v6947_v12, %v5024_v13  ;;  %v4867_v12 = vor.u32 %v6907_v36, %v4864_v37 }
 0x3a2   : > { %v5283_v29 = vor.u32 %v7011_v19, %v5280_v17  ;;  %v5872_v14 = vld [vmem:[%s7927_s28 + $0x7f8] sm:$0xf0]  ;;  %v7087_v37 = vld [vmem:[%s7927_s28 + $0x5ac] sm:$0xf] }
 0x3a3   : > { %v4225_v22 = vpop.f32.mrf.mxu0  ;;  %v4238_v23 = vpop.f32.mrf.mxu1  ;;  %v4224_v31 = vadd.f32 %v4223_v40, %v4211_v21  ;;  %v5120_v40 = vld [vmem:[%s7927_s28 + $0x218] sm:$0xf0]  ;;  %v5619_v21 = vor.u32 %v7095_v4, %v5616_v38  ;;  %v7047_v38 = vld [vmem:[%s7927_s28 + $0x46c] sm:$0xf] }
 0x3a4   : > { %4450 = vmatpush.bf16.msrb.mxu2 %v4947_v25  ;;  %4463 = vmatpush.bf16.msrb.mxu3 %v5075_v28  ;;  %v4880_v25 = vld [vmem:[%s7927_s28 + $0x38] sm:$0xf0]  ;;  %v5155_v28 = vor.u32 %v6979_v15, %v5152_v16  ;;  %v7159_v15 = vld [vmem:[%s7927_s28 + $0x7ec] sm:$0xf] }
 0x3a5   : > { %4476 = vmatpush.bf16.msrb.mxu0 %v5203_v26  ;;  %4489 = vmatpush.bf16.msrb.mxu1 %v5331_v18  ;;  %v5008_v26 = vld [vmem:[%s7927_s28 + $0x138] sm:$0xf0]  ;;  %v6975_v18 = vld [vmem:[%s7927_s28 + $0x22c] sm:$0xf]  ;;  %v4883_v43 = vor.u32 %v6911_v7, %v4880_v25 }
 0x3a6   : > { %v5011_v39 = vor.u32 %v6943_v30, %v5008_v26  ;;  %v5139_v49 = vor.u32 %v6975_v18, %v5136_v33  ;;  %v4199_v3 = vpop.f32.mrf.mxu2  ;;  %v4212_v50 = vpop.f32.mrf.mxu3  ;;  %v7059_v22 = vld [vmem:[%s7927_s28 + $0x4cc] sm:$0xf]  ;;  %v5472_v23 = vld [vmem:[%s7927_s28 + $0x4d8] sm:$0xf0] }
 0x3a7   : > { %v7091_v7 = vld [vmem:[%s7927_s28 + $0x5cc] sm:$0xf]  ;;  %v5600_v25 = vld [vmem:[%s7927_s28 + $0x5d8] sm:$0xf0]  ;;  %v5475_v18 = vor.u32 %v7059_v22, %v5472_v23 }
 0x3a8   : > { %4451 = vmatpush.bf16.msrb.mxu2 %v4931_v27  ;;  %4464 = vmatpush.bf16.msrb.mxu3 %v5059_v42  ;;  %v6939_v27 = vld [vmem:[%s7927_s28 + $0x10c] sm:$0xf]  ;;  %v4237_v42 = vadd.f32 %v4236_v41, %v4224_v31  ;;  %v5856_v26 = vld [vmem:[%s7927_s28 + $0x7d8] sm:$0xf0]  ;;  %v5603_v31 = vor.u32 %v7091_v7, %v5600_v25 }
 0x3a9   : > { %4477 = vmatpush.bf16.msrb.mxu0 %v5187_v32  ;;  %4490 = vmatpush.bf16.msrb.mxu1 %v5315_v45  ;;  %v4992_v32 = vld [vmem:[%s7927_s28 + $0x118] sm:$0xf0]  ;;  %v6971_v45 = vld [vmem:[%s7927_s28 + $0x20c] sm:$0xf] }
 0x3aa   : > { %v7003_v41 = vld [vmem:[%s7927_s28 + $0x30c] sm:$0xf]  ;;  %v4995_v13 = vor.u32 %v6939_v27, %v4992_v32  ;;  %v5123_v16 = vor.u32 %v6971_v45, %v5120_v40  ;;  %v5584_v27 = vld [vmem:[%s7927_s28 + $0x5b8] sm:$0xf0] }
 0x3ab   : > { %v5251_v19 = vor.u32 %v7003_v41, %v5248_v51  ;;  %v7155_v30 = vld [vmem:[%s7927_s28 + $0x7cc] sm:$0xf]  ;;  %v5840_v32 = vld [vmem:[%s7927_s28 + $0x7b8] sm:$0xf0]  ;;  %v5587_v40 = vor.u32 %v7087_v37, %v5584_v27 }
 0x3ac   : > { %4452 = vmatpush.bf16.msrb.mxu2 %v4915_v59  ;;  %4465 = vmatpush.bf16.msrb.mxu3 %v5043_v62  ;;  %v4657_v59 = vmax.f32 %v4237_v42, 0.0  ;;  %v5488_v62 = vld [vmem:[%s7927_s28 + $0x4f8] sm:$0xf0]  ;;  %v7055_v33 = vld [vmem:[%s7927_s28 + $0x4ac] sm:$0xf]  ;;  %v5859_v36 = vor.u32 %v7155_v30, %v5856_v26 }
 0x3ad   : > { %4478 = vmatpush.bf16.msrb.mxu0 %v5171_v10  ;;  %4491 = vmatpush.bf16.msrb.mxu1 %v5299_v11  ;;  %v7127_v10 = vld [vmem:[%s7927_s28 + $0x6ec] sm:$0xf]  ;;  %v5744_v11 = vld [vmem:[%s7927_s28 + $0x6f8] sm:$0xf0]  ;;  %v5491_v17 = vor.u32 %v7063_v58, %v5488_v62  ;;  %v5459_v45 = vor.u32 %v7055_v33, %v5456_v34 }
 0x3ae   : > { %v4664_v8 = vrot.slane %v4657_v59, 6  ;;  %v7119_v42 = vld [vmem:[%s7927_s28 + $0x6ac] sm:$0xf]  ;;  %v5568_v50 = vld [vmem:[%s7927_s28 + $0x598] sm:$0xf0] }
 0x3af   : > { %v7083_v3 = vld [vmem:[%s7927_s28 + $0x58c] sm:$0xf]  ;;  %v5696_v41 = vld [vmem:[%s7927_s28 + $0x698] sm:$0xf0] }
 0x3b0   : > { %4453 = vmatpush.bf16.msrb.mxu2 %v4899_v9  ;;  %4466 = vmatpush.bf16.msrb.mxu3 %v5027_v20  ;;  %v9013_v24 = vsel %vm4667_vm2, %v4656_v6, %v4664_v8  ;;  %v5747_v9 = vor.u32 %v7127_v10, %v5744_v11  ;;  %v5875_v20 = vor.u32 %v7159_v15, %v5872_v14  ;;  %v5824_v51 = vld [vmem:[%s7927_s28 + $0x798] sm:$0xf0]  ;;  %v7079_v11 = vld [vmem:[%s7927_s28 + $0x56c] sm:$0xf] }
 0x3b1   : > { %4479 = vmatpush.bf16.msrb.mxu0 %v5155_v28  ;;  %4492 = vmatpush.bf16.msrb.mxu1 %v5283_v29  ;;  %v7123_v28 = vld [vmem:[%s7927_s28 + $0x6cc] sm:$0xf]  ;;  %v5728_v29 = vld [vmem:[%s7927_s28 + $0x6d8] sm:$0xf0]  ;;  %v5571_v4 = vor.u32 %v7083_v3, %v5568_v50 }
 0x3b2   : > { %v5731_v35 = vor.u32 %v7123_v28, %v5728_v29  ;;  %v5424_v10 = vld [vmem:[%s7927_s28 + $0x478] sm:$0xf0]  ;;  %v7143_v14 = vld [vmem:[%s7927_s28 + $0x76c] sm:$0xf] }
 0x3b3   : > { %v5680_v15 = vld [vmem:[%s7927_s28 + $0x678] sm:$0xf0]  ;;  %v7043_v23 = vld [vmem:[%s7927_s28 + $0x44c] sm:$0xf] }
 0x3b4   : > { %4454 = vmatpush.bf16.msrb.mxu2 %v4883_v43  ;;  %4467 = vmatpush.bf16.msrb.mxu3 %v5011_v39  ;;  %v5712_v43 = vld [vmem:[%s7927_s28 + $0x6b8] sm:$0xf0]  ;;  %v7151_v39 = vld [vmem:[%s7927_s28 + $0x7ac] sm:$0xf] }
 0x3b5   : > { %4480 = vmatpush.bf16.msrb.mxu0 %v5139_v49  ;;  %4493 = vmatpush.bf16.msrb.mxu1 %v5267_v1  ;;  %v5440_v49 = vld [vmem:[%s7927_s28 + $0x498] sm:$0xf0]  ;;  %v5843_v1 = vor.u32 %v7151_v39, %v5840_v32  ;;  %v7075_v29 = vld [vmem:[%s7927_s28 + $0x54c] sm:$0xf] }
 0x3b6   : > { %v5536_v30 = vld [vmem:[%s7927_s28 + $0x558] sm:$0xf0]  ;;  %v7107_v26 = vld [vmem:[%s7927_s28 + $0x64c] sm:$0xf] }
 0x3b7   : > { %v7139_v33 = vld [vmem:[%s7927_s28 + $0x74c] sm:$0xf]  ;;  %v5792_v34 = vld [vmem:[%s7927_s28 + $0x758] sm:$0xf0] }
 0x3b8   : > { %4455 = vmatpush.bf16.msrb.mxu2 %v4867_v12  ;;  %4468 = vmatpush.bf16.msrb.mxu3 %v4995_v13  ;;  %v5552_v12 = vld [vmem:[%s7927_s28 + $0x578] sm:$0xf0]  ;;  %v7111_v13 = vld [vmem:[%s7927_s28 + $0x66c] sm:$0xf] }
 0x3b9   : > { %4481 = vmatpush.bf16.msrb.mxu0 %v5123_v16  ;;  %4494 = vmatpush.bf16.msrb.mxu1 %v5251_v19  ;;  %v5808_v16 = vld [vmem:[%s7927_s28 + $0x778] sm:$0xf0]  ;;  %v9054_v19 = vld [vmem:[%s8528_s29] sm:$0xf]  ;;  %v5555_v22 = vor.u32 %v7079_v11, %v5552_v12  ;;  %v7135_v3 = vld [vmem:[%s7927_s28 + $0x72c] sm:$0xf] }
 0x3ba   : > { %v5811_v7 = vor.u32 %v7143_v14, %v5808_v16  ;;  %v5392_v39 = vld [vmem:[%s7927_s28 + $0x438] sm:$0xf0]  ;;  %v7191_v14 = vld [vmem:[%s7927_s28 + $0x8ec] sm:$0xf] }
 0x3bb   : > { %4456 = vmatmul.bf16.vlgmr.msrb.gmra.mxu2 %v8201_v54  ;;  %4469 = vmatmul.bf16.vlgmr.msrb.gmra.mxu3 %v8203_v55  ;;  %v7051_v54 = vld [vmem:[%s7927_s28 + $0x48c] sm:$0xf]  ;;  %v5715_v55 = vor.u32 %v7119_v42, %v5712_v43  ;;  %v4275_v58 = vpop.f32.mrf.mxu0  ;;  %v9043_v59 = vpop.f32.mrf.mxu1  ;;  %v5539_v42 = vor.u32 %v7075_v29, %v5536_v30  ;;  %v5776_v50 = vld [vmem:[%s7927_s28 + $0x738] sm:$0xf0] }
 0x3bc   : > { %4500 = vmatpush.bf16.msra.mxu2 %v5491_v17  ;;  %4513 = vmatpush.bf16.msra.mxu3 %v5619_v21  ;;  %v5443_v62 = vor.u32 %v7051_v54, %v5440_v49  ;;  %v1258_v17 = vperm.slane %v9054_v19, 2  ;;  %v5427_v21 = vor.u32 %v7047_v38, %v5424_v10  ;;  %v7039_v43 = vld [vmem:[%s7927_s28 + $0x42c] sm:$0xf]  ;;  %v5520_v54 = vld [vmem:[%s7927_s28 + $0x538] sm:$0xf0]  ;;  %v5779_v10 = vor.u32 %v7135_v3, %v5776_v50 }
 0x3bd   : > { %4526 = vmatpush.bf16.msra.mxu0 %v5747_v9  ;;  %4539 = vmatpush.bf16.msra.mxu1 %v5875_v20  ;;  %v5408_v9 = vld [vmem:[%s7927_s28 + $0x458] sm:$0xf0]  ;;  %v5683_v20 = vor.u32 %v7111_v13, %v5680_v15  ;;  %v7103_v49 = vld [vmem:[%s7927_s28 + $0x62c] sm:$0xf] }
 0x3be   : > { %4482 = vmatmul.bf16.vlgmr.msrb.gmra.mxu0 %v8205_v60  ;;  %4495 = vmatmul.bf16.vlgmr.msrb.gmra.mxu1 %v8207_v61  ;;  %v7115_v60 = vld [vmem:[%s7927_s28 + $0x68c] sm:$0xf]  ;;  %v4249_v25 = vpop.f32.mrf.mxu2  ;;  %v4262_v28 = vpop.f32.mrf.mxu3  ;;  %v5411_v27 = vor.u32 %v7043_v23, %v5408_v9  ;;  %v5632_v12 = vld [vmem:[%s7927_s28 + $0x618] sm:$0xf0] }
 0x3bf   : > { %v7147_v61 = vld [vmem:[%s7927_s28 + $0x78c] sm:$0xf]  ;;  %v5699_v6 = vor.u32 %v7115_v60, %v5696_v41  ;;  %v5395_v41 = vor.u32 %v7039_v43, %v5392_v39  ;;  %v5760_v15 = vld [vmem:[%s7927_s28 + $0x718] sm:$0xf0] }
 0x3c0   : > { %4501 = vmatpush.bf16.msra.mxu2 %v5475_v18  ;;  %4514 = vmatpush.bf16.msra.mxu3 %v5603_v31  ;;  %v5827_v8 = vor.u32 %v7147_v61, %v5824_v51  ;;  %v4250_v18 = vadd.f32 %v4249_v25, %v1258_v17  ;;  %v5664_v31 = vld [vmem:[%s7927_s28 + $0x658] sm:$0xf0]  ;;  %v7035_v60 = vld [vmem:[%s7927_s28 + $0x40c] sm:$0xf] }
 0x3c1   : > { %4527 = vmatpush.bf16.msra.mxu0 %v5731_v35  ;;  %4540 = vmatpush.bf16.msra.mxu1 %v5859_v36  ;;  %v5667_v32 = vor.u32 %v7107_v26, %v5664_v31  ;;  %v5376_v51 = vld [vmem:[%s7927_s28 + $0x418] sm:$0xf0]  ;;  %v7131_v13 = vld [vmem:[%s7927_s28 + $0x70c] sm:$0xf] }
 0x3c2   : > { %v4263_v35 = vadd.f32 %v4262_v28, %v4250_v18  ;;  %v6000_v16 = vld [vmem:[%s7927_s28 + $0x8f8] sm:$0xf0]  ;;  %v7223_v17 = vld [vmem:[%s7927_s28 + $0x9ec] sm:$0xf]  ;;  %v5763_v28 = vor.u32 %v7131_v13, %v5760_v15 }
 0x3c3   : > { %v4277_v36 = vpop.f32.mrf.mxu0  ;;  %v4290_v37 = vpop.f32.mrf.mxu1  ;;  %v6256_v9 = vld [vmem:[%s7927_s28 + $0xaf8] sm:$0xf0]  ;;  %v6003_v29 = vor.u32 %v7191_v14, %v6000_v16  ;;  %v7187_v26 = vld [vmem:[%s7927_s28 + $0x8cc] sm:$0xf] }
 0x3c4   : > { %4502 = vmatpush.bf16.msra.mxu2 %v5459_v45  ;;  %4515 = vmatpush.bf16.msra.mxu3 %v5587_v40  ;;  %v5795_v45 = vor.u32 %v7139_v33, %v5792_v34  ;;  %v7071_v40 = vld [vmem:[%s7927_s28 + $0x52c] sm:$0xf]  ;;  %v5984_v18 = vld [vmem:[%s7927_s28 + $0x8d8] sm:$0xf0] }
 0x3c5   : > { %4528 = vmatpush.bf16.msra.mxu0 %v5715_v55  ;;  %4541 = vmatpush.bf16.msra.mxu1 %v5843_v1  ;;  %v4276_v55 = vadd.f32 %v4275_v58, %v4263_v35  ;;  %v5648_v1 = vld [vmem:[%s7927_s28 + $0x638] sm:$0xf0]  ;;  %v5523_v61 = vor.u32 %v7071_v40, %v5520_v54  ;;  %v7219_v34 = vld [vmem:[%s7927_s28 + $0x9cc] sm:$0xf]  ;;  %v5987_v43 = vor.u32 %v7187_v26, %v5984_v18 }
 0x3c6   : > { %v5651_v38 = vor.u32 %v7103_v49, %v5648_v1  ;;  %v4251_v11 = vpop.f32.mrf.mxu2  ;;  %v6112_v35 = vld [vmem:[%s7927_s28 + $0x9d8] sm:$0xf0]  ;;  %v7251_v36 = vld [vmem:[%s7927_s28 + $0xacc] sm:$0xf] }
 0x3c7   : > { %v9078_v58 = vadd.f32 %v9043_v59, %v4276_v55  ;;  %v7255_v59 = vld [vmem:[%s7927_s28 + $0xaec] sm:$0xf]  ;;  %v6240_v37 = vld [vmem:[%s7927_s28 + $0xad8] sm:$0xf0]  ;;  %v6115_v39 = vor.u32 %v7219_v34, %v6112_v35 }
 0x3c8   : > { %4503 = vmatpush.bf16.msra.mxu2 %v5443_v62  ;;  %4516 = vmatpush.bf16.msra.mxu3 %v5571_v4  ;;  %v7067_v62 = vld [vmem:[%s7927_s28 + $0x50c] sm:$0xf]  ;;  %v5504_v4 = vld [vmem:[%s7927_s28 + $0x518] sm:$0xf0]  ;;  %v6259_v31 = vor.u32 %v7255_v59, %v6256_v9  ;;  %v6243_v40 = vor.u32 %v7251_v36, %v6240_v37 }
 0x3c9   : > { %4529 = vmatpush.bf16.msra.mxu0 %v5699_v6  ;;  %4542 = vmatpush.bf16.msra.mxu1 %v5827_v8  ;;  %v4264_v6 = vpop.f32.mrf.mxu3  ;;  %v7099_v8 = vld [vmem:[%s7927_s28 + $0x60c] sm:$0xf]  ;;  %v5507_v23 = vor.u32 %v7067_v62, %v5504_v4  ;;  %v6096_v55 = vld [vmem:[%s7927_s28 + $0x9b8] sm:$0xf0] }
 0x3ca   : > { %v5635_v25 = vor.u32 %v7099_v8, %v5632_v12  ;;  %v7215_v49 = vld [vmem:[%s7927_s28 + $0x9ac] sm:$0xf]  ;;  %v6224_v3 = vld [vmem:[%s7927_s28 + $0xab8] sm:$0xf0] }
 0x3cb   : > { %v7247_v1 = vld [vmem:[%s7927_s28 + $0xaac] sm:$0xf]  ;;  %v6336_v11 = vld [vmem:[%s7927_s28 + $0xb98] sm:$0xf0] }
 0x3cc   : > { %4504 = vmatpush.bf16.msra.mxu2 %v5427_v21  ;;  %4517 = vmatpush.bf16.msra.mxu3 %v5555_v22  ;;  %v6128_v21 = vld [vmem:[%s7927_s28 + $0x9f8] sm:$0xf0]  ;;  %v5379_v22 = vor.u32 %v7035_v60, %v5376_v51  ;;  %v7279_v50 = vld [vmem:[%s7927_s28 + $0xbac] sm:$0xf] }
 0x3cd   : > { %4530 = vmatpush.bf16.msra.mxu0 %v5683_v20  ;;  %4543 = vmatpush.bf16.msra.mxu1 %v5811_v7  ;;  %v7287_v20 = vld [vmem:[%s7927_s28 + $0xbec] sm:$0xf]  ;;  %v6384_v7 = vld [vmem:[%s7927_s28 + $0xbf8] sm:$0xf0]  ;;  %v6131_v30 = vor.u32 %v7223_v17, %v6128_v21 }
 0x3ce   : > { %v6387_v33 = vor.u32 %v7287_v20, %v6384_v7  ;;  %v6352_v60 = vld [vmem:[%s7927_s28 + $0xbb8] sm:$0xf0]  ;;  %v7211_v4 = vld [vmem:[%s7927_s28 + $0x98c] sm:$0xf] }
 0x3cf   : > { %v5952_v51 = vld [vmem:[%s7927_s28 + $0x898] sm:$0xf0]  ;;  %v6355_v62 = vor.u32 %v7279_v50, %v6352_v60  ;;  %v7175_v15 = vld [vmem:[%s7927_s28 + $0x86c] sm:$0xf] }
 0x3d0   : > { %4505 = vmatpush.bf16.msra.mxu2 %v5411_v27  ;;  %4518 = vmatpush.bf16.msra.mxu3 %v5539_v42  ;;  %v7283_v27 = vld [vmem:[%s7927_s28 + $0xbcc] sm:$0xf]  ;;  %v6368_v42 = vld [vmem:[%s7927_s28 + $0xbd8] sm:$0xf0] }
 0x3d1   : > { %4531 = vmatpush.bf16.msra.mxu0 %v5667_v32  ;;  %4544 = vmatpush.bf16.msra.mxu1 %v5795_v45  ;;  %v7183_v32 = vld [vmem:[%s7927_s28 + $0x8ac] sm:$0xf]  ;;  %v5968_v45 = vld [vmem:[%s7927_s28 + $0x8b8] sm:$0xf0]  ;;  %v6371_v54 = vor.u32 %v7283_v27, %v6368_v42 }
 0x3d2   : > { %v5936_v14 = vld [vmem:[%s7927_s28 + $0x878] sm:$0xf0]  ;;  %v7207_v21 = vld [vmem:[%s7927_s28 + $0x96c] sm:$0xf] }
 0x3d3   : > { %v6064_v59 = vld [vmem:[%s7927_s28 + $0x978] sm:$0xf0]  ;;  %v7271_v9 = vld [vmem:[%s7927_s28 + $0xb6c] sm:$0xf]  ;;  %v5939_v7 = vor.u32 %v7175_v15, %v5936_v14 }
 0x3d4   : > { %4506 = vmatpush.bf16.msra.mxu2 %v5395_v41  ;;  %4519 = vmatpush.bf16.msra.mxu3 %v5523_v61  ;;  %v5971_v41 = vor.u32 %v7183_v32, %v5968_v45  ;;  %v6099_v61 = vor.u32 %v7215_v49, %v6096_v55  ;;  %v6320_v20 = vld [vmem:[%s7927_s28 + $0xb78] sm:$0xf0]  ;;  %v7235_v35 = vld [vmem:[%s7927_s28 + $0xa4c] sm:$0xf] }
 0x3d5   : > { %4532 = vmatpush.bf16.msra.mxu0 %v5651_v38  ;;  %4545 = vmatpush.bf16.msra.mxu1 %v5779_v10  ;;  %v6080_v38 = vld [vmem:[%s7927_s28 + $0x998] sm:$0xf0]  ;;  %v7243_v10 = vld [vmem:[%s7927_s28 + $0xa8c] sm:$0xf]  ;;  %v6323_v26 = vor.u32 %v7271_v9, %v6320_v20 }
 0x3d6   : > { %v6083_v13 = vor.u32 %v7211_v4, %v6080_v38  ;;  %v6048_v34 = vld [vmem:[%s7927_s28 + $0x958] sm:$0xf0]  ;;  %v7267_v27 = vld [vmem:[%s7927_s28 + $0xb4c] sm:$0xf] }
 0x3d7   : > { %v6176_v37 = vld [vmem:[%s7927_s28 + $0xa58] sm:$0xf0]  ;;  %v7231_v50 = vld [vmem:[%s7927_s28 + $0xa2c] sm:$0xf] }
 0x3d8   : > { %4507 = vmatpush.bf16.msra.mxu2 %v5379_v22  ;;  %4520 = vmatpush.bf16.msra.mxu3 %v5507_v23  ;;  %v7239_v22 = vld [vmem:[%s7927_s28 + $0xa6c] sm:$0xf]  ;;  %v6192_v23 = vld [vmem:[%s7927_s28 + $0xa78] sm:$0xf0] }
 0x3d9   : > { %4533 = vmatpush.bf16.msra.mxu0 %v5635_v25  ;;  %4546 = vmatpush.bf16.msra.mxu1 %v5763_v28  ;;  %v6067_v25 = vor.u32 %v7207_v21, %v6064_v59  ;;  %v7171_v28 = vld [vmem:[%s7927_s28 + $0x84c] sm:$0xf]  ;;  %v6304_v42 = vld [vmem:[%s7927_s28 + $0xb58] sm:$0xf0] }
 0x3da   : > { %v5904_v49 = vld [vmem:[%s7927_s28 + $0x838] sm:$0xf0]  ;;  %v6307_v55 = vor.u32 %v7267_v27, %v6304_v42  ;;  %v7195_v38 = vld [vmem:[%s7927_s28 + $0x90c] sm:$0xf] }
 0x3db   : > { %4508 = vmatmul.bf16.vlgmr.msra.gmra.mxu2 %v8241_v46  ;;  %4521 = vmatmul.bf16.vlgmr.msra.gmra.mxu3 %v8243_v47  ;;  %v7179_v46 = vld [vmem:[%s7927_s28 + $0x88c] sm:$0xf]  ;;  %v6227_v47 = vor.u32 %v7247_v1, %v6224_v3  ;;  %v4327_v6 = vpop.f32.mrf.mxu0  ;;  %v4340_v8 = vpop.f32.mrf.mxu1  ;;  %v6032_v3 = vld [vmem:[%s7927_s28 + $0x938] sm:$0xf0] }
 0x3dc   : > { %4552 = vmatpush.bf16.msrb.mxu2 %v6003_v29  ;;  %4565 = vmatpush.bf16.msrb.mxu3 %v6131_v30  ;;  %v5955_v12 = vor.u32 %v7179_v46, %v5952_v51  ;;  %v5920_v29 = vld [vmem:[%s7927_s28 + $0x858] sm:$0xf0]  ;;  %v6195_v30 = vor.u32 %v7239_v22, %v6192_v23  ;;  %v7199_v1 = vld [vmem:[%s7927_s28 + $0x92c] sm:$0xf] }
 0x3dd   : > { %4578 = vmatpush.bf16.msrb.mxu0 %v6259_v31  ;;  %4591 = vmatpush.bf16.msrb.mxu1 %v6387_v33  ;;  %v7203_v33 = vld [vmem:[%s7927_s28 + $0x94c] sm:$0xf]  ;;  %v5923_v45 = vor.u32 %v7171_v28, %v5920_v29  ;;  %v6288_v46 = vld [vmem:[%s7927_s28 + $0xb38] sm:$0xf0] }
 0x3de   : > { %4534 = vmatmul.bf16.vlgmr.msra.gmra.mxu0 %v8245_v48  ;;  %4547 = vmatmul.bf16.vlgmr.msra.gmra.mxu1 %v8249_v52  ;;  %v6208_v48 = vld [vmem:[%s7927_s28 + $0xa98] sm:$0xf0]  ;;  %v7275_v52 = vld [vmem:[%s7927_s28 + $0xb8c] sm:$0xf]  ;;  %v4301_v18 = vpop.f32.mrf.mxu2  ;;  %v4314_v31 = vpop.f32.mrf.mxu3 }
 0x3df   : > { %v6211_v16 = vor.u32 %v7243_v10, %v6208_v48  ;;  %v6339_v17 = vor.u32 %v7275_v52, %v6336_v11  ;;  %v4302_v36 = vadd.f32 %v4301_v18, %v9078_v58  ;;  %v6179_v58 = vor.u32 %v7235_v35, %v6176_v37  ;;  %v7163_v51 = vld [vmem:[%s7927_s28 + $0x80c] sm:$0xf]  ;;  %v5888_v4 = vld [vmem:[%s7927_s28 + $0x818] sm:$0xf0] }
 0x3e0   : > { %4553 = vmatpush.bf16.msrb.mxu2 %v5987_v43  ;;  %4566 = vmatpush.bf16.msrb.mxu3 %v6115_v39  ;;  %v6016_v10 = vld [vmem:[%s7927_s28 + $0x918] sm:$0xf0]  ;;  %v7259_v14 = vld [vmem:[%s7927_s28 + $0xb0c] sm:$0xf]  ;;  %v5891_v23 = vor.u32 %v7163_v51, %v5888_v4 }
 0x3e1   : > { %4579 = vmatpush.bf16.msrb.mxu0 %v6243_v40  ;;  %4592 = vmatpush.bf16.msrb.mxu1 %v6371_v54  ;;  %v4315_v43 = vadd.f32 %v4314_v31, %v4302_v36  ;;  %v6051_v40 = vor.u32 %v7203_v33, %v6048_v34  ;;  %v7167_v54 = vld [vmem:[%s7927_s28 + $0x82c] sm:$0xf]  ;;  %v6144_v15 = vld [vmem:[%s7927_s28 + $0xa18] sm:$0xf0]  ;;  %v6019_v9 = vor.u32 %v7195_v38, %v6016_v10 }
 0x3e2   : > { %v6512_v21 = vld [vmem:[%s7927_s28 + $0xcf8] sm:$0xf0]  ;;  %v7351_v59 = vld [vmem:[%s7927_s28 + $0xdec] sm:$0xf] }
 0x3e3   : > { %v4329_v39 = vpop.f32.mrf.mxu0  ;;  %v4342_v32 = vpop.f32.mrf.mxu1  ;;  %v4328_v60 = vadd.f32 %v4327_v6, %v4315_v43  ;;  %v6640_v22 = vld [vmem:[%s7927_s28 + $0xdf8] sm:$0xf0]  ;;  %v7315_v18 = vld [vmem:[%s7927_s28 + $0xccc] sm:$0xf] }
 0x3e4   : > { %4554 = vmatpush.bf16.msrb.mxu2 %v5971_v41  ;;  %4567 = vmatpush.bf16.msrb.mxu3 %v6099_v61  ;;  %v6160_v41 = vld [vmem:[%s7927_s28 + $0xa38] sm:$0xf0]  ;;  %v7263_v61 = vld [vmem:[%s7927_s28 + $0xb2c] sm:$0xf] }
 0x3e5   : > { %4580 = vmatpush.bf16.msrb.mxu0 %v6227_v47  ;;  %4593 = vmatpush.bf16.msrb.mxu1 %v6355_v62  ;;  %v5907_v47 = vor.u32 %v7167_v54, %v5904_v49  ;;  %v6035_v62 = vor.u32 %v7199_v1, %v6032_v3  ;;  %v9149_v48 = vadd.f32 %v4340_v8, %v4328_v60  ;;  %v7383_v8 = vld [vmem:[%s7927_s28 + $0xeec] sm:$0xf]  ;;  %v6768_v20 = vld [vmem:[%s7927_s28 + $0xef8] sm:$0xf0] }
 0x3e6   : > { %v6163_v52 = vor.u32 %v7231_v50, %v6160_v41  ;;  %v6291_v11 = vor.u32 %v7263_v61, %v6288_v46  ;;  %v4303_v6 = vpop.f32.mrf.mxu2  ;;  %v6496_v31 = vld [vmem:[%s7927_s28 + $0xcd8] sm:$0xf0]  ;;  %v6771_v33 = vor.u32 %v7383_v8, %v6768_v20  ;;  %v7347_v35 = vld [vmem:[%s7927_s28 + $0xdcc] sm:$0xf] }
 0x3e7   : > { %v6624_v36 = vld [vmem:[%s7927_s28 + $0xdd8] sm:$0xf0]  ;;  %v7379_v37 = vld [vmem:[%s7927_s28 + $0xecc] sm:$0xf]  ;;  %v6499_v39 = vor.u32 %v7315_v18, %v6496_v31 }
 0x3e8   : > { %4555 = vmatpush.bf16.msrb.mxu2 %v5955_v12  ;;  %4568 = vmatpush.bf16.msrb.mxu3 %v6083_v13  ;;  %v4316_v12 = vpop.f32.mrf.mxu3  ;;  %v7227_v13 = vld [vmem:[%s7927_s28 + $0xa0c] sm:$0xf]  ;;  %v6752_v27 = vld [vmem:[%s7927_s28 + $0xed8] sm:$0xf0]  ;;  %v6627_v32 = vor.u32 %v7347_v35, %v6624_v36 }
 0x3e9   : > { %4581 = vmatpush.bf16.msrb.mxu0 %v6211_v16  ;;  %4594 = vmatpush.bf16.msrb.mxu1 %v6339_v17  ;;  %v6272_v16 = vld [vmem:[%s7927_s28 + $0xb18] sm:$0xf0]  ;;  %v7319_v17 = vld [vmem:[%s7927_s28 + $0xcec] sm:$0xf]  ;;  %v6147_v28 = vor.u32 %v7227_v13, %v6144_v15  ;;  %v6755_v54 = vor.u32 %v7379_v37, %v6752_v27 }
 0x3ea   : > { %v6275_v29 = vor.u32 %v7259_v14, %v6272_v16  ;;  %v7411_v42 = vld [vmem:[%s7927_s28 + $0xfcc] sm:$0xf]  ;;  %v6880_v43 = vld [vmem:[%s7927_s28 + $0xfd8] sm:$0xf0] }
 0x3eb   : > { %v6883_v49 = vor.u32 %v7411_v42, %v6880_v43  ;;  %v7375_v1 = vld [vmem:[%s7927_s28 + $0xeac] sm:$0xf]  ;;  %v6736_v3 = vld [vmem:[%s7927_s28 + $0xeb8] sm:$0xf0] }
 0x3ec   : > { %4556 = vmatpush.bf16.msrb.mxu2 %v5939_v7  ;;  %4569 = vmatpush.bf16.msrb.mxu3 %v6067_v25  ;;  %v7415_v7 = vld [vmem:[%s7927_s28 + $0xfec] sm:$0xf]  ;;  %v6896_v25 = vld [vmem:[%s7927_s28 + $0xff8] sm:$0xf0] }
 0x3ed   : > { %4582 = vmatpush.bf16.msrb.mxu0 %v6195_v30  ;;  %4595 = vmatpush.bf16.msrb.mxu1 %v6323_v26  ;;  %v6515_v30 = vor.u32 %v7319_v17, %v6512_v21  ;;  %v6643_v26 = vor.u32 %v7351_v59, %v6640_v22  ;;  %v6899_v34 = vor.u32 %v7415_v7, %v6896_v25  ;;  %v7407_v50 = vld [vmem:[%s7927_s28 + $0xfac] sm:$0xf]  ;;  %v6864_v60 = vld [vmem:[%s7927_s28 + $0xfb8] sm:$0xf0] }
 0x3ee   : > { %v6464_v46 = vld [vmem:[%s7927_s28 + $0xc98] sm:$0xf0]  ;;  %v6867_v51 = vor.u32 %v7407_v50, %v6864_v60  ;;  %v7371_v4 = vld [vmem:[%s7927_s28 + $0xe8c] sm:$0xf] }
 0x3ef   : > { %v6848_v38 = vld [vmem:[%s7927_s28 + $0xf98] sm:$0xf0]  ;;  %v7303_v12 = vld [vmem:[%s7927_s28 + $0xc6c] sm:$0xf] }
 0x3f0   : > { %4557 = vmatpush.bf16.msrb.mxu2 %v5923_v45  ;;  %4570 = vmatpush.bf16.msrb.mxu3 %v6051_v40  ;;  %v7311_v45 = vld [vmem:[%s7927_s28 + $0xcac] sm:$0xf]  ;;  %v6480_v40 = vld [vmem:[%s7927_s28 + $0xcb8] sm:$0xf0] }
 0x3f1   : > { %4583 = vmatpush.bf16.msrb.mxu0 %v6179_v58  ;;  %4596 = vmatpush.bf16.msrb.mxu1 %v6307_v55  ;;  %v7343_v58 = vld [vmem:[%s7927_s28 + $0xdac] sm:$0xf]  ;;  %v6608_v55 = vld [vmem:[%s7927_s28 + $0xdb8] sm:$0xf0]  ;;  %v6483_v41 = vor.u32 %v7311_v45, %v6480_v40 }
 0x3f2   : > { %v6611_v61 = vor.u32 %v7343_v58, %v6608_v55  ;;  %v6448_v13 = vld [vmem:[%s7927_s28 + $0xc78] sm:$0xf0]  ;;  %v7335_v16 = vld [vmem:[%s7927_s28 + $0xd6c] sm:$0xf] }
 0x3f3   : > { %v6576_v17 = vld [vmem:[%s7927_s28 + $0xd78] sm:$0xf0]  ;;  %v7367_v21 = vld [vmem:[%s7927_s28 + $0xe6c] sm:$0xf] }
 0x3f4   : > { %4558 = vmatpush.bf16.msrb.mxu2 %v5907_v47  ;;  %4571 = vmatpush.bf16.msrb.mxu3 %v6035_v62  ;;  %v7339_v47 = vld [vmem:[%s7927_s28 + $0xd8c] sm:$0xf]  ;;  %v6592_v62 = vld [vmem:[%s7927_s28 + $0xd98] sm:$0xf0] }
 0x3f5   : > { %4584 = vmatpush.bf16.msrb.mxu0 %v6163_v52  ;;  %4597 = vmatpush.bf16.msrb.mxu1 %v6291_v11  ;;  %v6595_v6 = vor.u32 %v7339_v47, %v6592_v62  ;;  %v6704_v59 = vld [vmem:[%s7927_s28 + $0xe78] sm:$0xf0]  ;;  %v7399_v22 = vld [vmem:[%s7927_s28 + $0xf6c] sm:$0xf] }
 0x3f6   : > { %v6832_v8 = vld [vmem:[%s7927_s28 + $0xf78] sm:$0xf0]  ;;  %v7299_v20 = vld [vmem:[%s7927_s28 + $0xc4c] sm:$0xf]  ;;  %v6707_v25 = vor.u32 %v7367_v21, %v6704_v59 }
 0x3f7   : > { %v6432_v7 = vld [vmem:[%s7927_s28 + $0xc58] sm:$0xf0]  ;;  %v7363_v31 = vld [vmem:[%s7927_s28 + $0xe4c] sm:$0xf] }
 0x3f8   : > { %4559 = vmatpush.bf16.msrb.mxu2 %v5891_v23  ;;  %4572 = vmatpush.bf16.msrb.mxu3 %v6019_v9  ;;  %v6451_v23 = vor.u32 %v7303_v12, %v6448_v13  ;;  %v6579_v9 = vor.u32 %v7335_v16, %v6576_v17  ;;  %v6560_v18 = vld [vmem:[%s7927_s28 + $0xd58] sm:$0xf0]  ;;  %v7395_v35 = vld [vmem:[%s7927_s28 + $0xf4c] sm:$0xf]  ;;  %v6435_v43 = vor.u32 %v7299_v20, %v6432_v7 }
 0x3f9   : > { %4585 = vmatpush.bf16.msrb.mxu0 %v6147_v28  ;;  %4598 = vmatpush.bf16.msrb.mxu1 %v6275_v29  ;;  %v6835_v28 = vor.u32 %v7399_v22, %v6832_v8  ;;  %v6816_v36 = vld [vmem:[%s7927_s28 + $0xf58] sm:$0xf0]  ;;  %v7359_v58 = vld [vmem:[%s7927_s28 + $0xe2c] sm:$0xf] }
 0x3fa   : > { %v6416_v45 = vld [vmem:[%s7927_s28 + $0xc38] sm:$0xf0]  ;;  %v6819_v40 = vor.u32 %v7395_v35, %v6816_v36 }
 0x3fb   : > { %4560 = vmatmul.bf16.vlgmr.msrb.gmra.mxu2 %v8293_v63  ;;  %4573 = vmatmul.bf16.vlgmr.msrb.gmra.mxu3 %v8295_v0  ;;  %v7307_v63 = vld [vmem:[%s7927_s28 + $0xc8c] sm:$0xf]  ;;  %v6739_v0 = vor.u32 %v7375_v1, %v6736_v3  ;;  %v4379_v10 = vpop.f32.mrf.mxu0  ;;  %v4392_v52 = vpop.f32.mrf.mxu1  ;;  %v6672_v1 = vld [vmem:[%s7927_s28 + $0xe38] sm:$0xf0] }
 0x3fc   : > { %4604 = vmatpush.bf16.msra.mxu2 %v6515_v30  ;;  %4617 = vmatpush.bf16.msra.mxu3 %v6643_v26  ;;  %v6467_v11 = vor.u32 %v7307_v63, %v6464_v46  ;;  %v7331_v26 = vld [vmem:[%s7927_s28 + $0xd4c] sm:$0xf]  ;;  %v6800_v50 = vld [vmem:[%s7927_s28 + $0xf38] sm:$0xf0] }
 0x3fd   : > { %4630 = vmatpush.bf16.msra.mxu0 %v6771_v33  ;;  %4643 = vmatpush.bf16.msra.mxu1 %v6899_v34  ;;  %v6688_v34 = vld [vmem:[%s7927_s28 + $0xe58] sm:$0xf0]  ;;  %v7391_v3 = vld [vmem:[%s7927_s28 + $0xf2c] sm:$0xf] }
 0x3fe   : > { %4586 = vmatmul.bf16.vlgmr.msrb.gmra.mxu0 %v8297_v2  ;;  %4599 = vmatmul.bf16.vlgmr.msrb.gmra.mxu1 %v8301_v5  ;;  %v6720_v2 = vld [vmem:[%s7927_s28 + $0xe98] sm:$0xf0]  ;;  %v7403_v5 = vld [vmem:[%s7927_s28 + $0xf8c] sm:$0xf]  ;;  %v4353_v29 = vpop.f32.mrf.mxu2  ;;  %v4366_v30 = vpop.f32.mrf.mxu3 }
 0x3ff   : > { %v6723_v15 = vor.u32 %v7371_v4, %v6720_v2  ;;  %v6851_v14 = vor.u32 %v7403_v5, %v6848_v38  ;;  %v4354_v33 = vadd.f32 %v4353_v29, %v9149_v48  ;;  %v6691_v48 = vor.u32 %v7363_v31, %v6688_v34  ;;  %v6400_v63 = vld [vmem:[%s7927_s28 + $0xc18] sm:$0xf0]  ;;  %v7323_v4 = vld [vmem:[%s7927_s28 + $0xd0c] sm:$0xf] }
 0x400   : > { %4605 = vmatpush.bf16.msra.mxu2 %v6499_v39  ;;  %4618 = vmatpush.bf16.msra.mxu3 %v6627_v32  ;;  %v6563_v39 = vor.u32 %v7331_v26, %v6560_v18  ;;  %v7295_v32 = vld [vmem:[%s7927_s28 + $0xc2c] sm:$0xf]  ;;  %v6528_v2 = vld [vmem:[%s7927_s28 + $0xd18] sm:$0xf0] }
 0x401   : > { %4631 = vmatpush.bf16.msra.mxu0 %v6755_v54  ;;  %4644 = vmatpush.bf16.msra.mxu1 %v6883_v49  ;;  %v4367_v37 = vadd.f32 %v4366_v30, %v4354_v33  ;;  %v7327_v54 = vld [vmem:[%s7927_s28 + $0xd2c] sm:$0xf]  ;;  %v6544_v49 = vld [vmem:[%s7927_s28 + $0xd38] sm:$0xf0]  ;;  %v6419_v60 = vor.u32 %v7295_v32, %v6416_v45  ;;  %v6531_v12 = vor.u32 %v7323_v4, %v6528_v2 }
 0x402   : > { %v7355_v5 = vld [vmem:[%s7927_s28 + $0xe0c] sm:$0xf]  ;;  %v6656_v38 = vld [vmem:[%s7927_s28 + $0xe18] sm:$0xf0] }
 0x403   : > { %v4381_v27 = vpop.f32.mrf.mxu0  ;;  %v4394_v42 = vpop.f32.mrf.mxu1  ;;  %v4380_v55 = vadd.f32 %v4379_v10, %v4367_v37  ;;  %v7387_v10 = vld [vmem:[%s7927_s28 + $0xf0c] sm:$0xf]  ;;  %v6659_v13 = vor.u32 %v7355_v5, %v6656_v38 }
 0x404   : > { %4606 = vmatpush.bf16.msra.mxu2 %v6483_v41  ;;  %4619 = vmatpush.bf16.msra.mxu3 %v6611_v61  ;;  %v6547_v41 = vor.u32 %v7327_v54, %v6544_v49  ;;  %v7291_v61 = vld [vmem:[%s7927_s28 + $0xc0c] sm:$0xf] }
 0x405   : > { %4632 = vmatpush.bf16.msra.mxu0 %v6739_v0  ;;  %4645 = vmatpush.bf16.msra.mxu1 %v6867_v51  ;;  %v4393_v46 = vadd.f32 %v4392_v52, %v4380_v55  ;;  %v6675_v0 = vor.u32 %v7359_v58, %v6672_v1  ;;  %v6803_v51 = vor.u32 %v7391_v3, %v6800_v50 }
 0x406   : > { %v4355_v47 = vpop.f32.mrf.mxu2  ;;  %v4368_v62 = vpop.f32.mrf.mxu3 }
 0x408   : > { %4607 = vmatpush.bf16.msra.mxu2 %v6467_v11  ;;  %4620 = vmatpush.bf16.msra.mxu3 %v6595_v6  ;;  %v6784_v11 = vld [vmem:[%s7927_s28 + $0xf18] sm:$0xf0]  ;;  %v6403_v6 = vor.u32 %v7291_v61, %v6400_v63  ;;  %s4829_s28 = sshll.u32 %s7924_s18, 3 }
 0x409   : > { %4633 = vmatpush.bf16.msra.mxu0 %v6723_v15  ;;  %4646 = vmatpush.bf16.msra.mxu1 %v6851_v14  ;;  %v6787_v52 = vor.u32 %v7387_v10, %v6784_v11  ;;  %s353_s15 = scalar_lea.vmem [#allocation12], %s4829_s28 }
 0x40a   : > { %s4688_s21 = sshll.u32 %s353_s15, 4  ;;  %s4689_s21 = int_to_ptr.vmem [resolvable:$true] %s4688_s21 }
 0x40c   : > { %4608 = vmatpush.bf16.msra.mxu2 %v6451_v23  ;;  %4621 = vmatpush.bf16.msra.mxu3 %v6579_v9 }
 0x40d   : > { %4634 = vmatpush.bf16.msra.mxu0 %v6707_v25  ;;  %4647 = vmatpush.bf16.msra.mxu1 %v6835_v28 }
 0x410   : > { %4609 = vmatpush.bf16.msra.mxu2 %v6435_v43  ;;  %4622 = vmatpush.bf16.msra.mxu3 %v6563_v39 }
 0x411   : > { %4635 = vmatpush.bf16.msra.mxu0 %v6691_v48  ;;  %4648 = vmatpush.bf16.msra.mxu1 %v6819_v40 }
 0x414   : > { %4610 = vmatpush.bf16.msra.mxu2 %v6419_v60  ;;  %4623 = vmatpush.bf16.msra.mxu3 %v6547_v41 }
 0x415   : > { %4636 = vmatpush.bf16.msra.mxu0 %v6675_v0  ;;  %4649 = vmatpush.bf16.msra.mxu1 %v6803_v51 }
 0x418   : > { %4611 = vmatpush.bf16.msra.mxu2 %v6403_v6  ;;  %4624 = vmatpush.bf16.msra.mxu3 %v6531_v12 }
 0x419   : > { %4637 = vmatpush.bf16.msra.mxu0 %v6659_v13  ;;  %4650 = vmatpush.bf16.msra.mxu1 %v6787_v52 }
 0x41b   : > { %4612 = vmatmul.bf16.vlgmr.msra.gmra.mxu2 %v8369_v53  ;;  %4625 = vmatmul.bf16.vlgmr.msra.gmra.mxu3 %v8371_v56  ;;  %v4431_v15 = vpop.f32.mrf.mxu0  ;;  %v4444_v14 = vpop.f32.mrf.mxu1  ;;  %v1259_v56 = vperm.slane %v9054_v19, 3 }
 0x41c   : > { %4638 = vmatmul.bf16.vlgmr.msra.gmra.mxu0 %v8373_v57  ;;  %4651 = vmatmul.bf16.vlgmr.msra.gmra.mxu1 %v8377_v44 }
 0x41e   : > { %v4405_v16 = vpop.f32.mrf.mxu2  ;;  %v4418_v17 = vpop.f32.mrf.mxu3 }
 0x41f   : > { %v4406_v21 = vadd.f32 %v4405_v16, %v4393_v46 }
 0x421   : > { %v4419_v59 = vadd.f32 %v4418_v17, %v4406_v21 }
 0x423   : > { %v4433_v22 = vpop.f32.mrf.mxu0  ;;  %v4446_v8 = vpop.f32.mrf.mxu1  ;;  %v4432_v23 = vadd.f32 %v4431_v15, %v4419_v59 }
 0x425   : > { %v4445_v9 = vadd.f32 %v4444_v14, %v4432_v23 }
 0x426   : > { %v4407_v20 = vpop.f32.mrf.mxu2  ;;  %v4420_v7 = vpop.f32.mrf.mxu3 }
 0x427   : > { %v4658_v11 = vmax.f32 %v4445_v9, 0.0 }
 0x429   : > { %v4665_v15 = vrot.slane %v4658_v11, 4 }
 0x43b   : > { %v4483_v25 = vpop.f32.mrf.mxu0  ;;  %v4496_v53 = vpop.f32.mrf.mxu1 }
 0x43e   : > { %v4457_v28 = vpop.f32.mrf.mxu2  ;;  %v4470_v57 = vpop.f32.mrf.mxu3 }
 0x43f   : > { %v4458_v29 = vadd.f32 %v4457_v28, %v1259_v56 }
 0x441   : > { %v4471_v44 = vadd.f32 %v4470_v57, %v4458_v29 }
 0x443   : > { %v4485_v30 = vpop.f32.mrf.mxu0  ;;  %v4498_v26 = vpop.f32.mrf.mxu1  ;;  %v4484_v18 = vadd.f32 %v4483_v25, %v4471_v44 }
 0x445   : > { %v4497_v31 = vadd.f32 %v4496_v53, %v4484_v18 }
 0x446   : > { %v4459_v33 = vpop.f32.mrf.mxu2  ;;  %v4472_v34 = vpop.f32.mrf.mxu3 }
 0x45b   : > { %v4535_v35 = vpop.f32.mrf.mxu0  ;;  %v4548_v36 = vpop.f32.mrf.mxu1 }
 0x45e   : > { %v4509_v37 = vpop.f32.mrf.mxu2  ;;  %v4522_v27 = vpop.f32.mrf.mxu3 }
 0x45f   : > { %v4510_v54 = vadd.f32 %v4509_v37, %v4497_v31 }
 0x461   : > { %v4523_v55 = vadd.f32 %v4522_v27, %v4510_v54 }
 0x463   : > { %v4537_v42 = vpop.f32.mrf.mxu0  ;;  %v4550_v43 = vpop.f32.mrf.mxu1  ;;  %v4536_v50 = vadd.f32 %v4535_v35, %v4523_v55 }
 0x465   : > { %v4549_v60 = vadd.f32 %v4548_v36, %v4536_v50 }
 0x466   : > { %v4511_v39 = vpop.f32.mrf.mxu2  ;;  %v4524_v32 = vpop.f32.mrf.mxu3 }
 0x47b   : > { %v4587_v45 = vpop.f32.mrf.mxu0  ;;  %v4600_v19 = vpop.f32.mrf.mxu1 }
 0x47e   : > { %v4561_v48 = vpop.f32.mrf.mxu2  ;;  %v4574_v40 = vpop.f32.mrf.mxu3 }
 0x47f   : > { %v4562_v41 = vadd.f32 %v4561_v48, %v4549_v60 }
 0x481   : > { %v4575_v61 = vadd.f32 %v4574_v40, %v4562_v41 }
 0x483   : > { %v4589_v49 = vpop.f32.mrf.mxu0  ;;  %v4602_v58 = vpop.f32.mrf.mxu1  ;;  %v4588_v63 = vadd.f32 %v4587_v45, %v4575_v61 }
 0x485   : > { %v4601_v51 = vadd.f32 %v4600_v19, %v4588_v63 }
 0x486   : > { %v4563_v1 = vpop.f32.mrf.mxu2  ;;  %v4576_v3 = vpop.f32.mrf.mxu3 }
 0x499   : > { %v4639_v46 = vpop.f32.mrf.mxu0  ;;  %v4652_v0 = vpop.f32.mrf.mxu1 }
 0x49e   : > { %v4613_v47 = vpop.f32.mrf.mxu2  ;;  %v4626_v62 = vpop.f32.mrf.mxu3 }
 0x49f   : > { %v4614_v4 = vadd.f32 %v4613_v47, %v4601_v51 }
 0x4a1   : > { %v4627_v2 = vadd.f32 %v4626_v62, %v4614_v4  ;;  %v4641_v5 = vpop.f32.mrf.mxu0  ;;  %v4654_v38 = vpop.f32.mrf.mxu1 }
 0x4a3   : > { %v4640_v10 = vadd.f32 %v4639_v46, %v4627_v2 }
 0x4a5   : > { %v4653_v6 = vadd.f32 %v4652_v0, %v4640_v10 }
 0x4a6   : > { %v4615_v12 = vpop.f32.mrf.mxu2  ;;  %v4628_v13 = vpop.f32.mrf.mxu3 }
 0x4a7   : > { %v4659_v52 = vmax.f32 %v4653_v6, 0.0 }
 0x4a9   : > { %v4666_v14 = vrot.slane %v4659_v52, 2 }
 0x4ab   : > { %v4670_v16 = vsel %vm4669_vm3, %v4665_v15, %v4666_v14 }
 0x4ac   : > { %v4671_v17 = vsel %vm451_vm0, %v9013_v24, %v4670_v16 }
 0x4ad   : > { %4673 = vst [vmem:[%s353_s15] sm:$0xff] %v4671_v17 }
 0x4ae   : > { %7684 = shalt.err (!%p7681_p10)
}
 0x4af   : > { %7435 = dma.vmem_to_hbm [thread:$0]  (%p7827_p11), %s4689_s21, 128, %s4691_s4, %s4675_s25  }
 0x4b0 PF: > { %s9300_s18 = sld [smem:[#allocation17_spill]]  ;;  %p9302_p0 = scmp.ge.s32.totalorder %s7731_s24, 2 }
 0x4b2   : > { %p7455_p8 = pnand %p9302_p0, %p7831_p12 }
 0x4b4   : > { %p7456_p3 = pneg %p7455_p8 }
 0x4b6   : > { %s4702_s2 = sand.u32 1, %s9300_s18  }
 0x4b7   : > { %s4703_s30 = scalar_lea.sflag [#allocation5], %s4702_s2 }
 0x4b8   : > { %7714 = dma.done.wait (%p7456_p3), %s4703_s30, 128  }
 0x4b9   : > { %7716 = vsyncadd (%p7456_p3), %s4703_s30, 4294967168  ;;  %s9303_s24 = sld [smem:[#allocation18_spill]]  ;;  %s9305_s21 = smov %s7723_s22 }
 0x4ba   : > { %s9304_s19 = sld [smem:[#allocation19_spill]]  ;;  %s9306_s22 = smov %s7727_s23 }
 0x4bf   : > { %p21_p4 = scmp.ge.s32.totalorder %s9303_s24, 4  }
 0x4c0   : > { %s9307_s23 = smov %s9304_s19 }
 0x4c1   :  { %23 = sbr.rel (!%p21_p4) target bundleno = 11 (0xb), region = 138 }
 0x4c6   :  { %4709 = vsyncpa [#allocation4], 1 }
 0x4c7   :  { %4711 = vsyncpa [#allocation4 + $0x1], 1 }
 0x4c8   :  { %4712 = vsyncpa [#allocation7], 1 }
 0x4c9   :  { %4713 = vsyncpa [#allocation10], 1 }
 0x4ca   :  { %4715 = vsyncpa [#allocation10 + $0x1], 1 }
 0x4cb   :  { %4716 = vsyncpa [#allocation5], 1 }
 0x4cc   :  { %4718 = vsyncpa [#allocation5 + $0x1], 1 }

</bundles_post_ra>
